<compile_context>
chip_gen: v7x
topology: tpu7x:2x2x1
jax: 0.10.0
libtpu: 0.0.40
codegen_flags: <defaults>
</compile_context>

<pallas_src>
import math
import functools

import jax
import jax.numpy as jnp
from jax import lax
from jax.experimental import pallas as pl
from jax.experimental.pallas import tpu as pltpu

EPS = 1e-5  # torch LayerNorm default


# ----------------------------- shared numerics --------------------------------

def _layernorm(x, gamma, beta):
    mu = jnp.mean(x, axis=-1, keepdims=True)
    var = jnp.mean((x - mu) ** 2, axis=-1, keepdims=True)
    return (x - mu) * lax.rsqrt(var + EPS) * gamma + beta


# ------------------------------- Pallas kernel ---------------------------------

def _block_kernel(n_layers, n_heads, pos_all, mm_dtype,
                  x_ref, pe_ref,
                  ln1_g_ref, ln1_b_ref,
                  wq_ref, bq_ref, wk_ref, bk_ref, wv_ref, bv_ref,
                  wo_ref, bo_ref,
                  ln2_g_ref, ln2_b_ref, w1_ref, b1_ref, w2_ref, b2_ref,
                  lnf_g_ref, lnf_b_ref, projw_ref,
                  o_ref):
    """Whole Block forward for a (Bc, T, C) batch block: L pre-LN layers + final LN + proj."""
    bc, T, C = x_ref.shape
    S = bc * T

    def mm(a, b):
        # operands optionally cast (bf16 at realistic sizes); accumulate in f32
        return jnp.dot(a.astype(mm_dtype), b.astype(mm_dtype),
                       preferred_element_type=jnp.float32)

    def mm_tb(a, b):
        # contraction over the last dim of BOTH operands == a @ b.T without an XLU transpose
        return lax.dot_general(a.astype(mm_dtype), b.astype(mm_dtype),
                               (((1,), (1,)), ((), ())),
                               preferred_element_type=jnp.float32)

    x = x_ref[...].reshape(S, C).astype(jnp.float32)       # (Bc*T, C) token slab

    for l in range(n_layers):                               # static unrolled layer loop (L=2)
        if l == 0 or pos_all:                                # PE specialized statically
            x = x + pe_ref[...]

        # ---- self-attention (pre-LN), per-head weights (no lane slicing) ----
        h = _layernorm(x, ln1_g_ref[l], ln1_b_ref[l])
        att = jnp.zeros((S, C), jnp.float32)
        for hd in range(n_heads):                            # static head loop
            q_h = mm(h, wq_ref[l, hd]) + bq_ref[l, hd]       # (S, Dh); 1/sqrt(Dh) pre-folded
            k_h = mm(h, wk_ref[l, hd]) + bk_ref[l, hd]       # (S, Dh)
            v_h = mm(h, wv_ref[l, hd]) + bv_ref[l, hd]       # (S, Dh)
            parts = []
            for bi in range(bc):                             # static per-sequence loop
                r0 = bi * T                                  # sublane slice, multiple of 8
                s = mm_tb(q_h[r0:r0 + T], k_h[r0:r0 + T])    # (T, T) scores
                s = s - jnp.max(s, axis=-1, keepdims=True)
                p = jnp.exp(s)
                p = p / jnp.sum(p, axis=-1, keepdims=True)   # exact normalization
                parts.append(mm(p, v_h[r0:r0 + T]))          # (T, Dh)
            oh = parts[0] if bc == 1 else jnp.concatenate(parts, axis=0)
            # accumulate through this head's (Dh, C) slab of Wo  (== concat(heads) @ Wo)
            att = att + mm(oh, wo_ref[l, hd])
        x = x + att + bo_ref[l]

        # ---- MLP (pre-LN) ----
        h2 = _layernorm(x, ln2_g_ref[l], ln2_b_ref[l])
        m = mm(h2, w1_ref[l]) + b1_ref[l]
        # TODO(synk): torch nn.GELU default is exact erf-GELU; tanh approximation used here.
        m = jax.nn.gelu(m, approximate=True)
        m = mm(m, w2_ref[l]) + b2_ref[l]
        x = x + m

    # ---- final LayerNorm + bias-free projection ----
    hf = _layernorm(x, lnf_g_ref[...], lnf_b_ref[...])
    y = mm(hf, projw_ref[...])
    o_ref[...] = y.reshape(bc, T, C).astype(o_ref.dtype)


# --------------------------------- wrapper --------------------------------------

def _full_spec(arr):
    nd = arr.ndim
    return pl.BlockSpec(arr.shape, lambda b, _nd=nd: (0,) * _nd)


def block_forward(x, kparams, n_heads, block_size, pos_all=False,
                  num_batch_blocks=2, matmul_dtype=jnp.float32):
    """Forward of Block. `kparams` must come from prepare_params (per-head layout).

    num_batch_blocks: grid steps over the batch. 2 keeps both v7x TensorCores busy;
    use 1 on single-TC v5e/v6e to fold the whole batch into one fat step.
    matmul_dtype: set jnp.bfloat16 at realistic C/T for MXU-native matmuls.
    """
    assert x is not None, "Input tensor is None"
    if x.ndim == 2:
        x = x[None]
    B, T, C = x.shape
    mask = None
    # down_conv / up_conv disabled (config.down_conv / config.up_conv not set)
    # dropout: eval mode -> identity
    if num_batch_blocks < 1 or B % num_batch_blocks != 0:
        num_batch_blocks = B
    bc = B // num_batch_blocks

    pe = sinusoidal_pe(block_size, C)[:T]
    pe_block = jnp.tile(pe, (bc, 1))                     # (bc*T, C), built once on the wrapper side

    n_layers = kparams["wq"].shape[0]

    order = ("ln1_g", "ln1_b", "wq", "bq", "wk", "bk", "wv", "bv", "wo", "bo",
             "ln2_g", "ln2_b", "w1", "b1", "w2", "b2", "ln_g", "ln_b", "proj_w")
    param_list = tuple(kparams[k] for k in order)

    kernel = functools.partial(_block_kernel, n_layers, n_heads, bool(pos_all), matmul_dtype)
    logits = pl.pallas_call(
        kernel,
        out_shape=jax.ShapeDtypeStruct((B, T, C), x.dtype),
        grid=(num_batch_blocks,),
        in_specs=[pl.BlockSpec((bc, T, C), lambda b: (b, 0, 0)), _full_spec(pe_block)]
                 + [_full_spec(p) for p in param_list],
        out_specs=pl.BlockSpec((bc, T, C), lambda b: (b, 0, 0)),
        compiler_params=pltpu.CompilerParams(
            # batch axis is independent -> shardable across v7x's 2 TensorCores
            dimension_semantics=("parallel",),
        ),
    )(x, pe_block, *param_list)
    return logits, mask


# ------------------- parameter preparation (one-time, host side) ----------------

def prepare_params(params, n_heads):
    """Convert checkpoint-layout params to the kernel layout.

    - splits fused Wqkv into per-head wq/wk/wv of shape (L, H, C, Dh) so the kernel
      only indexes leading dims (no lane-dim slicing at runtime),
    - reshapes Wo to (L, H, Dh, C) for per-head output accumulation,
    - folds the 1/sqrt(Dh) attention scale into Wq and bq.
    """
    wqkv, bqkv = params["wqkv"], params["bqkv"]
    L, C, _ = wqkv.shape
    H = n_heads
    Dh = C // H
    scale = 1.0 / math.sqrt(Dh)

    def split_w(w):   # (L, C, C) -> (L, H, C, Dh)
        return w.reshape(L, C, H, Dh).transpose(0, 2, 1, 3)

    def split_b(b):   # (L, 1, C) -> (L, H, 1, Dh)
        return b.reshape(L, 1, H, Dh).transpose(0, 2, 1, 3)

    return dict(
        ln1_g=params["ln1_g"], ln1_b=params["ln1_b"],
        wq=split_w(wqkv[:, :, 0 * C:1 * C]) * scale,
        bq=split_b(bqkv[:, :, 0 * C:1 * C]) * scale,
        wk=split_w(wqkv[:, :, 1 * C:2 * C]),
        bk=split_b(bqkv[:, :, 1 * C:2 * C]),
        wv=split_w(wqkv[:, :, 2 * C:3 * C]),
        bv=split_b(bqkv[:, :, 2 * C:3 * C]),
        wo=params["wo"].reshape(L, H, Dh, C), bo=params["bo"],
        ln2_g=params["ln2_g"], ln2_b=params["ln2_b"],
        w1=params["w1"], b1=params["b1"], w2=params["w2"], b2=params["b2"],
        ln_g=params["ln_g"], ln_b=params["ln_b"], proj_w=params["proj_w"],
    )


# ------------------------- parameters / positional enc --------------------------

def sinusoidal_pe(max_len, dim):
    # matches PositionalEncoding(type='sine_frozen') for even dim
    pos = jnp.arange(max_len, dtype=jnp.float32)[:, None]
    div = jnp.exp(jnp.arange(0, dim, 2, dtype=jnp.float32) * (-math.log(10000.0) / dim))
    pe = jnp.zeros((max_len, dim), jnp.float32)
    pe = pe.at[:, 0::2].set(jnp.sin(pos * div))
    pe = pe.at[:, 1::2].set(jnp.cos(pos * div))
    return pe


def init_params(key, n_layers, C, n_heads):
    std = 0.02
    ks = jax.random.split(key, n_layers * 4 + 1)
    wqkv, wo, w1, w2 = [], [], [], []
    for i in range(n_layers):
        k = ks[i * 4:(i + 1) * 4]
        wqkv.append(std * jax.random.normal(k[0], (C, 3 * C)))
        wo.append(std * jax.random.normal(k[1], (C, C)))
        w1.append(std * jax.random.normal(k[2], (C, 4 * C)))
        w2.append(std * jax.random.normal(k[3], (4 * C, C)))
    L = n_layers
    return dict(
        ln1_g=jnp.ones((L, 1, C)), ln1_b=jnp.zeros((L, 1, C)),
        wqkv=jnp.stack(wqkv), bqkv=jnp.zeros((L, 1, 3 * C)),
        wo=jnp.stack(wo), bo=jnp.zeros((L, 1, C)),
        ln2_g=jnp.ones((L, 1, C)), ln2_b=jnp.zeros((L, 1, C)),
        w1=jnp.stack(w1), b1=jnp.zeros((L, 1, 4 * C)),
        w2=jnp.stack(w2), b2=jnp.zeros((L, 1, C)),
        ln_g=jnp.ones((1, C)), ln_b=jnp.zeros((1, C)),
        proj_w=std * jax.random.normal(ks[-1], (C, C)),
    )


# --------------------------- pure-JAX reference (check) -------------------------

def block_forward_ref(x, params, n_heads, block_size, pos_all=False):
    B, T, C = x.shape
    Dh = C // n_heads
    pe = sinusoidal_pe(block_size, C)[:T]
    scale = 1.0 / math.sqrt(Dh)
    L = params["wqkv"].shape[0]
    for i in range(L):
        if i == 0 or pos_all:
            x = x + pe
        h = _layernorm(x, params["ln1_g"][i], params["ln1_b"][i])
        qkv = h @ params["wqkv"][i] + params["bqkv"][i]
        q, k, v = qkv[..., :C], qkv[..., C:2 * C], qkv[..., 2 * C:]
        q = q.reshape(B, T, n_heads, Dh).transpose(0, 2, 1, 3)
        k = k.reshape(B, T, n_heads, Dh).transpose(0, 2, 1, 3)
        v = v.reshape(B, T, n_heads, Dh).transpose(0, 2, 1, 3)
        s = jnp.einsum("bhtd,bhsd->bhts", q, k) * scale
        p = jax.nn.softmax(s, axis=-1)
        o = jnp.einsum("bhts,bhsd->bhtd", p, v).transpose(0, 2, 1, 3).reshape(B, T, C)
        att = o @ params["wo"][i] + params["bo"][i]
        x = x + att
        h2 = _layernorm(x, params["ln2_g"][i], params["ln2_b"][i])
        m = jax.nn.gelu(h2 @ params["w1"][i] + params["b1"][i], approximate=True)
        m = m @ params["w2"][i] + params["b2"][i]
        x = x + m
    h = _layernorm(x, params["ln_g"], params["ln_b"])
    return h @ params["proj_w"]


# ------------------------------------ main ---------------------------------------

if __name__ == "__main__":
    # config: n_embd=32, n_heads=4, n_layers=2, block_size=16, pos_all=False,
    #         dropout=0 (eval), no down_conv / up_conv
    B, T, C, H, L, BLOCK = 2, 8, 32, 4, 2, 16
    key = jax.random.PRNGKey(0)
    kx, kp = jax.random.split(key)
    x = jax.random.normal(kx, (B, T, C), jnp.float32)
    params = init_params(kp, L, C, H)
    kparams = prepare_params(params, n_heads=H)   # one-time layout / scale-fold transform

    logits, mask = block_forward(x, kparams, n_heads=H, block_size=BLOCK, pos_all=False)
    logits = jax.block_until_ready(logits)

    ref = block_forward_ref(x, params, n_heads=H, block_size=BLOCK, pos_all=False)
    err = float(jnp.max(jnp.abs(logits - ref)))
    # f32 compute + exact softmax normalization -> tight tolerance
    assert err < 1e-4, f"mismatch vs reference: {err}"

    print("KERNEL_OK")
</pallas_src>

<mosaic_0001>
module attributes {stable_mosaic.version = 11 : i64} {
  func.func @_block_kernel(%arg0: i32, %arg1: memref<1x8x32xf32, #tpu.memory_space<vmem>>, %arg2: memref<8x32xf32, #tpu.memory_space<vmem>>, %arg3: memref<2x1x32xf32, #tpu.memory_space<vmem>>, %arg4: memref<2x1x32xf32, #tpu.memory_space<vmem>>, %arg5: memref<2x4x32x8xf32, #tpu.memory_space<vmem>>, %arg6: memref<2x4x1x8xf32, #tpu.memory_space<vmem>>, %arg7: memref<2x4x32x8xf32, #tpu.memory_space<vmem>>, %arg8: memref<2x4x1x8xf32, #tpu.memory_space<vmem>>, %arg9: memref<2x4x32x8xf32, #tpu.memory_space<vmem>>, %arg10: memref<2x4x1x8xf32, #tpu.memory_space<vmem>>, %arg11: memref<2x4x8x32xf32, #tpu.memory_space<vmem>>, %arg12: memref<2x1x32xf32, #tpu.memory_space<vmem>>, %arg13: memref<2x1x32xf32, #tpu.memory_space<vmem>>, %arg14: memref<2x1x32xf32, #tpu.memory_space<vmem>>, %arg15: memref<2x32x128xf32, #tpu.memory_space<vmem>>, %arg16: memref<2x1x128xf32, #tpu.memory_space<vmem>>, %arg17: memref<2x128x32xf32, #tpu.memory_space<vmem>>, %arg18: memref<2x1x32xf32, #tpu.memory_space<vmem>>, %arg19: memref<1x32xf32, #tpu.memory_space<vmem>>, %arg20: memref<1x32xf32, #tpu.memory_space<vmem>>, %arg21: memref<32x32xf32, #tpu.memory_space<vmem>>, %arg22: memref<1x8x32xf32, #tpu.memory_space<vmem>>) attributes {dimension_semantics = [#tpu.dimension_semantics<parallel>], iteration_bounds = array<i64: 2>, scalar_prefetch = 0 : i64, scratch_operands = 0 : i64, tpu.core_type = #tpu.core_type<tc>, window_params = [{transform_indices = @transform_0, window_bounds = array<i64: 1, 8, 32>}, {pipeline_mode = #tpu.pipeline_mode<synchronous>, transform_indices = @transform_1, window_bounds = array<i64: 8, 32>}, {pipeline_mode = #tpu.pipeline_mode<synchronous>, transform_indices = @transform_2, window_bounds = array<i64: 2, 1, 32>}, {pipeline_mode = #tpu.pipeline_mode<synchronous>, transform_indices = @transform_3, window_bounds = array<i64: 2, 1, 32>}, {pipeline_mode = #tpu.pipeline_mode<synchronous>, transform_indices = @transform_4, window_bounds = array<i64: 2, 4, 32, 8>}, {pipeline_mode = #tpu.pipeline_mode<synchronous>, transform_indices = @transform_5, window_bounds = array<i64: 2, 4, 1, 8>}, {pipeline_mode = #tpu.pipeline_mode<synchronous>, transform_indices = @transform_6, window_bounds = array<i64: 2, 4, 32, 8>}, {pipeline_mode = #tpu.pipeline_mode<synchronous>, transform_indices = @transform_7, window_bounds = array<i64: 2, 4, 1, 8>}, {pipeline_mode = #tpu.pipeline_mode<synchronous>, transform_indices = @transform_8, window_bounds = array<i64: 2, 4, 32, 8>}, {pipeline_mode = #tpu.pipeline_mode<synchronous>, transform_indices = @transform_9, window_bounds = array<i64: 2, 4, 1, 8>}, {pipeline_mode = #tpu.pipeline_mode<synchronous>, transform_indices = @transform_10, window_bounds = array<i64: 2, 4, 8, 32>}, {pipeline_mode = #tpu.pipeline_mode<synchronous>, transform_indices = @transform_11, window_bounds = array<i64: 2, 1, 32>}, {pipeline_mode = #tpu.pipeline_mode<synchronous>, transform_indices = @transform_12, window_bounds = array<i64: 2, 1, 32>}, {pipeline_mode = #tpu.pipeline_mode<synchronous>, transform_indices = @transform_13, window_bounds = array<i64: 2, 1, 32>}, {pipeline_mode = #tpu.pipeline_mode<synchronous>, transform_indices = @transform_14, window_bounds = array<i64: 2, 32, 128>}, {pipeline_mode = #tpu.pipeline_mode<synchronous>, transform_indices = @transform_15, window_bounds = array<i64: 2, 1, 128>}, {pipeline_mode = #tpu.pipeline_mode<synchronous>, transform_indices = @transform_16, window_bounds = array<i64: 2, 128, 32>}, {pipeline_mode = #tpu.pipeline_mode<synchronous>, transform_indices = @transform_17, window_bounds = array<i64: 2, 1, 32>}, {pipeline_mode = #tpu.pipeline_mode<synchronous>, transform_indices = @transform_18, window_bounds = array<i64: 1, 32>}, {pipeline_mode = #tpu.pipeline_mode<synchronous>, transform_indices = @transform_19, window_bounds = array<i64: 1, 32>}, {pipeline_mode = #tpu.pipeline_mode<synchronous>, transform_indices = @transform_20, window_bounds = array<i64: 32, 32>}, {transform_indices = @transform_21, window_bounds = array<i64: 1, 8, 32>}]} {
    %c0 = arith.constant 0 : index
    %c0_0 = arith.constant 0 : index
    %c0_1 = arith.constant 0 : index
    %0 = vector.load %arg1[%c0, %c0_0, %c0_1] : memref<1x8x32xf32, #tpu.memory_space<vmem>>, vector<1x8x32xf32>
    %1 = vector.shape_cast %0 : vector<1x8x32xf32> to vector<8x32xf32>
    %c0_2 = arith.constant 0 : index
    %c0_3 = arith.constant 0 : index
    %2 = vector.load %arg2[%c0_2, %c0_3] : memref<8x32xf32, #tpu.memory_space<vmem>>, vector<8x32xf32>
    %3 = arith.addf %1, %2 : vector<8x32xf32>
    %c0_4 = arith.constant 0 : index
    %c0_5 = arith.constant 0 : index
    %c0_6 = arith.constant 0 : index
    %4 = vector.load %arg3[%c0_4, %c0_5, %c0_6] : memref<2x1x32xf32, #tpu.memory_space<vmem>>, vector<1x1x32xf32>
    %5 = vector.shape_cast %4 : vector<1x1x32xf32> to vector<1x32xf32>
    %c0_7 = arith.constant 0 : index
    %c0_8 = arith.constant 0 : index
    %c0_9 = arith.constant 0 : index
    %6 = vector.load %arg4[%c0_7, %c0_8, %c0_9] : memref<2x1x32xf32, #tpu.memory_space<vmem>>, vector<1x1x32xf32>
    %7 = vector.shape_cast %6 : vector<1x1x32xf32> to vector<1x32xf32>
    %cst = arith.constant dense<0.000000e+00> : vector<8xf32>
    %8 = vector.multi_reduction <add>, %3, %cst [1] : vector<8x32xf32> to vector<8xf32>
    %9 = vector.shape_cast %8 : vector<8xf32> to vector<8x1xf32>
    %cst_10 = arith.constant 3.200000e+01 : f32
    %10 = vector.broadcast %cst_10 : f32 to vector<8x1xf32>
    %11 = arith.divf %9, %10 : vector<8x1xf32>
    %12 = vector.broadcast %11 : vector<8x1xf32> to vector<8x32xf32>
    %13 = arith.subf %3, %12 : vector<8x32xf32>
    %14 = arith.mulf %13, %13 : vector<8x32xf32>
    %cst_11 = arith.constant dense<0.000000e+00> : vector<8xf32>
    %15 = vector.multi_reduction <add>, %14, %cst_11 [1] : vector<8x32xf32> to vector<8xf32>
    %16 = vector.shape_cast %15 : vector<8xf32> to vector<8x1xf32>
    %cst_12 = arith.constant 3.200000e+01 : f32
    %17 = vector.broadcast %cst_12 : f32 to vector<8x1xf32>
    %18 = arith.divf %16, %17 : vector<8x1xf32>
    %19 = vector.broadcast %11 : vector<8x1xf32> to vector<8x32xf32>
    %20 = arith.subf %3, %19 : vector<8x32xf32>
    %cst_13 = arith.constant 9.99999974E-6 : f32
    %21 = vector.broadcast %cst_13 : f32 to vector<8x1xf32>
    %22 = arith.addf %18, %21 : vector<8x1xf32>
    %23 = math.rsqrt %22 : vector<8x1xf32>
    %24 = vector.broadcast %23 : vector<8x1xf32> to vector<8x32xf32>
    %25 = arith.mulf %20, %24 : vector<8x32xf32>
    %26 = vector.broadcast %5 : vector<1x32xf32> to vector<8x32xf32>
    %27 = arith.mulf %25, %26 : vector<8x32xf32>
    %28 = vector.broadcast %7 : vector<1x32xf32> to vector<8x32xf32>
    %29 = arith.addf %27, %28 : vector<8x32xf32>
    %cst_14 = arith.constant 0.000000e+00 : f32
    %30 = vector.broadcast %cst_14 : f32 to vector<8x32xf32>
    %c0_15 = arith.constant 0 : index
    %c0_16 = arith.constant 0 : index
    %c0_17 = arith.constant 0 : index
    %c0_18 = arith.constant 0 : index
    %31 = vector.load %arg5[%c0_15, %c0_16, %c0_17, %c0_18] : memref<2x4x32x8xf32, #tpu.memory_space<vmem>>, vector<1x1x32x8xf32>
    %32 = vector.shape_cast %31 : vector<1x1x32x8xf32> to vector<32x8xf32>
    %cst_19 = arith.constant dense<0.000000e+00> : vector<8x8xf32>
    %33 = tpu.matmul %29, %32, %cst_19 {dimension_numbers = #tpu.dot_dimension_numbers<[1], [0], [0], [1], [0, 0, 1, 1], [], []>} : vector<8x32xf32>, vector<32x8xf32>, vector<8x8xf32> -> vector<8x8xf32>
    %c0_20 = arith.constant 0 : index
    %c0_21 = arith.constant 0 : index
    %c0_22 = arith.constant 0 : index
    %c0_23 = arith.constant 0 : index
    %34 = vector.load %arg6[%c0_20, %c0_21, %c0_22, %c0_23] : memref<2x4x1x8xf32, #tpu.memory_space<vmem>>, vector<1x1x1x8xf32>
    %35 = vector.shape_cast %34 : vector<1x1x1x8xf32> to vector<1x8xf32>
    %36 = vector.broadcast %35 : vector<1x8xf32> to vector<8x8xf32>
    %37 = arith.addf %33, %36 : vector<8x8xf32>
    %c0_24 = arith.constant 0 : index
    %c0_25 = arith.constant 0 : index
    %c0_26 = arith.constant 0 : index
    %c0_27 = arith.constant 0 : index
    %38 = vector.load %arg7[%c0_24, %c0_25, %c0_26, %c0_27] : memref<2x4x32x8xf32, #tpu.memory_space<vmem>>, vector<1x1x32x8xf32>
    %39 = vector.shape_cast %38 : vector<1x1x32x8xf32> to vector<32x8xf32>
    %cst_28 = arith.constant dense<0.000000e+00> : vector<8x8xf32>
    %40 = tpu.matmul %29, %39, %cst_28 {dimension_numbers = #tpu.dot_dimension_numbers<[1], [0], [0], [1], [0, 0, 1, 1], [], []>} : vector<8x32xf32>, vector<32x8xf32>, vector<8x8xf32> -> vector<8x8xf32>
    %c0_29 = arith.constant 0 : index
    %c0_30 = arith.constant 0 : index
    %c0_31 = arith.constant 0 : index
    %c0_32 = arith.constant 0 : index
    %41 = vector.load %arg8[%c0_29, %c0_30, %c0_31, %c0_32] : memref<2x4x1x8xf32, #tpu.memory_space<vmem>>, vector<1x1x1x8xf32>
    %42 = vector.shape_cast %41 : vector<1x1x1x8xf32> to vector<1x8xf32>
    %43 = vector.broadcast %42 : vector<1x8xf32> to vector<8x8xf32>
    %44 = arith.addf %40, %43 : vector<8x8xf32>
    %c0_33 = arith.constant 0 : index
    %c0_34 = arith.constant 0 : index
    %c0_35 = arith.constant 0 : index
    %c0_36 = arith.constant 0 : index
    %45 = vector.load %arg9[%c0_33, %c0_34, %c0_35, %c0_36] : memref<2x4x32x8xf32, #tpu.memory_space<vmem>>, vector<1x1x32x8xf32>
    %46 = vector.shape_cast %45 : vector<1x1x32x8xf32> to vector<32x8xf32>
    %cst_37 = arith.constant dense<0.000000e+00> : vector<8x8xf32>
    %47 = tpu.matmul %29, %46, %cst_37 {dimension_numbers = #tpu.dot_dimension_numbers<[1], [0], [0], [1], [0, 0, 1, 1], [], []>} : vector<8x32xf32>, vector<32x8xf32>, vector<8x8xf32> -> vector<8x8xf32>
    %c0_38 = arith.constant 0 : index
    %c0_39 = arith.constant 0 : index
    %c0_40 = arith.constant 0 : index
    %c0_41 = arith.constant 0 : index
    %48 = vector.load %arg10[%c0_38, %c0_39, %c0_40, %c0_41] : memref<2x4x1x8xf32, #tpu.memory_space<vmem>>, vector<1x1x1x8xf32>
    %49 = vector.shape_cast %48 : vector<1x1x1x8xf32> to vector<1x8xf32>
    %50 = vector.broadcast %49 : vector<1x8xf32> to vector<8x8xf32>
    %51 = arith.addf %47, %50 : vector<8x8xf32>
    %cst_42 = arith.constant dense<0.000000e+00> : vector<8x8xf32>
    %52 = tpu.matmul %37, %44, %cst_42 {dimension_numbers = #tpu.dot_dimension_numbers<[1], [1], [0], [0], [0, 0, 1, 0], [], []>} : vector<8x8xf32>, vector<8x8xf32>, vector<8x8xf32> -> vector<8x8xf32>
    %cst_43 = arith.constant dense<0xFF800000> : vector<8xf32>
    %53 = vector.multi_reduction <maximumf>, %52, %cst_43 [1] : vector<8x8xf32> to vector<8xf32>
    %54 = vector.shape_cast %53 : vector<8xf32> to vector<8x1xf32>
    %55 = vector.broadcast %54 : vector<8x1xf32> to vector<8x8xf32>
    %56 = arith.subf %52, %55 : vector<8x8xf32>
    %57 = math.exp %56 : vector<8x8xf32>
    %cst_44 = arith.constant dense<0.000000e+00> : vector<8xf32>
    %58 = vector.multi_reduction <add>, %57, %cst_44 [1] : vector<8x8xf32> to vector<8xf32>
    %59 = vector.shape_cast %58 : vector<8xf32> to vector<8x1xf32>
    %60 = vector.broadcast %59 : vector<8x1xf32> to vector<8x8xf32>
    %61 = arith.divf %57, %60 : vector<8x8xf32>
    %cst_45 = arith.constant dense<0.000000e+00> : vector<8x8xf32>
    %62 = tpu.matmul %61, %51, %cst_45 {dimension_numbers = #tpu.dot_dimension_numbers<[1], [0], [0], [1], [0, 0, 1, 1], [], []>} : vector<8x8xf32>, vector<8x8xf32>, vector<8x8xf32> -> vector<8x8xf32>
    %c0_46 = arith.constant 0 : index
    %c0_47 = arith.constant 0 : index
    %c0_48 = arith.constant 0 : index
    %c0_49 = arith.constant 0 : index
    %63 = vector.load %arg11[%c0_46, %c0_47, %c0_48, %c0_49] : memref<2x4x8x32xf32, #tpu.memory_space<vmem>>, vector<1x1x8x32xf32>
    %64 = vector.shape_cast %63 : vector<1x1x8x32xf32> to vector<8x32xf32>
    %cst_50 = arith.constant dense<0.000000e+00> : vector<8x32xf32>
    %65 = tpu.matmul %62, %64, %cst_50 {dimension_numbers = #tpu.dot_dimension_numbers<[1], [0], [0], [1], [0, 0, 1, 1], [], []>} : vector<8x8xf32>, vector<8x32xf32>, vector<8x32xf32> -> vector<8x32xf32>
    %66 = arith.addf %30, %65 : vector<8x32xf32>
    %c0_51 = arith.constant 0 : index
    %c1 = arith.constant 1 : index
    %c0_52 = arith.constant 0 : index
    %c0_53 = arith.constant 0 : index
    %67 = vector.load %arg5[%c0_51, %c1, %c0_52, %c0_53] : memref<2x4x32x8xf32, #tpu.memory_space<vmem>>, vector<1x1x32x8xf32>
    %68 = vector.shape_cast %67 : vector<1x1x32x8xf32> to vector<32x8xf32>
    %cst_54 = arith.constant dense<0.000000e+00> : vector<8x8xf32>
    %69 = tpu.matmul %29, %68, %cst_54 {dimension_numbers = #tpu.dot_dimension_numbers<[1], [0], [0], [1], [0, 0, 1, 1], [], []>} : vector<8x32xf32>, vector<32x8xf32>, vector<8x8xf32> -> vector<8x8xf32>
    %c0_55 = arith.constant 0 : index
    %c1_56 = arith.constant 1 : index
    %c0_57 = arith.constant 0 : index
    %c0_58 = arith.constant 0 : index
    %70 = vector.load %arg6[%c0_55, %c1_56, %c0_57, %c0_58] : memref<2x4x1x8xf32, #tpu.memory_space<vmem>>, vector<1x1x1x8xf32>
    %71 = vector.shape_cast %70 : vector<1x1x1x8xf32> to vector<1x8xf32>
    %72 = vector.broadcast %71 : vector<1x8xf32> to vector<8x8xf32>
    %73 = arith.addf %69, %72 : vector<8x8xf32>
    %c0_59 = arith.constant 0 : index
    %c1_60 = arith.constant 1 : index
    %c0_61 = arith.constant 0 : index
    %c0_62 = arith.constant 0 : index
    %74 = vector.load %arg7[%c0_59, %c1_60, %c0_61, %c0_62] : memref<2x4x32x8xf32, #tpu.memory_space<vmem>>, vector<1x1x32x8xf32>
    %75 = vector.shape_cast %74 : vector<1x1x32x8xf32> to vector<32x8xf32>
    %cst_63 = arith.constant dense<0.000000e+00> : vector<8x8xf32>
    %76 = tpu.matmul %29, %75, %cst_63 {dimension_numbers = #tpu.dot_dimension_numbers<[1], [0], [0], [1], [0, 0, 1, 1], [], []>} : vector<8x32xf32>, vector<32x8xf32>, vector<8x8xf32> -> vector<8x8xf32>
    %c0_64 = arith.constant 0 : index
    %c1_65 = arith.constant 1 : index
    %c0_66 = arith.constant 0 : index
    %c0_67 = arith.constant 0 : index
    %77 = vector.load %arg8[%c0_64, %c1_65, %c0_66, %c0_67] : memref<2x4x1x8xf32, #tpu.memory_space<vmem>>, vector<1x1x1x8xf32>
    %78 = vector.shape_cast %77 : vector<1x1x1x8xf32> to vector<1x8xf32>
    %79 = vector.broadcast %78 : vector<1x8xf32> to vector<8x8xf32>
    %80 = arith.addf %76, %79 : vector<8x8xf32>
    %c0_68 = arith.constant 0 : index
    %c1_69 = arith.constant 1 : index
    %c0_70 = arith.constant 0 : index
    %c0_71 = arith.constant 0 : index
    %81 = vector.load %arg9[%c0_68, %c1_69, %c0_70, %c0_71] : memref<2x4x32x8xf32, #tpu.memory_space<vmem>>, vector<1x1x32x8xf32>
    %82 = vector.shape_cast %81 : vector<1x1x32x8xf32> to vector<32x8xf32>
    %cst_72 = arith.constant dense<0.000000e+00> : vector<8x8xf32>
    %83 = tpu.matmul %29, %82, %cst_72 {dimension_numbers = #tpu.dot_dimension_numbers<[1], [0], [0], [1], [0, 0, 1, 1], [], []>} : vector<8x32xf32>, vector<32x8xf32>, vector<8x8xf32> -> vector<8x8xf32>
    %c0_73 = arith.constant 0 : index
    %c1_74 = arith.constant 1 : index
    %c0_75 = arith.constant 0 : index
    %c0_76 = arith.constant 0 : index
    %84 = vector.load %arg10[%c0_73, %c1_74, %c0_75, %c0_76] : memref<2x4x1x8xf32, #tpu.memory_space<vmem>>, vector<1x1x1x8xf32>
    %85 = vector.shape_cast %84 : vector<1x1x1x8xf32> to vector<1x8xf32>
    %86 = vector.broadcast %85 : vector<1x8xf32> to vector<8x8xf32>
    %87 = arith.addf %83, %86 : vector<8x8xf32>
    %cst_77 = arith.constant dense<0.000000e+00> : vector<8x8xf32>
    %88 = tpu.matmul %73, %80, %cst_77 {dimension_numbers = #tpu.dot_dimension_numbers<[1], [1], [0], [0], [0, 0, 1, 0], [], []>} : vector<8x8xf32>, vector<8x8xf32>, vector<8x8xf32> -> vector<8x8xf32>
    %cst_78 = arith.constant dense<0xFF800000> : vector<8xf32>
    %89 = vector.multi_reduction <maximumf>, %88, %cst_78 [1] : vector<8x8xf32> to vector<8xf32>
    %90 = vector.shape_cast %89 : vector<8xf32> to vector<8x1xf32>
    %91 = vector.broadcast %90 : vector<8x1xf32> to vector<8x8xf32>
    %92 = arith.subf %88, %91 : vector<8x8xf32>
    %93 = math.exp %92 : vector<8x8xf32>
    %cst_79 = arith.constant dense<0.000000e+00> : vector<8xf32>
    %94 = vector.multi_reduction <add>, %93, %cst_79 [1] : vector<8x8xf32> to vector<8xf32>
    %95 = vector.shape_cast %94 : vector<8xf32> to vector<8x1xf32>
    %96 = vector.broadcast %95 : vector<8x1xf32> to vector<8x8xf32>
    %97 = arith.divf %93, %96 : vector<8x8xf32>
    %cst_80 = arith.constant dense<0.000000e+00> : vector<8x8xf32>
    %98 = tpu.matmul %97, %87, %cst_80 {dimension_numbers = #tpu.dot_dimension_numbers<[1], [0], [0], [1], [0, 0, 1, 1], [], []>} : vector<8x8xf32>, vector<8x8xf32>, vector<8x8xf32> -> vector<8x8xf32>
    %c0_81 = arith.constant 0 : index
    %c1_82 = arith.constant 1 : index
    %c0_83 = arith.constant 0 : index
    %c0_84 = arith.constant 0 : index
    %99 = vector.load %arg11[%c0_81, %c1_82, %c0_83, %c0_84] : memref<2x4x8x32xf32, #tpu.memory_space<vmem>>, vector<1x1x8x32xf32>
    %100 = vector.shape_cast %99 : vector<1x1x8x32xf32> to vector<8x32xf32>
    %cst_85 = arith.constant dense<0.000000e+00> : vector<8x32xf32>
    %101 = tpu.matmul %98, %100, %cst_85 {dimension_numbers = #tpu.dot_dimension_numbers<[1], [0], [0], [1], [0, 0, 1, 1], [], []>} : vector<8x8xf32>, vector<8x32xf32>, vector<8x32xf32> -> vector<8x32xf32>
    %102 = arith.addf %66, %101 : vector<8x32xf32>
    %c0_86 = arith.constant 0 : index
    %c2 = arith.constant 2 : index
    %c0_87 = arith.constant 0 : index
    %c0_88 = arith.constant 0 : index
    %103 = vector.load %arg5[%c0_86, %c2, %c0_87, %c0_88] : memref<2x4x32x8xf32, #tpu.memory_space<vmem>>, vector<1x1x32x8xf32>
    %104 = vector.shape_cast %103 : vector<1x1x32x8xf32> to vector<32x8xf32>
    %cst_89 = arith.constant dense<0.000000e+00> : vector<8x8xf32>
    %105 = tpu.matmul %29, %104, %cst_89 {dimension_numbers = #tpu.dot_dimension_numbers<[1], [0], [0], [1], [0, 0, 1, 1], [], []>} : vector<8x32xf32>, vector<32x8xf32>, vector<8x8xf32> -> vector<8x8xf32>
    %c0_90 = arith.constant 0 : index
    %c2_91 = arith.constant 2 : index
    %c0_92 = arith.constant 0 : index
    %c0_93 = arith.constant 0 : index
    %106 = vector.load %arg6[%c0_90, %c2_91, %c0_92, %c0_93] : memref<2x4x1x8xf32, #tpu.memory_space<vmem>>, vector<1x1x1x8xf32>
    %107 = vector.shape_cast %106 : vector<1x1x1x8xf32> to vector<1x8xf32>
    %108 = vector.broadcast %107 : vector<1x8xf32> to vector<8x8xf32>
    %109 = arith.addf %105, %108 : vector<8x8xf32>
    %c0_94 = arith.constant 0 : index
    %c2_95 = arith.constant 2 : index
    %c0_96 = arith.constant 0 : index
    %c0_97 = arith.constant 0 : index
    %110 = vector.load %arg7[%c0_94, %c2_95, %c0_96, %c0_97] : memref<2x4x32x8xf32, #tpu.memory_space<vmem>>, vector<1x1x32x8xf32>
    %111 = vector.shape_cast %110 : vector<1x1x32x8xf32> to vector<32x8xf32>
    %cst_98 = arith.constant dense<0.000000e+00> : vector<8x8xf32>
    %112 = tpu.matmul %29, %111, %cst_98 {dimension_numbers = #tpu.dot_dimension_numbers<[1], [0], [0], [1], [0, 0, 1, 1], [], []>} : vector<8x32xf32>, vector<32x8xf32>, vector<8x8xf32> -> vector<8x8xf32>
    %c0_99 = arith.constant 0 : index
    %c2_100 = arith.constant 2 : index
    %c0_101 = arith.constant 0 : index
    %c0_102 = arith.constant 0 : index
    %113 = vector.load %arg8[%c0_99, %c2_100, %c0_101, %c0_102] : memref<2x4x1x8xf32, #tpu.memory_space<vmem>>, vector<1x1x1x8xf32>
    %114 = vector.shape_cast %113 : vector<1x1x1x8xf32> to vector<1x8xf32>
    %115 = vector.broadcast %114 : vector<1x8xf32> to vector<8x8xf32>
    %116 = arith.addf %112, %115 : vector<8x8xf32>
    %c0_103 = arith.constant 0 : index
    %c2_104 = arith.constant 2 : index
    %c0_105 = arith.constant 0 : index
    %c0_106 = arith.constant 0 : index
    %117 = vector.load %arg9[%c0_103, %c2_104, %c0_105, %c0_106] : memref<2x4x32x8xf32, #tpu.memory_space<vmem>>, vector<1x1x32x8xf32>
    %118 = vector.shape_cast %117 : vector<1x1x32x8xf32> to vector<32x8xf32>
    %cst_107 = arith.constant dense<0.000000e+00> : vector<8x8xf32>
    %119 = tpu.matmul %29, %118, %cst_107 {dimension_numbers = #tpu.dot_dimension_numbers<[1], [0], [0], [1], [0, 0, 1, 1], [], []>} : vector<8x32xf32>, vector<32x8xf32>, vector<8x8xf32> -> vector<8x8xf32>
    %c0_108 = arith.constant 0 : index
    %c2_109 = arith.constant 2 : index
    %c0_110 = arith.constant 0 : index
    %c0_111 = arith.constant 0 : index
    %120 = vector.load %arg10[%c0_108, %c2_109, %c0_110, %c0_111] : memref<2x4x1x8xf32, #tpu.memory_space<vmem>>, vector<1x1x1x8xf32>
    %121 = vector.shape_cast %120 : vector<1x1x1x8xf32> to vector<1x8xf32>
    %122 = vector.broadcast %121 : vector<1x8xf32> to vector<8x8xf32>
    %123 = arith.addf %119, %122 : vector<8x8xf32>
    %cst_112 = arith.constant dense<0.000000e+00> : vector<8x8xf32>
    %124 = tpu.matmul %109, %116, %cst_112 {dimension_numbers = #tpu.dot_dimension_numbers<[1], [1], [0], [0], [0, 0, 1, 0], [], []>} : vector<8x8xf32>, vector<8x8xf32>, vector<8x8xf32> -> vector<8x8xf32>
    %cst_113 = arith.constant dense<0xFF800000> : vector<8xf32>
    %125 = vector.multi_reduction <maximumf>, %124, %cst_113 [1] : vector<8x8xf32> to vector<8xf32>
    %126 = vector.shape_cast %125 : vector<8xf32> to vector<8x1xf32>
    %127 = vector.broadcast %126 : vector<8x1xf32> to vector<8x8xf32>
    %128 = arith.subf %124, %127 : vector<8x8xf32>
    %129 = math.exp %128 : vector<8x8xf32>
    %cst_114 = arith.constant dense<0.000000e+00> : vector<8xf32>
    %130 = vector.multi_reduction <add>, %129, %cst_114 [1] : vector<8x8xf32> to vector<8xf32>
    %131 = vector.shape_cast %130 : vector<8xf32> to vector<8x1xf32>
    %132 = vector.broadcast %131 : vector<8x1xf32> to vector<8x8xf32>
    %133 = arith.divf %129, %132 : vector<8x8xf32>
    %cst_115 = arith.constant dense<0.000000e+00> : vector<8x8xf32>
    %134 = tpu.matmul %133, %123, %cst_115 {dimension_numbers = #tpu.dot_dimension_numbers<[1], [0], [0], [1], [0, 0, 1, 1], [], []>} : vector<8x8xf32>, vector<8x8xf32>, vector<8x8xf32> -> vector<8x8xf32>
    %c0_116 = arith.constant 0 : index
    %c2_117 = arith.constant 2 : index
    %c0_118 = arith.constant 0 : index
    %c0_119 = arith.constant 0 : index
    %135 = vector.load %arg11[%c0_116, %c2_117, %c0_118, %c0_119] : memref<2x4x8x32xf32, #tpu.memory_space<vmem>>, vector<1x1x8x32xf32>
    %136 = vector.shape_cast %135 : vector<1x1x8x32xf32> to vector<8x32xf32>
    %cst_120 = arith.constant dense<0.000000e+00> : vector<8x32xf32>
    %137 = tpu.matmul %134, %136, %cst_120 {dimension_numbers = #tpu.dot_dimension_numbers<[1], [0], [0], [1], [0, 0, 1, 1], [], []>} : vector<8x8xf32>, vector<8x32xf32>, vector<8x32xf32> -> vector<8x32xf32>
    %138 = arith.addf %102, %137 : vector<8x32xf32>
    %c0_121 = arith.constant 0 : index
    %c3 = arith.constant 3 : index
    %c0_122 = arith.constant 0 : index
    %c0_123 = arith.constant 0 : index
    %139 = vector.load %arg5[%c0_121, %c3, %c0_122, %c0_123] : memref<2x4x32x8xf32, #tpu.memory_space<vmem>>, vector<1x1x32x8xf32>
    %140 = vector.shape_cast %139 : vector<1x1x32x8xf32> to vector<32x8xf32>
    %cst_124 = arith.constant dense<0.000000e+00> : vector<8x8xf32>
    %141 = tpu.matmul %29, %140, %cst_124 {dimension_numbers = #tpu.dot_dimension_numbers<[1], [0], [0], [1], [0, 0, 1, 1], [], []>} : vector<8x32xf32>, vector<32x8xf32>, vector<8x8xf32> -> vector<8x8xf32>
    %c0_125 = arith.constant 0 : index
    %c3_126 = arith.constant 3 : index
    %c0_127 = arith.constant 0 : index
    %c0_128 = arith.constant 0 : index
    %142 = vector.load %arg6[%c0_125, %c3_126, %c0_127, %c0_128] : memref<2x4x1x8xf32, #tpu.memory_space<vmem>>, vector<1x1x1x8xf32>
    %143 = vector.shape_cast %142 : vector<1x1x1x8xf32> to vector<1x8xf32>
    %144 = vector.broadcast %143 : vector<1x8xf32> to vector<8x8xf32>
    %145 = arith.addf %141, %144 : vector<8x8xf32>
    %c0_129 = arith.constant 0 : index
    %c3_130 = arith.constant 3 : index
    %c0_131 = arith.constant 0 : index
    %c0_132 = arith.constant 0 : index
    %146 = vector.load %arg7[%c0_129, %c3_130, %c0_131, %c0_132] : memref<2x4x32x8xf32, #tpu.memory_space<vmem>>, vector<1x1x32x8xf32>
    %147 = vector.shape_cast %146 : vector<1x1x32x8xf32> to vector<32x8xf32>
    %cst_133 = arith.constant dense<0.000000e+00> : vector<8x8xf32>
    %148 = tpu.matmul %29, %147, %cst_133 {dimension_numbers = #tpu.dot_dimension_numbers<[1], [0], [0], [1], [0, 0, 1, 1], [], []>} : vector<8x32xf32>, vector<32x8xf32>, vector<8x8xf32> -> vector<8x8xf32>
    %c0_134 = arith.constant 0 : index
    %c3_135 = arith.constant 3 : index
    %c0_136 = arith.constant 0 : index
    %c0_137 = arith.constant 0 : index
    %149 = vector.load %arg8[%c0_134, %c3_135, %c0_136, %c0_137] : memref<2x4x1x8xf32, #tpu.memory_space<vmem>>, vector<1x1x1x8xf32>
    %150 = vector.shape_cast %149 : vector<1x1x1x8xf32> to vector<1x8xf32>
    %151 = vector.broadcast %150 : vector<1x8xf32> to vector<8x8xf32>
    %152 = arith.addf %148, %151 : vector<8x8xf32>
    %c0_138 = arith.constant 0 : index
    %c3_139 = arith.constant 3 : index
    %c0_140 = arith.constant 0 : index
    %c0_141 = arith.constant 0 : index
    %153 = vector.load %arg9[%c0_138, %c3_139, %c0_140, %c0_141] : memref<2x4x32x8xf32, #tpu.memory_space<vmem>>, vector<1x1x32x8xf32>
    %154 = vector.shape_cast %153 : vector<1x1x32x8xf32> to vector<32x8xf32>
    %cst_142 = arith.constant dense<0.000000e+00> : vector<8x8xf32>
    %155 = tpu.matmul %29, %154, %cst_142 {dimension_numbers = #tpu.dot_dimension_numbers<[1], [0], [0], [1], [0, 0, 1, 1], [], []>} : vector<8x32xf32>, vector<32x8xf32>, vector<8x8xf32> -> vector<8x8xf32>
    %c0_143 = arith.constant 0 : index
    %c3_144 = arith.constant 3 : index
    %c0_145 = arith.constant 0 : index
    %c0_146 = arith.constant 0 : index
    %156 = vector.load %arg10[%c0_143, %c3_144, %c0_145, %c0_146] : memref<2x4x1x8xf32, #tpu.memory_space<vmem>>, vector<1x1x1x8xf32>
    %157 = vector.shape_cast %156 : vector<1x1x1x8xf32> to vector<1x8xf32>
    %158 = vector.broadcast %157 : vector<1x8xf32> to vector<8x8xf32>
    %159 = arith.addf %155, %158 : vector<8x8xf32>
    %cst_147 = arith.constant dense<0.000000e+00> : vector<8x8xf32>
    %160 = tpu.matmul %145, %152, %cst_147 {dimension_numbers = #tpu.dot_dimension_numbers<[1], [1], [0], [0], [0, 0, 1, 0], [], []>} : vector<8x8xf32>, vector<8x8xf32>, vector<8x8xf32> -> vector<8x8xf32>
    %cst_148 = arith.constant dense<0xFF800000> : vector<8xf32>
    %161 = vector.multi_reduction <maximumf>, %160, %cst_148 [1] : vector<8x8xf32> to vector<8xf32>
    %162 = vector.shape_cast %161 : vector<8xf32> to vector<8x1xf32>
    %163 = vector.broadcast %162 : vector<8x1xf32> to vector<8x8xf32>
    %164 = arith.subf %160, %163 : vector<8x8xf32>
    %165 = math.exp %164 : vector<8x8xf32>
    %cst_149 = arith.constant dense<0.000000e+00> : vector<8xf32>
    %166 = vector.multi_reduction <add>, %165, %cst_149 [1] : vector<8x8xf32> to vector<8xf32>
    %167 = vector.shape_cast %166 : vector<8xf32> to vector<8x1xf32>
    %168 = vector.broadcast %167 : vector<8x1xf32> to vector<8x8xf32>
    %169 = arith.divf %165, %168 : vector<8x8xf32>
    %cst_150 = arith.constant dense<0.000000e+00> : vector<8x8xf32>
    %170 = tpu.matmul %169, %159, %cst_150 {dimension_numbers = #tpu.dot_dimension_numbers<[1], [0], [0], [1], [0, 0, 1, 1], [], []>} : vector<8x8xf32>, vector<8x8xf32>, vector<8x8xf32> -> vector<8x8xf32>
    %c0_151 = arith.constant 0 : index
    %c3_152 = arith.constant 3 : index
    %c0_153 = arith.constant 0 : index
    %c0_154 = arith.constant 0 : index
    %171 = vector.load %arg11[%c0_151, %c3_152, %c0_153, %c0_154] : memref<2x4x8x32xf32, #tpu.memory_space<vmem>>, vector<1x1x8x32xf32>
    %172 = vector.shape_cast %171 : vector<1x1x8x32xf32> to vector<8x32xf32>
    %cst_155 = arith.constant dense<0.000000e+00> : vector<8x32xf32>
    %173 = tpu.matmul %170, %172, %cst_155 {dimension_numbers = #tpu.dot_dimension_numbers<[1], [0], [0], [1], [0, 0, 1, 1], [], []>} : vector<8x8xf32>, vector<8x32xf32>, vector<8x32xf32> -> vector<8x32xf32>
    %174 = arith.addf %138, %173 : vector<8x32xf32>
    %175 = arith.addf %3, %174 : vector<8x32xf32>
    %c0_156 = arith.constant 0 : index
    %c0_157 = arith.constant 0 : index
    %c0_158 = arith.constant 0 : index
    %176 = vector.load %arg12[%c0_156, %c0_157, %c0_158] : memref<2x1x32xf32, #tpu.memory_space<vmem>>, vector<1x1x32xf32>
    %177 = vector.shape_cast %176 : vector<1x1x32xf32> to vector<1x32xf32>
    %178 = vector.broadcast %177 : vector<1x32xf32> to vector<8x32xf32>
    %179 = arith.addf %175, %178 : vector<8x32xf32>
    %c0_159 = arith.constant 0 : index
    %c0_160 = arith.constant 0 : index
    %c0_161 = arith.constant 0 : index
    %180 = vector.load %arg13[%c0_159, %c0_160, %c0_161] : memref<2x1x32xf32, #tpu.memory_space<vmem>>, vector<1x1x32xf32>
    %181 = vector.shape_cast %180 : vector<1x1x32xf32> to vector<1x32xf32>
    %c0_162 = arith.constant 0 : index
    %c0_163 = arith.constant 0 : index
    %c0_164 = arith.constant 0 : index
    %182 = vector.load %arg14[%c0_162, %c0_163, %c0_164] : memref<2x1x32xf32, #tpu.memory_space<vmem>>, vector<1x1x32xf32>
    %183 = vector.shape_cast %182 : vector<1x1x32xf32> to vector<1x32xf32>
    %cst_165 = arith.constant dense<0.000000e+00> : vector<8xf32>
    %184 = vector.multi_reduction <add>, %179, %cst_165 [1] : vector<8x32xf32> to vector<8xf32>
    %185 = vector.shape_cast %184 : vector<8xf32> to vector<8x1xf32>
    %cst_166 = arith.constant 3.200000e+01 : f32
    %186 = vector.broadcast %cst_166 : f32 to vector<8x1xf32>
    %187 = arith.divf %185, %186 : vector<8x1xf32>
    %188 = vector.broadcast %187 : vector<8x1xf32> to vector<8x32xf32>
    %189 = arith.subf %179, %188 : vector<8x32xf32>
    %190 = arith.mulf %189, %189 : vector<8x32xf32>
    %cst_167 = arith.constant dense<0.000000e+00> : vector<8xf32>
    %191 = vector.multi_reduction <add>, %190, %cst_167 [1] : vector<8x32xf32> to vector<8xf32>
    %192 = vector.shape_cast %191 : vector<8xf32> to vector<8x1xf32>
    %cst_168 = arith.constant 3.200000e+01 : f32
    %193 = vector.broadcast %cst_168 : f32 to vector<8x1xf32>
    %194 = arith.divf %192, %193 : vector<8x1xf32>
    %195 = vector.broadcast %187 : vector<8x1xf32> to vector<8x32xf32>
    %196 = arith.subf %179, %195 : vector<8x32xf32>
    %cst_169 = arith.constant 9.99999974E-6 : f32
    %197 = vector.broadcast %cst_169 : f32 to vector<8x1xf32>
    %198 = arith.addf %194, %197 : vector<8x1xf32>
    %199 = math.rsqrt %198 : vector<8x1xf32>
    %200 = vector.broadcast %199 : vector<8x1xf32> to vector<8x32xf32>
    %201 = arith.mulf %196, %200 : vector<8x32xf32>
    %202 = vector.broadcast %181 : vector<1x32xf32> to vector<8x32xf32>
    %203 = arith.mulf %201, %202 : vector<8x32xf32>
    %204 = vector.broadcast %183 : vector<1x32xf32> to vector<8x32xf32>
    %205 = arith.addf %203, %204 : vector<8x32xf32>
    %c0_170 = arith.constant 0 : index
    %c0_171 = arith.constant 0 : index
    %c0_172 = arith.constant 0 : index
    %206 = vector.load %arg15[%c0_170, %c0_171, %c0_172] : memref<2x32x128xf32, #tpu.memory_space<vmem>>, vector<1x32x128xf32>
    %207 = vector.shape_cast %206 : vector<1x32x128xf32> to vector<32x128xf32>
    %cst_173 = arith.constant dense<0.000000e+00> : vector<8x128xf32>
    %208 = tpu.matmul %205, %207, %cst_173 {dimension_numbers = #tpu.dot_dimension_numbers<[1], [0], [0], [1], [0, 0, 1, 1], [], []>} : vector<8x32xf32>, vector<32x128xf32>, vector<8x128xf32> -> vector<8x128xf32>
    %c0_174 = arith.constant 0 : index
    %c0_175 = arith.constant 0 : index
    %c0_176 = arith.constant 0 : index
    %209 = vector.load %arg16[%c0_174, %c0_175, %c0_176] : memref<2x1x128xf32, #tpu.memory_space<vmem>>, vector<1x1x128xf32>
    %210 = vector.shape_cast %209 : vector<1x1x128xf32> to vector<1x128xf32>
    %211 = vector.broadcast %210 : vector<1x128xf32> to vector<8x128xf32>
    %212 = arith.addf %208, %211 : vector<8x128xf32>
    %213 = arith.mulf %212, %212 : vector<8x128xf32>
    %214 = arith.mulf %212, %213 : vector<8x128xf32>
    %cst_177 = arith.constant 4.471500e-02 : f32
    %215 = vector.broadcast %cst_177 : f32 to vector<8x128xf32>
    %216 = arith.mulf %215, %214 : vector<8x128xf32>
    %217 = arith.addf %212, %216 : vector<8x128xf32>
    %cst_178 = arith.constant 0.797884583 : f32
    %218 = vector.broadcast %cst_178 : f32 to vector<8x128xf32>
    %219 = arith.mulf %218, %217 : vector<8x128xf32>
    %220 = math.tanh %219 : vector<8x128xf32>
    %cst_179 = arith.constant 1.000000e+00 : f32
    %221 = vector.broadcast %cst_179 : f32 to vector<8x128xf32>
    %222 = arith.addf %221, %220 : vector<8x128xf32>
    %cst_180 = arith.constant 5.000000e-01 : f32
    %223 = vector.broadcast %cst_180 : f32 to vector<8x128xf32>
    %224 = arith.mulf %223, %222 : vector<8x128xf32>
    %225 = arith.mulf %212, %224 : vector<8x128xf32>
    %c0_181 = arith.constant 0 : index
    %c0_182 = arith.constant 0 : index
    %c0_183 = arith.constant 0 : index
    %226 = vector.load %arg17[%c0_181, %c0_182, %c0_183] : memref<2x128x32xf32, #tpu.memory_space<vmem>>, vector<1x128x32xf32>
    %227 = vector.shape_cast %226 : vector<1x128x32xf32> to vector<128x32xf32>
    %cst_184 = arith.constant dense<0.000000e+00> : vector<8x32xf32>
    %228 = tpu.matmul %225, %227, %cst_184 {dimension_numbers = #tpu.dot_dimension_numbers<[1], [0], [0], [1], [0, 0, 1, 1], [], []>} : vector<8x128xf32>, vector<128x32xf32>, vector<8x32xf32> -> vector<8x32xf32>
    %c0_185 = arith.constant 0 : index
    %c0_186 = arith.constant 0 : index
    %c0_187 = arith.constant 0 : index
    %229 = vector.load %arg18[%c0_185, %c0_186, %c0_187] : memref<2x1x32xf32, #tpu.memory_space<vmem>>, vector<1x1x32xf32>
    %230 = vector.shape_cast %229 : vector<1x1x32xf32> to vector<1x32xf32>
    %231 = vector.broadcast %230 : vector<1x32xf32> to vector<8x32xf32>
    %232 = arith.addf %228, %231 : vector<8x32xf32>
    %233 = arith.addf %179, %232 : vector<8x32xf32>
    %c1_188 = arith.constant 1 : index
    %c0_189 = arith.constant 0 : index
    %c0_190 = arith.constant 0 : index
    %234 = vector.load %arg3[%c1_188, %c0_189, %c0_190] : memref<2x1x32xf32, #tpu.memory_space<vmem>>, vector<1x1x32xf32>
    %235 = vector.shape_cast %234 : vector<1x1x32xf32> to vector<1x32xf32>
    %c1_191 = arith.constant 1 : index
    %c0_192 = arith.constant 0 : index
    %c0_193 = arith.constant 0 : index
    %236 = vector.load %arg4[%c1_191, %c0_192, %c0_193] : memref<2x1x32xf32, #tpu.memory_space<vmem>>, vector<1x1x32xf32>
    %237 = vector.shape_cast %236 : vector<1x1x32xf32> to vector<1x32xf32>
    %cst_194 = arith.constant dense<0.000000e+00> : vector<8xf32>
    %238 = vector.multi_reduction <add>, %233, %cst_194 [1] : vector<8x32xf32> to vector<8xf32>
    %239 = vector.shape_cast %238 : vector<8xf32> to vector<8x1xf32>
    %cst_195 = arith.constant 3.200000e+01 : f32
    %240 = vector.broadcast %cst_195 : f32 to vector<8x1xf32>
    %241 = arith.divf %239, %240 : vector<8x1xf32>
    %242 = vector.broadcast %241 : vector<8x1xf32> to vector<8x32xf32>
    %243 = arith.subf %233, %242 : vector<8x32xf32>
    %244 = arith.mulf %243, %243 : vector<8x32xf32>
    %cst_196 = arith.constant dense<0.000000e+00> : vector<8xf32>
    %245 = vector.multi_reduction <add>, %244, %cst_196 [1] : vector<8x32xf32> to vector<8xf32>
    %246 = vector.shape_cast %245 : vector<8xf32> to vector<8x1xf32>
    %cst_197 = arith.constant 3.200000e+01 : f32
    %247 = vector.broadcast %cst_197 : f32 to vector<8x1xf32>
    %248 = arith.divf %246, %247 : vector<8x1xf32>
    %249 = vector.broadcast %241 : vector<8x1xf32> to vector<8x32xf32>
    %250 = arith.subf %233, %249 : vector<8x32xf32>
    %cst_198 = arith.constant 9.99999974E-6 : f32
    %251 = vector.broadcast %cst_198 : f32 to vector<8x1xf32>
    %252 = arith.addf %248, %251 : vector<8x1xf32>
    %253 = math.rsqrt %252 : vector<8x1xf32>
    %254 = vector.broadcast %253 : vector<8x1xf32> to vector<8x32xf32>
    %255 = arith.mulf %250, %254 : vector<8x32xf32>
    %256 = vector.broadcast %235 : vector<1x32xf32> to vector<8x32xf32>
    %257 = arith.mulf %255, %256 : vector<8x32xf32>
    %258 = vector.broadcast %237 : vector<1x32xf32> to vector<8x32xf32>
    %259 = arith.addf %257, %258 : vector<8x32xf32>
    %cst_199 = arith.constant 0.000000e+00 : f32
    %260 = vector.broadcast %cst_199 : f32 to vector<8x32xf32>
    %c1_200 = arith.constant 1 : index
    %c0_201 = arith.constant 0 : index
    %c0_202 = arith.constant 0 : index
    %c0_203 = arith.constant 0 : index
    %261 = vector.load %arg5[%c1_200, %c0_201, %c0_202, %c0_203] : memref<2x4x32x8xf32, #tpu.memory_space<vmem>>, vector<1x1x32x8xf32>
    %262 = vector.shape_cast %261 : vector<1x1x32x8xf32> to vector<32x8xf32>
    %cst_204 = arith.constant dense<0.000000e+00> : vector<8x8xf32>
    %263 = tpu.matmul %259, %262, %cst_204 {dimension_numbers = #tpu.dot_dimension_numbers<[1], [0], [0], [1], [0, 0, 1, 1], [], []>} : vector<8x32xf32>, vector<32x8xf32>, vector<8x8xf32> -> vector<8x8xf32>
    %c1_205 = arith.constant 1 : index
    %c0_206 = arith.constant 0 : index
    %c0_207 = arith.constant 0 : index
    %c0_208 = arith.constant 0 : index
    %264 = vector.load %arg6[%c1_205, %c0_206, %c0_207, %c0_208] : memref<2x4x1x8xf32, #tpu.memory_space<vmem>>, vector<1x1x1x8xf32>
    %265 = vector.shape_cast %264 : vector<1x1x1x8xf32> to vector<1x8xf32>
    %266 = vector.broadcast %265 : vector<1x8xf32> to vector<8x8xf32>
    %267 = arith.addf %263, %266 : vector<8x8xf32>
    %c1_209 = arith.constant 1 : index
    %c0_210 = arith.constant 0 : index
    %c0_211 = arith.constant 0 : index
    %c0_212 = arith.constant 0 : index
    %268 = vector.load %arg7[%c1_209, %c0_210, %c0_211, %c0_212] : memref<2x4x32x8xf32, #tpu.memory_space<vmem>>, vector<1x1x32x8xf32>
    %269 = vector.shape_cast %268 : vector<1x1x32x8xf32> to vector<32x8xf32>
    %cst_213 = arith.constant dense<0.000000e+00> : vector<8x8xf32>
    %270 = tpu.matmul %259, %269, %cst_213 {dimension_numbers = #tpu.dot_dimension_numbers<[1], [0], [0], [1], [0, 0, 1, 1], [], []>} : vector<8x32xf32>, vector<32x8xf32>, vector<8x8xf32> -> vector<8x8xf32>
    %c1_214 = arith.constant 1 : index
    %c0_215 = arith.constant 0 : index
    %c0_216 = arith.constant 0 : index
    %c0_217 = arith.constant 0 : index
    %271 = vector.load %arg8[%c1_214, %c0_215, %c0_216, %c0_217] : memref<2x4x1x8xf32, #tpu.memory_space<vmem>>, vector<1x1x1x8xf32>
    %272 = vector.shape_cast %271 : vector<1x1x1x8xf32> to vector<1x8xf32>
    %273 = vector.broadcast %272 : vector<1x8xf32> to vector<8x8xf32>
    %274 = arith.addf %270, %273 : vector<8x8xf32>
    %c1_218 = arith.constant 1 : index
    %c0_219 = arith.constant 0 : index
    %c0_220 = arith.constant 0 : index
    %c0_221 = arith.constant 0 : index
    %275 = vector.load %arg9[%c1_218, %c0_219, %c0_220, %c0_221] : memref<2x4x32x8xf32, #tpu.memory_space<vmem>>, vector<1x1x32x8xf32>
    %276 = vector.shape_cast %275 : vector<1x1x32x8xf32> to vector<32x8xf32>
    %cst_222 = arith.constant dense<0.000000e+00> : vector<8x8xf32>
    %277 = tpu.matmul %259, %276, %cst_222 {dimension_numbers = #tpu.dot_dimension_numbers<[1], [0], [0], [1], [0, 0, 1, 1], [], []>} : vector<8x32xf32>, vector<32x8xf32>, vector<8x8xf32> -> vector<8x8xf32>
    %c1_223 = arith.constant 1 : index
    %c0_224 = arith.constant 0 : index
    %c0_225 = arith.constant 0 : index
    %c0_226 = arith.constant 0 : index
    %278 = vector.load %arg10[%c1_223, %c0_224, %c0_225, %c0_226] : memref<2x4x1x8xf32, #tpu.memory_space<vmem>>, vector<1x1x1x8xf32>
    %279 = vector.shape_cast %278 : vector<1x1x1x8xf32> to vector<1x8xf32>
    %280 = vector.broadcast %279 : vector<1x8xf32> to vector<8x8xf32>
    %281 = arith.addf %277, %280 : vector<8x8xf32>
    %cst_227 = arith.constant dense<0.000000e+00> : vector<8x8xf32>
    %282 = tpu.matmul %267, %274, %cst_227 {dimension_numbers = #tpu.dot_dimension_numbers<[1], [1], [0], [0], [0, 0, 1, 0], [], []>} : vector<8x8xf32>, vector<8x8xf32>, vector<8x8xf32> -> vector<8x8xf32>
    %cst_228 = arith.constant dense<0xFF800000> : vector<8xf32>
    %283 = vector.multi_reduction <maximumf>, %282, %cst_228 [1] : vector<8x8xf32> to vector<8xf32>
    %284 = vector.shape_cast %283 : vector<8xf32> to vector<8x1xf32>
    %285 = vector.broadcast %284 : vector<8x1xf32> to vector<8x8xf32>
    %286 = arith.subf %282, %285 : vector<8x8xf32>
    %287 = math.exp %286 : vector<8x8xf32>
    %cst_229 = arith.constant dense<0.000000e+00> : vector<8xf32>
    %288 = vector.multi_reduction <add>, %287, %cst_229 [1] : vector<8x8xf32> to vector<8xf32>
    %289 = vector.shape_cast %288 : vector<8xf32> to vector<8x1xf32>
    %290 = vector.broadcast %289 : vector<8x1xf32> to vector<8x8xf32>
    %291 = arith.divf %287, %290 : vector<8x8xf32>
    %cst_230 = arith.constant dense<0.000000e+00> : vector<8x8xf32>
    %292 = tpu.matmul %291, %281, %cst_230 {dimension_numbers = #tpu.dot_dimension_numbers<[1], [0], [0], [1], [0, 0, 1, 1], [], []>} : vector<8x8xf32>, vector<8x8xf32>, vector<8x8xf32> -> vector<8x8xf32>
    %c1_231 = arith.constant 1 : index
    %c0_232 = arith.constant 0 : index
    %c0_233 = arith.constant 0 : index
    %c0_234 = arith.constant 0 : index
    %293 = vector.load %arg11[%c1_231, %c0_232, %c0_233, %c0_234] : memref<2x4x8x32xf32, #tpu.memory_space<vmem>>, vector<1x1x8x32xf32>
    %294 = vector.shape_cast %293 : vector<1x1x8x32xf32> to vector<8x32xf32>
    %cst_235 = arith.constant dense<0.000000e+00> : vector<8x32xf32>
    %295 = tpu.matmul %292, %294, %cst_235 {dimension_numbers = #tpu.dot_dimension_numbers<[1], [0], [0], [1], [0, 0, 1, 1], [], []>} : vector<8x8xf32>, vector<8x32xf32>, vector<8x32xf32> -> vector<8x32xf32>
    %296 = arith.addf %260, %295 : vector<8x32xf32>
    %c1_236 = arith.constant 1 : index
    %c1_237 = arith.constant 1 : index
    %c0_238 = arith.constant 0 : index
    %c0_239 = arith.constant 0 : index
    %297 = vector.load %arg5[%c1_236, %c1_237, %c0_238, %c0_239] : memref<2x4x32x8xf32, #tpu.memory_space<vmem>>, vector<1x1x32x8xf32>
    %298 = vector.shape_cast %297 : vector<1x1x32x8xf32> to vector<32x8xf32>
    %cst_240 = arith.constant dense<0.000000e+00> : vector<8x8xf32>
    %299 = tpu.matmul %259, %298, %cst_240 {dimension_numbers = #tpu.dot_dimension_numbers<[1], [0], [0], [1], [0, 0, 1, 1], [], []>} : vector<8x32xf32>, vector<32x8xf32>, vector<8x8xf32> -> vector<8x8xf32>
    %c1_241 = arith.constant 1 : index
    %c1_242 = arith.constant 1 : index
    %c0_243 = arith.constant 0 : index
    %c0_244 = arith.constant 0 : index
    %300 = vector.load %arg6[%c1_241, %c1_242, %c0_243, %c0_244] : memref<2x4x1x8xf32, #tpu.memory_space<vmem>>, vector<1x1x1x8xf32>
    %301 = vector.shape_cast %300 : vector<1x1x1x8xf32> to vector<1x8xf32>
    %302 = vector.broadcast %301 : vector<1x8xf32> to vector<8x8xf32>
    %303 = arith.addf %299, %302 : vector<8x8xf32>
    %c1_245 = arith.constant 1 : index
    %c1_246 = arith.constant 1 : index
    %c0_247 = arith.constant 0 : index
    %c0_248 = arith.constant 0 : index
    %304 = vector.load %arg7[%c1_245, %c1_246, %c0_247, %c0_248] : memref<2x4x32x8xf32, #tpu.memory_space<vmem>>, vector<1x1x32x8xf32>
    %305 = vector.shape_cast %304 : vector<1x1x32x8xf32> to vector<32x8xf32>
    %cst_249 = arith.constant dense<0.000000e+00> : vector<8x8xf32>
    %306 = tpu.matmul %259, %305, %cst_249 {dimension_numbers = #tpu.dot_dimension_numbers<[1], [0], [0], [1], [0, 0, 1, 1], [], []>} : vector<8x32xf32>, vector<32x8xf32>, vector<8x8xf32> -> vector<8x8xf32>
    %c1_250 = arith.constant 1 : index
    %c1_251 = arith.constant 1 : index
    %c0_252 = arith.constant 0 : index
    %c0_253 = arith.constant 0 : index
    %307 = vector.load %arg8[%c1_250, %c1_251, %c0_252, %c0_253] : memref<2x4x1x8xf32, #tpu.memory_space<vmem>>, vector<1x1x1x8xf32>
    %308 = vector.shape_cast %307 : vector<1x1x1x8xf32> to vector<1x8xf32>
    %309 = vector.broadcast %308 : vector<1x8xf32> to vector<8x8xf32>
    %310 = arith.addf %306, %309 : vector<8x8xf32>
    %c1_254 = arith.constant 1 : index
    %c1_255 = arith.constant 1 : index
    %c0_256 = arith.constant 0 : index
    %c0_257 = arith.constant 0 : index
    %311 = vector.load %arg9[%c1_254, %c1_255, %c0_256, %c0_257] : memref<2x4x32x8xf32, #tpu.memory_space<vmem>>, vector<1x1x32x8xf32>
    %312 = vector.shape_cast %311 : vector<1x1x32x8xf32> to vector<32x8xf32>
    %cst_258 = arith.constant dense<0.000000e+00> : vector<8x8xf32>
    %313 = tpu.matmul %259, %312, %cst_258 {dimension_numbers = #tpu.dot_dimension_numbers<[1], [0], [0], [1], [0, 0, 1, 1], [], []>} : vector<8x32xf32>, vector<32x8xf32>, vector<8x8xf32> -> vector<8x8xf32>
    %c1_259 = arith.constant 1 : index
    %c1_260 = arith.constant 1 : index
    %c0_261 = arith.constant 0 : index
    %c0_262 = arith.constant 0 : index
    %314 = vector.load %arg10[%c1_259, %c1_260, %c0_261, %c0_262] : memref<2x4x1x8xf32, #tpu.memory_space<vmem>>, vector<1x1x1x8xf32>
    %315 = vector.shape_cast %314 : vector<1x1x1x8xf32> to vector<1x8xf32>
    %316 = vector.broadcast %315 : vector<1x8xf32> to vector<8x8xf32>
    %317 = arith.addf %313, %316 : vector<8x8xf32>
    %cst_263 = arith.constant dense<0.000000e+00> : vector<8x8xf32>
    %318 = tpu.matmul %303, %310, %cst_263 {dimension_numbers = #tpu.dot_dimension_numbers<[1], [1], [0], [0], [0, 0, 1, 0], [], []>} : vector<8x8xf32>, vector<8x8xf32>, vector<8x8xf32> -> vector<8x8xf32>
    %cst_264 = arith.constant dense<0xFF800000> : vector<8xf32>
    %319 = vector.multi_reduction <maximumf>, %318, %cst_264 [1] : vector<8x8xf32> to vector<8xf32>
    %320 = vector.shape_cast %319 : vector<8xf32> to vector<8x1xf32>
    %321 = vector.broadcast %320 : vector<8x1xf32> to vector<8x8xf32>
    %322 = arith.subf %318, %321 : vector<8x8xf32>
    %323 = math.exp %322 : vector<8x8xf32>
    %cst_265 = arith.constant dense<0.000000e+00> : vector<8xf32>
    %324 = vector.multi_reduction <add>, %323, %cst_265 [1] : vector<8x8xf32> to vector<8xf32>
    %325 = vector.shape_cast %324 : vector<8xf32> to vector<8x1xf32>
    %326 = vector.broadcast %325 : vector<8x1xf32> to vector<8x8xf32>
    %327 = arith.divf %323, %326 : vector<8x8xf32>
    %cst_266 = arith.constant dense<0.000000e+00> : vector<8x8xf32>
    %328 = tpu.matmul %327, %317, %cst_266 {dimension_numbers = #tpu.dot_dimension_numbers<[1], [0], [0], [1], [0, 0, 1, 1], [], []>} : vector<8x8xf32>, vector<8x8xf32>, vector<8x8xf32> -> vector<8x8xf32>
    %c1_267 = arith.constant 1 : index
    %c1_268 = arith.constant 1 : index
    %c0_269 = arith.constant 0 : index
    %c0_270 = arith.constant 0 : index
    %329 = vector.load %arg11[%c1_267, %c1_268, %c0_269, %c0_270] : memref<2x4x8x32xf32, #tpu.memory_space<vmem>>, vector<1x1x8x32xf32>
    %330 = vector.shape_cast %329 : vector<1x1x8x32xf32> to vector<8x32xf32>
    %cst_271 = arith.constant dense<0.000000e+00> : vector<8x32xf32>
    %331 = tpu.matmul %328, %330, %cst_271 {dimension_numbers = #tpu.dot_dimension_numbers<[1], [0], [0], [1], [0, 0, 1, 1], [], []>} : vector<8x8xf32>, vector<8x32xf32>, vector<8x32xf32> -> vector<8x32xf32>
    %332 = arith.addf %296, %331 : vector<8x32xf32>
    %c1_272 = arith.constant 1 : index
    %c2_273 = arith.constant 2 : index
    %c0_274 = arith.constant 0 : index
    %c0_275 = arith.constant 0 : index
    %333 = vector.load %arg5[%c1_272, %c2_273, %c0_274, %c0_275] : memref<2x4x32x8xf32, #tpu.memory_space<vmem>>, vector<1x1x32x8xf32>
    %334 = vector.shape_cast %333 : vector<1x1x32x8xf32> to vector<32x8xf32>
    %cst_276 = arith.constant dense<0.000000e+00> : vector<8x8xf32>
    %335 = tpu.matmul %259, %334, %cst_276 {dimension_numbers = #tpu.dot_dimension_numbers<[1], [0], [0], [1], [0, 0, 1, 1], [], []>} : vector<8x32xf32>, vector<32x8xf32>, vector<8x8xf32> -> vector<8x8xf32>
    %c1_277 = arith.constant 1 : index
    %c2_278 = arith.constant 2 : index
    %c0_279 = arith.constant 0 : index
    %c0_280 = arith.constant 0 : index
    %336 = vector.load %arg6[%c1_277, %c2_278, %c0_279, %c0_280] : memref<2x4x1x8xf32, #tpu.memory_space<vmem>>, vector<1x1x1x8xf32>
    %337 = vector.shape_cast %336 : vector<1x1x1x8xf32> to vector<1x8xf32>
    %338 = vector.broadcast %337 : vector<1x8xf32> to vector<8x8xf32>
    %339 = arith.addf %335, %338 : vector<8x8xf32>
    %c1_281 = arith.constant 1 : index
    %c2_282 = arith.constant 2 : index
    %c0_283 = arith.constant 0 : index
    %c0_284 = arith.constant 0 : index
    %340 = vector.load %arg7[%c1_281, %c2_282, %c0_283, %c0_284] : memref<2x4x32x8xf32, #tpu.memory_space<vmem>>, vector<1x1x32x8xf32>
    %341 = vector.shape_cast %340 : vector<1x1x32x8xf32> to vector<32x8xf32>
    %cst_285 = arith.constant dense<0.000000e+00> : vector<8x8xf32>
    %342 = tpu.matmul %259, %341, %cst_285 {dimension_numbers = #tpu.dot_dimension_numbers<[1], [0], [0], [1], [0, 0, 1, 1], [], []>} : vector<8x32xf32>, vector<32x8xf32>, vector<8x8xf32> -> vector<8x8xf32>
    %c1_286 = arith.constant 1 : index
    %c2_287 = arith.constant 2 : index
    %c0_288 = arith.constant 0 : index
    %c0_289 = arith.constant 0 : index
    %343 = vector.load %arg8[%c1_286, %c2_287, %c0_288, %c0_289] : memref<2x4x1x8xf32, #tpu.memory_space<vmem>>, vector<1x1x1x8xf32>
    %344 = vector.shape_cast %343 : vector<1x1x1x8xf32> to vector<1x8xf32>
    %345 = vector.broadcast %344 : vector<1x8xf32> to vector<8x8xf32>
    %346 = arith.addf %342, %345 : vector<8x8xf32>
    %c1_290 = arith.constant 1 : index
    %c2_291 = arith.constant 2 : index
    %c0_292 = arith.constant 0 : index
    %c0_293 = arith.constant 0 : index
    %347 = vector.load %arg9[%c1_290, %c2_291, %c0_292, %c0_293] : memref<2x4x32x8xf32, #tpu.memory_space<vmem>>, vector<1x1x32x8xf32>
    %348 = vector.shape_cast %347 : vector<1x1x32x8xf32> to vector<32x8xf32>
    %cst_294 = arith.constant dense<0.000000e+00> : vector<8x8xf32>
    %349 = tpu.matmul %259, %348, %cst_294 {dimension_numbers = #tpu.dot_dimension_numbers<[1], [0], [0], [1], [0, 0, 1, 1], [], []>} : vector<8x32xf32>, vector<32x8xf32>, vector<8x8xf32> -> vector<8x8xf32>
    %c1_295 = arith.constant 1 : index
    %c2_296 = arith.constant 2 : index
    %c0_297 = arith.constant 0 : index
    %c0_298 = arith.constant 0 : index
    %350 = vector.load %arg10[%c1_295, %c2_296, %c0_297, %c0_298] : memref<2x4x1x8xf32, #tpu.memory_space<vmem>>, vector<1x1x1x8xf32>
    %351 = vector.shape_cast %350 : vector<1x1x1x8xf32> to vector<1x8xf32>
    %352 = vector.broadcast %351 : vector<1x8xf32> to vector<8x8xf32>
    %353 = arith.addf %349, %352 : vector<8x8xf32>
    %cst_299 = arith.constant dense<0.000000e+00> : vector<8x8xf32>
    %354 = tpu.matmul %339, %346, %cst_299 {dimension_numbers = #tpu.dot_dimension_numbers<[1], [1], [0], [0], [0, 0, 1, 0], [], []>} : vector<8x8xf32>, vector<8x8xf32>, vector<8x8xf32> -> vector<8x8xf32>
    %cst_300 = arith.constant dense<0xFF800000> : vector<8xf32>
    %355 = vector.multi_reduction <maximumf>, %354, %cst_300 [1] : vector<8x8xf32> to vector<8xf32>
    %356 = vector.shape_cast %355 : vector<8xf32> to vector<8x1xf32>
    %357 = vector.broadcast %356 : vector<8x1xf32> to vector<8x8xf32>
    %358 = arith.subf %354, %357 : vector<8x8xf32>
    %359 = math.exp %358 : vector<8x8xf32>
    %cst_301 = arith.constant dense<0.000000e+00> : vector<8xf32>
    %360 = vector.multi_reduction <add>, %359, %cst_301 [1] : vector<8x8xf32> to vector<8xf32>
    %361 = vector.shape_cast %360 : vector<8xf32> to vector<8x1xf32>
    %362 = vector.broadcast %361 : vector<8x1xf32> to vector<8x8xf32>
    %363 = arith.divf %359, %362 : vector<8x8xf32>
    %cst_302 = arith.constant dense<0.000000e+00> : vector<8x8xf32>
    %364 = tpu.matmul %363, %353, %cst_302 {dimension_numbers = #tpu.dot_dimension_numbers<[1], [0], [0], [1], [0, 0, 1, 1], [], []>} : vector<8x8xf32>, vector<8x8xf32>, vector<8x8xf32> -> vector<8x8xf32>
    %c1_303 = arith.constant 1 : index
    %c2_304 = arith.constant 2 : index
    %c0_305 = arith.constant 0 : index
    %c0_306 = arith.constant 0 : index
    %365 = vector.load %arg11[%c1_303, %c2_304, %c0_305, %c0_306] : memref<2x4x8x32xf32, #tpu.memory_space<vmem>>, vector<1x1x8x32xf32>
    %366 = vector.shape_cast %365 : vector<1x1x8x32xf32> to vector<8x32xf32>
    %cst_307 = arith.constant dense<0.000000e+00> : vector<8x32xf32>
    %367 = tpu.matmul %364, %366, %cst_307 {dimension_numbers = #tpu.dot_dimension_numbers<[1], [0], [0], [1], [0, 0, 1, 1], [], []>} : vector<8x8xf32>, vector<8x32xf32>, vector<8x32xf32> -> vector<8x32xf32>
    %368 = arith.addf %332, %367 : vector<8x32xf32>
    %c1_308 = arith.constant 1 : index
    %c3_309 = arith.constant 3 : index
    %c0_310 = arith.constant 0 : index
    %c0_311 = arith.constant 0 : index
    %369 = vector.load %arg5[%c1_308, %c3_309, %c0_310, %c0_311] : memref<2x4x32x8xf32, #tpu.memory_space<vmem>>, vector<1x1x32x8xf32>
    %370 = vector.shape_cast %369 : vector<1x1x32x8xf32> to vector<32x8xf32>
    %cst_312 = arith.constant dense<0.000000e+00> : vector<8x8xf32>
    %371 = tpu.matmul %259, %370, %cst_312 {dimension_numbers = #tpu.dot_dimension_numbers<[1], [0], [0], [1], [0, 0, 1, 1], [], []>} : vector<8x32xf32>, vector<32x8xf32>, vector<8x8xf32> -> vector<8x8xf32>
    %c1_313 = arith.constant 1 : index
    %c3_314 = arith.constant 3 : index
    %c0_315 = arith.constant 0 : index
    %c0_316 = arith.constant 0 : index
    %372 = vector.load %arg6[%c1_313, %c3_314, %c0_315, %c0_316] : memref<2x4x1x8xf32, #tpu.memory_space<vmem>>, vector<1x1x1x8xf32>
    %373 = vector.shape_cast %372 : vector<1x1x1x8xf32> to vector<1x8xf32>
    %374 = vector.broadcast %373 : vector<1x8xf32> to vector<8x8xf32>
    %375 = arith.addf %371, %374 : vector<8x8xf32>
    %c1_317 = arith.constant 1 : index
    %c3_318 = arith.constant 3 : index
    %c0_319 = arith.constant 0 : index
    %c0_320 = arith.constant 0 : index
    %376 = vector.load %arg7[%c1_317, %c3_318, %c0_319, %c0_320] : memref<2x4x32x8xf32, #tpu.memory_space<vmem>>, vector<1x1x32x8xf32>
    %377 = vector.shape_cast %376 : vector<1x1x32x8xf32> to vector<32x8xf32>
    %cst_321 = arith.constant dense<0.000000e+00> : vector<8x8xf32>
    %378 = tpu.matmul %259, %377, %cst_321 {dimension_numbers = #tpu.dot_dimension_numbers<[1], [0], [0], [1], [0, 0, 1, 1], [], []>} : vector<8x32xf32>, vector<32x8xf32>, vector<8x8xf32> -> vector<8x8xf32>
    %c1_322 = arith.constant 1 : index
    %c3_323 = arith.constant 3 : index
    %c0_324 = arith.constant 0 : index
    %c0_325 = arith.constant 0 : index
    %379 = vector.load %arg8[%c1_322, %c3_323, %c0_324, %c0_325] : memref<2x4x1x8xf32, #tpu.memory_space<vmem>>, vector<1x1x1x8xf32>
    %380 = vector.shape_cast %379 : vector<1x1x1x8xf32> to vector<1x8xf32>
    %381 = vector.broadcast %380 : vector<1x8xf32> to vector<8x8xf32>
    %382 = arith.addf %378, %381 : vector<8x8xf32>
    %c1_326 = arith.constant 1 : index
    %c3_327 = arith.constant 3 : index
    %c0_328 = arith.constant 0 : index
    %c0_329 = arith.constant 0 : index
    %383 = vector.load %arg9[%c1_326, %c3_327, %c0_328, %c0_329] : memref<2x4x32x8xf32, #tpu.memory_space<vmem>>, vector<1x1x32x8xf32>
    %384 = vector.shape_cast %383 : vector<1x1x32x8xf32> to vector<32x8xf32>
    %cst_330 = arith.constant dense<0.000000e+00> : vector<8x8xf32>
    %385 = tpu.matmul %259, %384, %cst_330 {dimension_numbers = #tpu.dot_dimension_numbers<[1], [0], [0], [1], [0, 0, 1, 1], [], []>} : vector<8x32xf32>, vector<32x8xf32>, vector<8x8xf32> -> vector<8x8xf32>
    %c1_331 = arith.constant 1 : index
    %c3_332 = arith.constant 3 : index
    %c0_333 = arith.constant 0 : index
    %c0_334 = arith.constant 0 : index
    %386 = vector.load %arg10[%c1_331, %c3_332, %c0_333, %c0_334] : memref<2x4x1x8xf32, #tpu.memory_space<vmem>>, vector<1x1x1x8xf32>
    %387 = vector.shape_cast %386 : vector<1x1x1x8xf32> to vector<1x8xf32>
    %388 = vector.broadcast %387 : vector<1x8xf32> to vector<8x8xf32>
    %389 = arith.addf %385, %388 : vector<8x8xf32>
    %cst_335 = arith.constant dense<0.000000e+00> : vector<8x8xf32>
    %390 = tpu.matmul %375, %382, %cst_335 {dimension_numbers = #tpu.dot_dimension_numbers<[1], [1], [0], [0], [0, 0, 1, 0], [], []>} : vector<8x8xf32>, vector<8x8xf32>, vector<8x8xf32> -> vector<8x8xf32>
    %cst_336 = arith.constant dense<0xFF800000> : vector<8xf32>
    %391 = vector.multi_reduction <maximumf>, %390, %cst_336 [1] : vector<8x8xf32> to vector<8xf32>
    %392 = vector.shape_cast %391 : vector<8xf32> to vector<8x1xf32>
    %393 = vector.broadcast %392 : vector<8x1xf32> to vector<8x8xf32>
    %394 = arith.subf %390, %393 : vector<8x8xf32>
    %395 = math.exp %394 : vector<8x8xf32>
    %cst_337 = arith.constant dense<0.000000e+00> : vector<8xf32>
    %396 = vector.multi_reduction <add>, %395, %cst_337 [1] : vector<8x8xf32> to vector<8xf32>
    %397 = vector.shape_cast %396 : vector<8xf32> to vector<8x1xf32>
    %398 = vector.broadcast %397 : vector<8x1xf32> to vector<8x8xf32>
    %399 = arith.divf %395, %398 : vector<8x8xf32>
    %cst_338 = arith.constant dense<0.000000e+00> : vector<8x8xf32>
    %400 = tpu.matmul %399, %389, %cst_338 {dimension_numbers = #tpu.dot_dimension_numbers<[1], [0], [0], [1], [0, 0, 1, 1], [], []>} : vector<8x8xf32>, vector<8x8xf32>, vector<8x8xf32> -> vector<8x8xf32>
    %c1_339 = arith.constant 1 : index
    %c3_340 = arith.constant 3 : index
    %c0_341 = arith.constant 0 : index
    %c0_342 = arith.constant 0 : index
    %401 = vector.load %arg11[%c1_339, %c3_340, %c0_341, %c0_342] : memref<2x4x8x32xf32, #tpu.memory_space<vmem>>, vector<1x1x8x32xf32>
    %402 = vector.shape_cast %401 : vector<1x1x8x32xf32> to vector<8x32xf32>
    %cst_343 = arith.constant dense<0.000000e+00> : vector<8x32xf32>
    %403 = tpu.matmul %400, %402, %cst_343 {dimension_numbers = #tpu.dot_dimension_numbers<[1], [0], [0], [1], [0, 0, 1, 1], [], []>} : vector<8x8xf32>, vector<8x32xf32>, vector<8x32xf32> -> vector<8x32xf32>
    %404 = arith.addf %368, %403 : vector<8x32xf32>
    %405 = arith.addf %233, %404 : vector<8x32xf32>
    %c1_344 = arith.constant 1 : index
    %c0_345 = arith.constant 0 : index
    %c0_346 = arith.constant 0 : index
    %406 = vector.load %arg12[%c1_344, %c0_345, %c0_346] : memref<2x1x32xf32, #tpu.memory_space<vmem>>, vector<1x1x32xf32>
    %407 = vector.shape_cast %406 : vector<1x1x32xf32> to vector<1x32xf32>
    %408 = vector.broadcast %407 : vector<1x32xf32> to vector<8x32xf32>
    %409 = arith.addf %405, %408 : vector<8x32xf32>
    %c1_347 = arith.constant 1 : index
    %c0_348 = arith.constant 0 : index
    %c0_349 = arith.constant 0 : index
    %410 = vector.load %arg13[%c1_347, %c0_348, %c0_349] : memref<2x1x32xf32, #tpu.memory_space<vmem>>, vector<1x1x32xf32>
    %411 = vector.shape_cast %410 : vector<1x1x32xf32> to vector<1x32xf32>
    %c1_350 = arith.constant 1 : index
    %c0_351 = arith.constant 0 : index
    %c0_352 = arith.constant 0 : index
    %412 = vector.load %arg14[%c1_350, %c0_351, %c0_352] : memref<2x1x32xf32, #tpu.memory_space<vmem>>, vector<1x1x32xf32>
    %413 = vector.shape_cast %412 : vector<1x1x32xf32> to vector<1x32xf32>
    %cst_353 = arith.constant dense<0.000000e+00> : vector<8xf32>
    %414 = vector.multi_reduction <add>, %409, %cst_353 [1] : vector<8x32xf32> to vector<8xf32>
    %415 = vector.shape_cast %414 : vector<8xf32> to vector<8x1xf32>
    %cst_354 = arith.constant 3.200000e+01 : f32
    %416 = vector.broadcast %cst_354 : f32 to vector<8x1xf32>
    %417 = arith.divf %415, %416 : vector<8x1xf32>
    %418 = vector.broadcast %417 : vector<8x1xf32> to vector<8x32xf32>
    %419 = arith.subf %409, %418 : vector<8x32xf32>
    %420 = arith.mulf %419, %419 : vector<8x32xf32>
    %cst_355 = arith.constant dense<0.000000e+00> : vector<8xf32>
    %421 = vector.multi_reduction <add>, %420, %cst_355 [1] : vector<8x32xf32> to vector<8xf32>
    %422 = vector.shape_cast %421 : vector<8xf32> to vector<8x1xf32>
    %cst_356 = arith.constant 3.200000e+01 : f32
    %423 = vector.broadcast %cst_356 : f32 to vector<8x1xf32>
    %424 = arith.divf %422, %423 : vector<8x1xf32>
    %425 = vector.broadcast %417 : vector<8x1xf32> to vector<8x32xf32>
    %426 = arith.subf %409, %425 : vector<8x32xf32>
    %cst_357 = arith.constant 9.99999974E-6 : f32
    %427 = vector.broadcast %cst_357 : f32 to vector<8x1xf32>
    %428 = arith.addf %424, %427 : vector<8x1xf32>
    %429 = math.rsqrt %428 : vector<8x1xf32>
    %430 = vector.broadcast %429 : vector<8x1xf32> to vector<8x32xf32>
    %431 = arith.mulf %426, %430 : vector<8x32xf32>
    %432 = vector.broadcast %411 : vector<1x32xf32> to vector<8x32xf32>
    %433 = arith.mulf %431, %432 : vector<8x32xf32>
    %434 = vector.broadcast %413 : vector<1x32xf32> to vector<8x32xf32>
    %435 = arith.addf %433, %434 : vector<8x32xf32>
    %c1_358 = arith.constant 1 : index
    %c0_359 = arith.constant 0 : index
    %c0_360 = arith.constant 0 : index
    %436 = vector.load %arg15[%c1_358, %c0_359, %c0_360] : memref<2x32x128xf32, #tpu.memory_space<vmem>>, vector<1x32x128xf32>
    %437 = vector.shape_cast %436 : vector<1x32x128xf32> to vector<32x128xf32>
    %cst_361 = arith.constant dense<0.000000e+00> : vector<8x128xf32>
    %438 = tpu.matmul %435, %437, %cst_361 {dimension_numbers = #tpu.dot_dimension_numbers<[1], [0], [0], [1], [0, 0, 1, 1], [], []>} : vector<8x32xf32>, vector<32x128xf32>, vector<8x128xf32> -> vector<8x128xf32>
    %c1_362 = arith.constant 1 : index
    %c0_363 = arith.constant 0 : index
    %c0_364 = arith.constant 0 : index
    %439 = vector.load %arg16[%c1_362, %c0_363, %c0_364] : memref<2x1x128xf32, #tpu.memory_space<vmem>>, vector<1x1x128xf32>
    %440 = vector.shape_cast %439 : vector<1x1x128xf32> to vector<1x128xf32>
    %441 = vector.broadcast %440 : vector<1x128xf32> to vector<8x128xf32>
    %442 = arith.addf %438, %441 : vector<8x128xf32>
    %443 = arith.mulf %442, %442 : vector<8x128xf32>
    %444 = arith.mulf %442, %443 : vector<8x128xf32>
    %cst_365 = arith.constant 4.471500e-02 : f32
    %445 = vector.broadcast %cst_365 : f32 to vector<8x128xf32>
    %446 = arith.mulf %445, %444 : vector<8x128xf32>
    %447 = arith.addf %442, %446 : vector<8x128xf32>
    %cst_366 = arith.constant 0.797884583 : f32
    %448 = vector.broadcast %cst_366 : f32 to vector<8x128xf32>
    %449 = arith.mulf %448, %447 : vector<8x128xf32>
    %450 = math.tanh %449 : vector<8x128xf32>
    %cst_367 = arith.constant 1.000000e+00 : f32
    %451 = vector.broadcast %cst_367 : f32 to vector<8x128xf32>
    %452 = arith.addf %451, %450 : vector<8x128xf32>
    %cst_368 = arith.constant 5.000000e-01 : f32
    %453 = vector.broadcast %cst_368 : f32 to vector<8x128xf32>
    %454 = arith.mulf %453, %452 : vector<8x128xf32>
    %455 = arith.mulf %442, %454 : vector<8x128xf32>
    %c1_369 = arith.constant 1 : index
    %c0_370 = arith.constant 0 : index
    %c0_371 = arith.constant 0 : index
    %456 = vector.load %arg17[%c1_369, %c0_370, %c0_371] : memref<2x128x32xf32, #tpu.memory_space<vmem>>, vector<1x128x32xf32>
    %457 = vector.shape_cast %456 : vector<1x128x32xf32> to vector<128x32xf32>
    %cst_372 = arith.constant dense<0.000000e+00> : vector<8x32xf32>
    %458 = tpu.matmul %455, %457, %cst_372 {dimension_numbers = #tpu.dot_dimension_numbers<[1], [0], [0], [1], [0, 0, 1, 1], [], []>} : vector<8x128xf32>, vector<128x32xf32>, vector<8x32xf32> -> vector<8x32xf32>
    %c1_373 = arith.constant 1 : index
    %c0_374 = arith.constant 0 : index
    %c0_375 = arith.constant 0 : index
    %459 = vector.load %arg18[%c1_373, %c0_374, %c0_375] : memref<2x1x32xf32, #tpu.memory_space<vmem>>, vector<1x1x32xf32>
    %460 = vector.shape_cast %459 : vector<1x1x32xf32> to vector<1x32xf32>
    %461 = vector.broadcast %460 : vector<1x32xf32> to vector<8x32xf32>
    %462 = arith.addf %458, %461 : vector<8x32xf32>
    %463 = arith.addf %409, %462 : vector<8x32xf32>
    %c0_376 = arith.constant 0 : index
    %c0_377 = arith.constant 0 : index
    %464 = vector.load %arg19[%c0_376, %c0_377] : memref<1x32xf32, #tpu.memory_space<vmem>>, vector<1x32xf32>
    %c0_378 = arith.constant 0 : index
    %c0_379 = arith.constant 0 : index
    %465 = vector.load %arg20[%c0_378, %c0_379] : memref<1x32xf32, #tpu.memory_space<vmem>>, vector<1x32xf32>
    %cst_380 = arith.constant dense<0.000000e+00> : vector<8xf32>
    %466 = vector.multi_reduction <add>, %463, %cst_380 [1] : vector<8x32xf32> to vector<8xf32>
    %467 = vector.shape_cast %466 : vector<8xf32> to vector<8x1xf32>
    %cst_381 = arith.constant 3.200000e+01 : f32
    %468 = vector.broadcast %cst_381 : f32 to vector<8x1xf32>
    %469 = arith.divf %467, %468 : vector<8x1xf32>
    %470 = vector.broadcast %469 : vector<8x1xf32> to vector<8x32xf32>
    %471 = arith.subf %463, %470 : vector<8x32xf32>
    %472 = arith.mulf %471, %471 : vector<8x32xf32>
    %cst_382 = arith.constant dense<0.000000e+00> : vector<8xf32>
    %473 = vector.multi_reduction <add>, %472, %cst_382 [1] : vector<8x32xf32> to vector<8xf32>
    %474 = vector.shape_cast %473 : vector<8xf32> to vector<8x1xf32>
    %cst_383 = arith.constant 3.200000e+01 : f32
    %475 = vector.broadcast %cst_383 : f32 to vector<8x1xf32>
    %476 = arith.divf %474, %475 : vector<8x1xf32>
    %477 = vector.broadcast %469 : vector<8x1xf32> to vector<8x32xf32>
    %478 = arith.subf %463, %477 : vector<8x32xf32>
    %cst_384 = arith.constant 9.99999974E-6 : f32
    %479 = vector.broadcast %cst_384 : f32 to vector<8x1xf32>
    %480 = arith.addf %476, %479 : vector<8x1xf32>
    %481 = math.rsqrt %480 : vector<8x1xf32>
    %482 = vector.broadcast %481 : vector<8x1xf32> to vector<8x32xf32>
    %483 = arith.mulf %478, %482 : vector<8x32xf32>
    %484 = vector.broadcast %464 : vector<1x32xf32> to vector<8x32xf32>
    %485 = arith.mulf %483, %484 : vector<8x32xf32>
    %486 = vector.broadcast %465 : vector<1x32xf32> to vector<8x32xf32>
    %487 = arith.addf %485, %486 : vector<8x32xf32>
    %c0_385 = arith.constant 0 : index
    %c0_386 = arith.constant 0 : index
    %488 = vector.load %arg21[%c0_385, %c0_386] : memref<32x32xf32, #tpu.memory_space<vmem>>, vector<32x32xf32>
    %cst_387 = arith.constant dense<0.000000e+00> : vector<8x32xf32>
    %489 = tpu.matmul %487, %488, %cst_387 {dimension_numbers = #tpu.dot_dimension_numbers<[1], [0], [0], [1], [0, 0, 1, 1], [], []>} : vector<8x32xf32>, vector<32x32xf32>, vector<8x32xf32> -> vector<8x32xf32>
    %490 = vector.shape_cast %489 : vector<8x32xf32> to vector<1x8x32xf32>
    %c0_388 = arith.constant 0 : index
    %c0_389 = arith.constant 0 : index
    %c0_390 = arith.constant 0 : index
    %491 = vector.load %arg22[%c0_388, %c0_389, %c0_390] : memref<1x8x32xf32, #tpu.memory_space<vmem>>, vector<1x8x32xf32>
    tpu.vector_store %arg22[%c0_388, %c0_389, %c0_390], %490 {strides = array<i32>} : memref<1x8x32xf32, #tpu.memory_space<vmem>>, vector<1x8x32xf32>,
    return
  }
  func.func @transform_0(%arg0: i32) -> (i32, i32, i32) {
    %c0_i32 = arith.constant 0 : i32
    %c0_i32_0 = arith.constant 0 : i32
    %c0_i32_1 = arith.constant 0 : i32
    return %arg0, %c0_i32, %c0_i32_0 : i32, i32, i32
  }
  func.func @transform_1(%arg0: i32) -> (i32, i32) {
    %c0_i32 = arith.constant 0 : i32
    %c0_i32_0 = arith.constant 0 : i32
    %c0_i32_1 = arith.constant 0 : i32
    return %c0_i32, %c0_i32_0 : i32, i32
  }
  func.func @transform_2(%arg0: i32) -> (i32, i32, i32) {
    %c0_i32 = arith.constant 0 : i32
    %c0_i32_0 = arith.constant 0 : i32
    %c0_i32_1 = arith.constant 0 : i32
    %c0_i32_2 = arith.constant 0 : i32
    return %c0_i32, %c0_i32_0, %c0_i32_1 : i32, i32, i32
  }
  func.func @transform_3(%arg0: i32) -> (i32, i32, i32) {
    %c0_i32 = arith.constant 0 : i32
    %c0_i32_0 = arith.constant 0 : i32
    %c0_i32_1 = arith.constant 0 : i32
    %c0_i32_2 = arith.constant 0 : i32
    return %c0_i32, %c0_i32_0, %c0_i32_1 : i32, i32, i32
  }
  func.func @transform_4(%arg0: i32) -> (i32, i32, i32, i32) {
    %c0_i32 = arith.constant 0 : i32
    %c0_i32_0 = arith.constant 0 : i32
    %c0_i32_1 = arith.constant 0 : i32
    %c0_i32_2 = arith.constant 0 : i32
    %c0_i32_3 = arith.constant 0 : i32
    return %c0_i32, %c0_i32_0, %c0_i32_1, %c0_i32_2 : i32, i32, i32, i32
  }
  func.func @transform_5(%arg0: i32) -> (i32, i32, i32, i32) {
    %c0_i32 = arith.constant 0 : i32
    %c0_i32_0 = arith.constant 0 : i32
    %c0_i32_1 = arith.constant 0 : i32
    %c0_i32_2 = arith.constant 0 : i32
    %c0_i32_3 = arith.constant 0 : i32
    return %c0_i32, %c0_i32_0, %c0_i32_1, %c0_i32_2 : i32, i32, i32, i32
  }
  func.func @transform_6(%arg0: i32) -> (i32, i32, i32, i32) {
    %c0_i32 = arith.constant 0 : i32
    %c0_i32_0 = arith.constant 0 : i32
    %c0_i32_1 = arith.constant 0 : i32
    %c0_i32_2 = arith.constant 0 : i32
    %c0_i32_3 = arith.constant 0 : i32
    return %c0_i32, %c0_i32_0, %c0_i32_1, %c0_i32_2 : i32, i32, i32, i32
  }
  func.func @transform_7(%arg0: i32) -> (i32, i32, i32, i32) {
    %c0_i32 = arith.constant 0 : i32
    %c0_i32_0 = arith.constant 0 : i32
    %c0_i32_1 = arith.constant 0 : i32
    %c0_i32_2 = arith.constant 0 : i32
    %c0_i32_3 = arith.constant 0 : i32
    return %c0_i32, %c0_i32_0, %c0_i32_1, %c0_i32_2 : i32, i32, i32, i32
  }
  func.func @transform_8(%arg0: i32) -> (i32, i32, i32, i32) {
    %c0_i32 = arith.constant 0 : i32
    %c0_i32_0 = arith.constant 0 : i32
    %c0_i32_1 = arith.constant 0 : i32
    %c0_i32_2 = arith.constant 0 : i32
    %c0_i32_3 = arith.constant 0 : i32
    return %c0_i32, %c0_i32_0, %c0_i32_1, %c0_i32_2 : i32, i32, i32, i32
  }
  func.func @transform_9(%arg0: i32) -> (i32, i32, i32, i32) {
    %c0_i32 = arith.constant 0 : i32
    %c0_i32_0 = arith.constant 0 : i32
    %c0_i32_1 = arith.constant 0 : i32
    %c0_i32_2 = arith.constant 0 : i32
    %c0_i32_3 = arith.constant 0 : i32
    return %c0_i32, %c0_i32_0, %c0_i32_1, %c0_i32_2 : i32, i32, i32, i32
  }
  func.func @transform_10(%arg0: i32) -> (i32, i32, i32, i32) {
    %c0_i32 = arith.constant 0 : i32
    %c0_i32_0 = arith.constant 0 : i32
    %c0_i32_1 = arith.constant 0 : i32
    %c0_i32_2 = arith.constant 0 : i32
    %c0_i32_3 = arith.constant 0 : i32
    return %c0_i32, %c0_i32_0, %c0_i32_1, %c0_i32_2 : i32, i32, i32, i32
  }
  func.func @transform_11(%arg0: i32) -> (i32, i32, i32) {
    %c0_i32 = arith.constant 0 : i32
    %c0_i32_0 = arith.constant 0 : i32
    %c0_i32_1 = arith.constant 0 : i32
    %c0_i32_2 = arith.constant 0 : i32
    return %c0_i32, %c0_i32_0, %c0_i32_1 : i32, i32, i32
  }
  func.func @transform_12(%arg0: i32) -> (i32, i32, i32) {
    %c0_i32 = arith.constant 0 : i32
    %c0_i32_0 = arith.constant 0 : i32
    %c0_i32_1 = arith.constant 0 : i32
    %c0_i32_2 = arith.constant 0 : i32
    return %c0_i32, %c0_i32_0, %c0_i32_1 : i32, i32, i32
  }
  func.func @transform_13(%arg0: i32) -> (i32, i32, i32) {
    %c0_i32 = arith.constant 0 : i32
    %c0_i32_0 = arith.constant 0 : i32
    %c0_i32_1 = arith.constant 0 : i32
    %c0_i32_2 = arith.constant 0 : i32
    return %c0_i32, %c0_i32_0, %c0_i32_1 : i32, i32, i32
  }
  func.func @transform_14(%arg0: i32) -> (i32, i32, i32) {
    %c0_i32 = arith.constant 0 : i32
    %c0_i32_0 = arith.constant 0 : i32
    %c0_i32_1 = arith.constant 0 : i32
    %c0_i32_2 = arith.constant 0 : i32
    return %c0_i32, %c0_i32_0, %c0_i32_1 : i32, i32, i32
  }
  func.func @transform_15(%arg0: i32) -> (i32, i32, i32) {
    %c0_i32 = arith.constant 0 : i32
    %c0_i32_0 = arith.constant 0 : i32
    %c0_i32_1 = arith.constant 0 : i32
    %c0_i32_2 = arith.constant 0 : i32
    return %c0_i32, %c0_i32_0, %c0_i32_1 : i32, i32, i32
  }
  func.func @transform_16(%arg0: i32) -> (i32, i32, i32) {
    %c0_i32 = arith.constant 0 : i32
    %c0_i32_0 = arith.constant 0 : i32
    %c0_i32_1 = arith.constant 0 : i32
    %c0_i32_2 = arith.constant 0 : i32
    return %c0_i32, %c0_i32_0, %c0_i32_1 : i32, i32, i32
  }
  func.func @transform_17(%arg0: i32) -> (i32, i32, i32) {
    %c0_i32 = arith.constant 0 : i32
    %c0_i32_0 = arith.constant 0 : i32
    %c0_i32_1 = arith.constant 0 : i32
    %c0_i32_2 = arith.constant 0 : i32
    return %c0_i32, %c0_i32_0, %c0_i32_1 : i32, i32, i32
  }
  func.func @transform_18(%arg0: i32) -> (i32, i32) {
    %c0_i32 = arith.constant 0 : i32
    %c0_i32_0 = arith.constant 0 : i32
    %c0_i32_1 = arith.constant 0 : i32
    return %c0_i32, %c0_i32_0 : i32, i32
  }
  func.func @transform_19(%arg0: i32) -> (i32, i32) {
    %c0_i32 = arith.constant 0 : i32
    %c0_i32_0 = arith.constant 0 : i32
    %c0_i32_1 = arith.constant 0 : i32
    return %c0_i32, %c0_i32_0 : i32, i32
  }
  func.func @transform_20(%arg0: i32) -> (i32, i32) {
    %c0_i32 = arith.constant 0 : i32
    %c0_i32_0 = arith.constant 0 : i32
    %c0_i32_1 = arith.constant 0 : i32
    return %c0_i32, %c0_i32_0 : i32, i32
  }
  func.func @transform_21(%arg0: i32) -> (i32, i32, i32) {
    %c0_i32 = arith.constant 0 : i32
    %c0_i32_0 = arith.constant 0 : i32
    %c0_i32_1 = arith.constant 0 : i32
    return %arg0, %c0_i32, %c0_i32_0 : i32, i32, i32
  }
}

</mosaic_0001>

<bundles_post_ra>
// kernel: tpu_custom_call.1
= control target key start
LH: loop header
LB: loop body
LE: loop exit
PB: predicated region body
PF: predicated region fallthrough
CT: control target
= control target key end

     0   :  { %s7665_s0 = inlined_call_operand.vmem [shape: f32[2,8,32], index: 0, kind: input, shape index: {}]   ;;  %s7666_s1 = inlined_call_operand.vmem [shape: f32[8,32], index: 1, kind: input, shape index: {}]   ;;  %s7667_s2 = inlined_call_operand.vmem [shape: f32[2,1,32], index: 2, kind: input, shape index: {}]   ;;  %s7668_s3 = inlined_call_operand.vmem [shape: f32[2,1,32], index: 3, kind: input, shape index: {}]   ;;  %s7669_s4 = inlined_call_operand.vmem [shape: f32[2,4,32,8], index: 4, kind: input, shape index: {}]   ;;  %s7670_s5 = inlined_call_operand.vmem [shape: f32[2,4,1,8], index: 5, kind: input, shape index: {}]   ;;  %s7671_s6 = inlined_call_operand.vmem [shape: f32[2,4,32,8], index: 6, kind: input, shape index: {}]   ;;  %s7672_s7 = inlined_call_operand.vmem [shape: f32[2,4,1,8], index: 7, kind: input, shape index: {}]   ;;  %s7673_s8 = inlined_call_operand.vmem [shape: f32[2,4,32,8], index: 8, kind: input, shape index: {}]   ;;  %s7674_s9 = inlined_call_operand.vmem [shape: f32[2,4,1,8], index: 9, kind: input, shape index: {}]   ;;  %s7675_s10 = inlined_call_operand.vmem [shape: f32[2,4,8,32], index: 10, kind: input, shape index: {}]   ;;  %s7676_s11 = inlined_call_operand.vmem [shape: f32[2,1,32], index: 11, kind: input, shape index: {}]   ;;  %s7677_s12 = inlined_call_operand.vmem [shape: f32[2,1,32], index: 12, kind: input, shape index: {}]   ;;  %s7678_s13 = inlined_call_operand.vmem [shape: f32[2,1,32], index: 13, kind: input, shape index: {}]   ;;  %s7679_s14 = inlined_call_operand.vmem [shape: f32[2,32,128], index: 14, kind: input, shape index: {}]   ;;  %s7680_s15 = inlined_call_operand.vmem [shape: f32[2,1,128], index: 15, kind: input, shape index: {}]   ;;  %s7681_s16 = inlined_call_operand.vmem [shape: f32[2,128,32], index: 16, kind: input, shape index: {}]   ;;  %s7682_s17 = inlined_call_operand.vmem [shape: f32[2,1,32], index: 17, kind: input, shape index: {}]   ;;  %s7683_s18 = inlined_call_operand.vmem [shape: f32[1,32], index: 18, kind: input, shape index: {}]   ;;  %s7684_s19 = inlined_call_operand.vmem [shape: f32[1,32], index: 19, kind: input, shape index: {}]   ;;  %s7685_s20 = inlined_call_operand.vmem [shape: f32[32,32], index: 20, kind: input, shape index: {}]   ;;  %s7686_s21 = inlined_call_operand.hbm [shape: f32[2,8,32], index: 21, kind: output, shape index: {}]  }
   0x1   :  { %7701 = sst [smem:[#allocation12_spill]] %s7665_s0 }
   0x2   :  { %7702 = sst [smem:[#allocation13_spill]] %s7666_s1 }
   0x3   :  { %7703 = sst [smem:[#allocation14_spill]] %s7667_s2 }
   0x4   :  { %7704 = sst [smem:[#allocation15_spill]] %s7668_s3 }
   0x5   :  { %7705 = sst [smem:[#allocation16_spill]] %s7669_s4 }
   0x6   :  { %7706 = sst [smem:[#allocation17_spill]] %s7670_s5 }
   0x7   :  { %7707 = sst [smem:[#allocation18_spill]] %s7671_s6 }
   0x8   :  { %7708 = sst [smem:[#allocation19_spill]] %s7672_s7 }
   0x9   :  { %7709 = sst [smem:[#allocation20_spill]] %s7686_s21 }
   0xa   :  { %26 = vsyncpa [#allocation3], 0 }
   0xb   :  { %28 = vsyncpa [#allocation3 + $0x1], 0  ;;  %s6658_s2 = smov 0   ;;  %s6660_s25 = smov 0  }
   0xc   :  { %s6662_s26 = smov 0   ;;  %s6664_s27 = smov 0  }
   0xd LB: > { %7710 = sst [smem:[#allocation5_spill]] %s6530_s2  ;;  %s6679_s3 = sadd.s32 4294967295, %s6542_s27   ;;  %s6542_s27 = sphi %s6664_s27, %s7734_s27   ;;  %s6538_s26 = sphi %s6662_s26, %s7736_s26   ;;  %s6534_s25 = sphi %s6660_s25, %s7738_s25   ;;  %s6530_s2 = sphi %s6658_s2, %s7737_s2  }
   0xe   : > { %7711 = sst [smem:[#allocation6_spill]] %s6538_s26  ;;  %s5230_s28 = sadd.s32 4294967294, %s6542_s27  }
   0xf   : > { %7712 = sst [smem:[#allocation7_spill]] %s6542_s27  ;;  %s6683_s29 = sadd.s32 1, %s6542_s27  }
  0x10   : > { %7713 = sst [smem:[#allocation8_spill]] %s6683_s29  ;;  %s487_s0 = sadd.s32 1, %s6538_s26 }
  0x11   : > { %s484_s4 = ssub.s32 %s6542_s27, %s6683_s29  ;;  %p497_p0 = scmp.ne.s32.totalorder %s6538_s26, %s6534_s25 }
  0x12   : > { %p485_p1 = scmp.eq.s32.totalorder %s484_s4, 0  ;;  %p498_p2 = scmp.eq.s32.totalorder %s6679_s3, 1 }
  0x13   : > { %p503_p3 = scmp.ne.s32.totalorder %s6534_s25, %s6530_s2  ;;  %p504_p4 = scmp.eq.s32.totalorder %s5230_s28, 1 }
  0x14   : > { %s6694_s30 = scalar_select %p485_p1, %s6538_s26, %s487_s0  }
  0x15   : > { %p6696_p5 = por %p498_p2, %p497_p0  ;;  %p6700_p6 = por %p504_p4, %p503_p3 }
  0x16   : > { %7714 = sst [smem:[#allocation9_spill]] %s6694_s30  ;;  %p5233_p7 = scmp.ge.s32.totalorder %s6542_s27, 1 }
  0x17   : > { %s7715_s5 = scalar_select %p6696_p5, 1, 0 }
  0x18   : > { %s7717_s22 = scalar_select %p6700_p6, 1, 0 }
  0x19   : > { %7716 = sst [smem:[#allocation10_spill]] %s7715_s5  ;;  %p589_p8 = scmp.lt.s32.totalorder %s6542_s27, 3 }
  0x1a   : > { %7718 = sst [smem:[#allocation11_spill]] %s7717_s22 }
  0x1b   : > { %p590_p9 = pnand %p5233_p7, %p589_p8 }
  0x1c   : > { %p648_p10 = scmp.lt.s32.totalorder (!%p590_p9), %s6679_s3, 1  ;;  %s7719_s0 = sld [smem:[#allocation13_spill]] (!%p590_p9)  ;;  %vm657_vm0 = vcmask (!%p590_p9), 261120   ;;  %v6544_v12 = vmov (!%p590_p9), 0.0|0.0   ;;  %vm6545_vm1 = vmmov (!%p590_p9), 0   ;;  %v6546_v16 = vmov (!%p590_p9), 0.0  }
  0x1d   : > { %593 = sbr.rel (%p590_p9) target bundleno = 10458 (0x28da), region = 104  ;;  %s7720_s26 = sld [smem:[#allocation12_spill]] (!%p590_p9)  ;;  %6182 = vmatprep.subr.bf16.mxu0 (!%p590_p9), %v6544_v12  ;;  %5703 = vmatprep.mubr.msk.f32.mxu0 (!%p590_p9), %vm6545_vm1, %v6546_v16  ;;  %v851_v32 = vld [vmem:[%s7673_s8] sm:$0xff] (!%p590_p9)  ;;  %v852_v33 = vld [vmem:[%s7673_s8 + $0x8] sm:$0xff] (!%p590_p9)  ;;  %v853_v35 = vld [vmem:[%s7673_s8 + $0x10] sm:$0xff] (!%p590_p9)  ;;  %vm932_vm2 = vcmask (!%p590_p9), 64512  }
  0x1e   : > { %s7721_s30 = sld [smem:[#allocation16_spill]] (!%p590_p9)  ;;  %5728 = vmatprep.subr.mxu1 (!%p590_p9), %v6546_v16  ;;  %5730 = vmatprep.mubr.msk.f32.mxu1 (!%p590_p9), %vm6545_vm1, %v6546_v16  ;;  %s7724_s6 = sld [smem:[#allocation18_spill]] (!%p590_p9)  ;;  %v6195_v34 = vpack.c.bf16 (!%p590_p9), %v852_v33, %v851_v32  ;;  %v854_v36 = vld [vmem:[%s7673_s8 + $0x18] sm:$0xff] (!%p590_p9)  ;;  %v5261_v44 = vld [vmem:[%s7673_s8 + $0x20] sm:$0xff] (!%p590_p9)  ;;  %v5262_v45 = vld [vmem:[%s7673_s8 + $0x28] sm:$0xff] (!%p590_p9) }
  0x1f   : > { %s7725_s27 = sld [smem:[#allocation15_spill]] (!%p590_p9)  ;;  %v6198_v37 = vpack.c.bf16 (!%p590_p9), %v854_v36, %v853_v35  ;;  %v6213_v46 = vpack.c.bf16 (!%p590_p9), %v5262_v45, %v5261_v44  ;;  %v5263_v47 = vld [vmem:[%s7673_s8 + $0x30] sm:$0xff] (!%p590_p9)  ;;  %v5264_v48 = vld [vmem:[%s7673_s8 + $0x38] sm:$0xff] (!%p590_p9)  ;;  %s7727_s7 = sld [smem:[#allocation19_spill]] (!%p590_p9)  ;;  %v5242_v58 = vld [vmem:[%s7674_s9] ss:$0 sm:$0xff] (!%p590_p9) }
  0x20   : > { %v6216_v49 = vpack.c.bf16 (!%p590_p9), %v5264_v48, %v5263_v47  ;;  %v1093_v45 = vld [vmem:[%s7675_s10] sm:$0xff] (!%p590_p9)  ;;  %s645_s28 = sand.u32 (!%p590_p9), 1, %s6534_s25  }
  0x21   : > { %s5234_s4 = sshll.u32 (!%p590_p9), %s645_s28, 3 }
  0x22   : > { %v653_v0 = vld [vmem:[%s7719_s0] sm:$0xff] (!%p590_p9)  ;;  %s7728_s0 = sld [smem:[#allocation17_spill]] (!%p590_p9)  ;;  %s647_s24 = scalar_lea.vmem (!%p590_p9), [#allocation2], %s5234_s4 }
  0x24   : > { %s649_s23 = scalar_select %p648_p10, %s6679_s3, 1  ;;  %v686_v9 = vld [vmem:[%s7721_s30] sm:$0xff]  ;;  %v687_v10 = vld [vmem:[%s7721_s30 + $0x8] sm:$0xff]  ;;  %v688_v13 = vld [vmem:[%s7721_s30 + $0x10] sm:$0xff] }
  0x25   : > { %v6183_v11 = vpack.c.bf16 %v687_v10, %v686_v9  ;;  %v689_v14 = vld [vmem:[%s7721_s30 + $0x18] sm:$0xff]  ;;  %v770_v23 = vld [vmem:[%s7724_s6] sm:$0xff]  ;;  %v771_v24 = vld [vmem:[%s7724_s6 + $0x8] sm:$0xff]  ;;  %s7726_s21 = smov %s7725_s27 }
  0x26   : > { %s5235_s1 = sshll.u32 %s649_s23, 3  ;;  %v6186_v15 = vpack.c.bf16 %v689_v14, %v688_v13  ;;  %v5237_v25 = vld [vmem:[%s7725_s27] ss:$0 sm:$0xff]  ;;  %v6189_v27 = vpack.c.bf16 %v771_v24, %v770_v23  ;;  %v772_v29 = vld [vmem:[%s7724_s6 + $0x10] sm:$0xff]  ;;  %v773_v30 = vld [vmem:[%s7724_s6 + $0x18] sm:$0xff]  ;;  %s5475_s23 = sshll.u32 %s6679_s3, 7 }
  0x27   : > { %s651_s29 = scalar_lea.vmem %s7720_s26, %s5235_s1  ;;  %6184 = vmatpush3.bf16.msra.mxu0 %v6183_v11  ;;  %s7722_s26 = sld [smem:[#allocation14_spill]]  ;;  %v6192_v31 = vpack.c.bf16 %v773_v30, %v772_v29  ;;  %v5247_v38 = vld [vmem:[%s7721_s30 + $0x20] sm:$0xff]  ;;  %v5248_v39 = vld [vmem:[%s7721_s30 + $0x28] sm:$0xff]  ;;  %v5249_v41 = vld [vmem:[%s7721_s30 + $0x30] sm:$0xff] }
  0x28   : > { %v652_v1 = vld [vmem:[%s651_s29] sm:$0xff]  ;;  %6185 = vmatprep.subr.bf16.mxu0 %v6544_v12  ;;  %v6201_v40 = vpack.c.bf16 %v5248_v39, %v5247_v38  ;;  %v5250_v42 = vld [vmem:[%s7721_s30 + $0x38] sm:$0xff]  ;;  %v5255_v14 = vld [vmem:[%s7724_s6 + $0x28] sm:$0xff]  ;;  %s5158_s27 = scalar_lea.sflag [#allocation3], %s645_s28  ;;  %s6547_s3 = smov [#allocation2]  }
  0x29   : > { %v6714_v2 = vadd.f32 %v653_v0, %v652_v1  ;;  %v6204_v43 = vpack.c.bf16 %v5250_v42, %v5249_v41  ;;  %v5240_v52 = vld [vmem:[%s7727_s7] ss:$0 sm:$0xff]  ;;  %v5259_v24 = vld [vmem:[%s7727_s7 + $0x1] ss:$0 sm:$0xff]  ;;  %v5271_v41 = vld [vmem:[%s7675_s10 + $0x8] sm:$0xff]  ;;  %s6484_s22 = sshll.u32 %s6547_s3, 4  ;;  %s6485_s22 = int_to_ptr.vmem [resolvable:$false] %s6484_s22 }
  0x2a   : > { %v5238_v54 = vld [vmem:[%s7728_s0] ss:$0 sm:$0xff]  ;;  %v5266_v30 = vld [vmem:[%s7674_s9 + $0x1] ss:$0 sm:$0xff]  ;;  %v5282_v47 = vld [vmem:[%s7724_s6 + $0x48] sm:$0xff] }
  0x2b   : > { %v658_v3 = vsel %vm657_vm0, %v6714_v2, 0.0  ;;  %6187 = vmatpush3.bf16.msra.mxu0 %v6186_v15  ;;  %v5254_v13 = vld [vmem:[%s7724_s6 + $0x20] sm:$0xff] }
  0x2c   : > { %659 = vadd.xlane.f32.xlu0 %v658_v3  ;;  %6188 = vmatprep.subr.bf16.mxu0 %v6544_v12 }
  0x2d   : > { %s7723_s29 = smov %s7722_s26  ;;  %v5236_v21 = vld [vmem:[%s7722_s26] ss:$0 sm:$0xff]  ;;  %s5171_s26 = sshll.u32 %s647_s24, 4  ;;  %s7624_s26 = int_to_ptr.vmem [resolvable:$true] %s5171_s26 }
  0x2e   : > { %s6480_s5 = scalar_lea.vmem %s7624_s26, 128  ;;  %p6487_p0 = scmp.lt.s32.totalorder %s7624_s26, %s6485_s22 }
  0x2f   : > { %p6481_p11 = scmp.ne.s32.totalorder %s7624_s26, %s6480_s5 }
  0x31   : > { %p6482_p12 = pnand %p6481_p11, %p6696_p5 }
  0x33   : > { %p6483_p13 = pneg %p6482_p12 }
  0xb9   : > { %v660_v4 = vpop.xlane.xlu0 %659 }
  0xba   : > { %v662_v5 = vmul.f32 0.03125, %v660_v4 }
  0xbc   : > { %v663_v6 = vsub.f32 %v6714_v2, %v662_v5 }
  0xbe   : > { %v664_v7 = vmul.f32 %v663_v6, %v663_v6 }
  0xc0   : > { %v665_v8 = vsel %vm657_vm0, %v664_v7, 0.0 }
  0xc1   : > { %666 = vadd.xlane.f32.xlu0 %v665_v8 }
 0x14e   : > { %v667_v17 = vpop.xlane.xlu0 %666 }
 0x14f   : > { %v668_v18 = vmul.f32 0.03125, %v667_v17  ;;  %v6207_v17 = vpack.c.bf16 %v5255_v14, %v5254_v13  ;;  %v5279_v13 = vld [vmem:[%s7728_s0 + $0x2] ss:$0 sm:$0xff] }
 0x151   : > { %v669_v19 = vadd.f32 1e-05, %v668_v18 }
 0x153   : > { %6434 = vrsqrt.f32 %v669_v19  ;;  %v5256_v19 = vld [vmem:[%s7724_s6 + $0x30] sm:$0xff] }
 0x15d   : > { %v6435_v20 = vpop.eup %6434 }
 0x15e   : > { %v671_v22 = vmul.f32 %v6435_v20, %v663_v6  ;;  %v5257_v20 = vld [vmem:[%s7724_s6 + $0x38] sm:$0xff] }
 0x160   : > { %v678_v26 = vmul.f32 %v5236_v21, %v671_v22  ;;  %v6210_v21 = vpack.c.bf16 %v5257_v20, %v5256_v19 }
 0x162   : > { %v6752_v28 = vadd.f32 %v5237_v25, %v678_v26  ;;  %v5252_v26 = vld [vmem:[%s7728_s0 + $0x1] ss:$0 sm:$0xff] }
 0x164   : > { %5704 = vmatmul.mubr.msk.f32.vlgmr.msra.gmra.mrb[0].mxu0 %vm657_vm0, %v6752_v28 }
 0x165   : > { %6190 = vmatpush3.bf16.msra.mxu0 %v6189_v27  ;;  %5714 = vmatprep.mubr.msk.f32.mxu0 %vm6545_vm1, %v6546_v16 }
 0x166   : > { %6191 = vmatprep.subr.bf16.mxu0 %v6544_v12 }
 0x169   : > { %6193 = vmatpush3.bf16.msra.mxu0 %v6192_v31 }
 0x16a   : > { %6194 = vmatprep.subr.bf16.mxu0 %v6544_v12 }
 0x16c   : > { %5715 = vmatmul.mubr.msk.f32.vlgmr.msra.gmra.mrb[2].mxu0 %vm657_vm0, %v6752_v28 }
 0x16d   : > { %6196 = vmatpush3.bf16.msra.mxu0 %v6195_v34  ;;  %5725 = vmatprep.mubr.msk.f32.mxu0 %vm6545_vm1, %v6546_v16 }
 0x16e   : > { %6197 = vmatprep.subr.bf16.mxu0 %v6544_v12 }
 0x171   : > { %6199 = vmatpush3.bf16.msra.mxu0 %v6198_v37 }
 0x172   : > { %6200 = vmatprep.subr.bf16.mxu0 %v6544_v12 }
 0x174   : > { %5726 = vmatmul.mubr.msk.f32.vlgmr.msra.gmra.mrb[4].mxu0 %vm657_vm0, %v6752_v28 }
 0x175   : > { %6202 = vmatpush3.bf16.msra.mxu0 %v6201_v40  ;;  %5746 = vmatprep.mubr.msk.f32.mxu0 %vm6545_vm1, %v6546_v16 }
 0x176   : > { %6203 = vmatprep.subr.bf16.mxu0 %v6544_v12 }
 0x179   : > { %6205 = vmatpush3.bf16.msra.mxu0 %v6204_v43 }
 0x17a   : > { %6212 = vmatprep.subr.bf16.mxu0 %v6544_v12 }
 0x17c   : > { %5747 = vmatmul.mubr.msk.f32.vlgmr.msra.gmra.mrb[6].mxu0 %vm657_vm0, %v6752_v28 }
 0x17d   : > { %6214 = vmatpush3.bf16.msra.mxu0 %v6213_v46  ;;  %5768 = vmatprep.mubr.msk.f32.mxu0 %vm6545_vm1, %v6546_v16  ;;  %v5281_v46 = vld [vmem:[%s7724_s6 + $0x40] sm:$0xff] }
 0x17e   : > { %6215 = vmatprep.subr.bf16.mxu0 %v6544_v12  ;;  %v6225_v48 = vpack.c.bf16 %v5282_v47, %v5281_v46  ;;  %v5307_v47 = vld [vmem:[%s7724_s6 + $0x60] sm:$0xff] }
 0x181   : > { %6217 = vmatpush3.bf16.msra.mxu0 %v6216_v49  ;;  %v5283_v49 = vld [vmem:[%s7724_s6 + $0x50] sm:$0xff] }
 0x182   : > { %5781 = vmatprep.subr.mxu0 %v6546_v16 }
 0x184   : > { %5769 = vmatmul.mubr.msk.f32.vlgmr.msra.gmra.mrb[8].mxu0 %vm657_vm0, %v6752_v28 }
 0x185   : > { %5783 = vmatprep.mubr.msk.f32.mxu0 %vm6545_vm1, %v6546_v16  ;;  %5782 = vmatpush3.msra.mxu0 %v5271_v41  ;;  %v5314_v41 = vld [vmem:[%s7673_s8 + $0x60] sm:$0xff] }
 0x186   : > { %6218 = vmatprep.subr.bf16.mxu0 %v6544_v12 }
 0x237   : > { %v766_v50 = vpop.f32.mrb[0].mxu0 }
 0x238   : > { %v5705_v51 = vpop.f32.mrb[1].mxu0  ;;  %v767_v57 = vadd.f32 %v5238_v54, %v766_v50  ;;  %v5284_v50 = vld [vmem:[%s7724_s6 + $0x58] sm:$0xff] }
 0x239   : > { %v6228_v51 = vpack.c.bf16 %v5284_v50, %v5283_v49  ;;  %v5309_v50 = vld [vmem:[%s7724_s6 + $0x70] sm:$0xff] }
 0x23f   : > { %v847_v53 = vpop.f32.mrb[2].mxu0 }
 0x240   : > { %v848_v55 = vadd.f32 %v5240_v52, %v847_v53  ;;  %v5716_v56 = vpop.f32.mrb[3].mxu0  ;;  %v5274_v52 = vld [vmem:[%s7721_s30 + $0x40] sm:$0xff]  ;;  %v5275_v53 = vld [vmem:[%s7721_s30 + $0x48] sm:$0xff] }
 0x241   : > { %v6219_v54 = vpack.c.bf16 %v5275_v53, %v5274_v52  ;;  %v5277_v56 = vld [vmem:[%s7721_s30 + $0x58] sm:$0xff] }
 0x242   : > { %5729 = vmatpush3.xpose.msk.msra.mxu1 %vm932_vm2, %v848_v55  ;;  %v5276_v55 = vld [vmem:[%s7721_s30 + $0x50] sm:$0xff] }
 0x243   : > { %5733 = vmatprep.subr.mxu1 %v6546_v16 }
 0x245   : > { %5731 = vmatmul.mubr.msk.f32.vlgmr.msra.gmra.mrb[0].mxu1 %vm932_vm2, %v767_v57 }
 0x246   : > { %5735 = vmatprep.mubr.msk.f32.mxu1 %vm6545_vm1, %v6546_v16 }
 0x247   : > { %v928_v59 = vpop.f32.mrb[4].mxu0 }
 0x248   : > { %v929_v60 = vadd.f32 %v5242_v58, %v928_v59  ;;  %v5727_v61 = vpop.f32.mrb[5].mxu0  ;;  %v6222_v59 = vpack.c.bf16 %v5277_v56, %v5276_v55 }
 0x249   : > { %v5289_v61 = vld [vmem:[%s7673_s8 + $0x48] sm:$0xff] }
 0x24a   : > { %5734 = vmatpush3.msra.mxu1 %v929_v60  ;;  %v5288_v60 = vld [vmem:[%s7673_s8 + $0x40] sm:$0xff] }
 0x24b   : > { %6206 = vmatprep.subr.bf16.mxu1 %v6544_v12 }
 0x24f   : > { %v1173_v62 = vpop.f32.mrb[6].mxu0 }
 0x250   : > { %v5748_v63 = vpop.f32.mrb[7].mxu0  ;;  %v1174_v31 = vadd.f32 %v5252_v26, %v1173_v62 }
 0x257   : > { %v1339_v0 = vpop.f32.mrb[8].mxu0 }
 0x258   : > { %v5770_v1 = vpop.f32.mrb[9].mxu0  ;;  %v1340_v32 = vadd.f32 %v5266_v30, %v1339_v0  ;;  %v6231_v0 = vpack.c.bf16 %v5289_v61, %v5288_v60 }
 0x259   : > { %v5290_v1 = vld [vmem:[%s7673_s8 + $0x50] sm:$0xff] }
 0x318   : > { %v1005_v3 = vpop.f32.mrb[0].mxu1 }
 0x319   : > { %v5732_v4 = vpop.f32.mrb[1].mxu1  ;;  %v1009_v5 = vsel %vm932_vm2, %v1005_v3, -inf }
 0x31a   : > { %1010 = vmax.xlane.f32.xlu1 %v1009_v5  ;;  %v5286_v4 = vld [vmem:[%s7727_s7 + $0x2] ss:$0 sm:$0xff] }
 0x3a7   : > { %v1011_v6 = vpop.xlane.xlu1 %1010 }
 0x3a8   : > { %v1012_v7 = vsub.f32 %v1005_v3, %v1011_v6  ;;  %v5291_v3 = vld [vmem:[%s7673_s8 + $0x58] sm:$0xff] }
 0x3a9   : > { %v6234_v5 = vpack.c.bf16 %v5291_v3, %v5290_v1  ;;  %v5319_v3 = vld [vmem:[%s7674_s9 + $0x3] ss:$0 sm:$0xff] }
 0x3aa   : > { %v1013_v8 = vmul.f32 1.442695, %v1012_v7 }
 0x3ac   : > { %6436 = vpow2.f32 %v1013_v8 }
 0x3b6   : > { %v6437_v9 = vpop.eup %6436 }
 0x3b7   : > { %v1015_v10 = vsel %vm932_vm2, %v6437_v9, 0.0 }
 0x3b8   : > { %1016 = vadd.xlane.f32.xlu1 %v1015_v10 }
 0x445   : > { %v1017_v11 = vpop.xlane.xlu1 %1016 }
 0x446   : > { %6438 = vrcp.f32 %v1017_v11 }
 0x450   : > { %v6439_v15 = vpop.eup %6438 }
 0x451   : > { %v1019_v18 = vmul.f32 %v6439_v15, %v6437_v9 }
 0x453   : > { %5736 = vmatmul.mubr.msk.f32.vlgmr.msra.gmra.mrb[2].mxu1 %vm932_vm2, %v1019_v18  ;;  %v5293_v18 = vld [vmem:[%s7674_s9 + $0x2] ss:$0 sm:$0xff] }
 0x454   : > { %6208 = vmatpush3.bf16.msra.mxu1 %v6207_v17  ;;  %5757 = vmatprep.mubr.msk.f32.mxu1 %vm6545_vm1, %v6546_v16 }
 0x455   : > { %6209 = vmatprep.subr.bf16.mxu1 %v6544_v12 }
 0x458   : > { %6211 = vmatpush3.bf16.msra.mxu1 %v6210_v21 }
 0x459   : > { %5771 = vmatprep.subr.mxu1 %v6546_v16 }
 0x45b   : > { %5758 = vmatmul.mubr.msk.f32.vlgmr.msra.gmra.mrb[4].mxu1 %vm657_vm0, %v6752_v28 }
 0x45c   : > { %5773 = vmatprep.mubr.msk.f32.mxu1 %vm6545_vm1, %v6546_v16 }
 0x526   : > { %v1089_v22 = vpop.f32.mrb[2].mxu1 }
 0x527   : > { %v5737_v23 = vpop.f32.mrb[3].mxu1 }
 0x52e   : > { %v1256_v25 = vpop.f32.mrb[4].mxu1 }
 0x52f   : > { %v1257_v27 = vadd.f32 %v5259_v24, %v1256_v25  ;;  %v5759_v29 = vpop.f32.mrb[5].mxu1 }
 0x531   : > { %5772 = vmatpush3.xpose.msk.msra.mxu1 %vm932_vm2, %v1257_v27 }
 0x532   : > { %5776 = vmatprep.subr.mxu1 %v6546_v16 }
 0x534   : > { %5774 = vmatmul.mubr.msk.f32.vlgmr.msra.gmra.mrb[6].mxu1 %vm932_vm2, %v1174_v31  ;;  %v5298_v31 = vld [vmem:[%s7675_s10 + $0x10] sm:$0xff] }
 0x535   : > { %5777 = vmatpush3.msra.mxu1 %v1340_v32  ;;  %5778 = vmatprep.mubr.msk.f32.mxu1 %vm6545_vm1, %v6546_v16 }
 0x536   : > { %5786 = vmatprep.subr.mxu1 %v6546_v16 }
 0x607   : > { %v1415_v33 = vpop.f32.mrb[6].mxu1 }
 0x608   : > { %v5775_v34 = vpop.f32.mrb[7].mxu1  ;;  %v1419_v35 = vsel %vm932_vm2, %v1415_v33, -inf }
 0x609   : > { %1420 = vmax.xlane.f32.xlu0 %v1419_v35  ;;  %v5301_v34 = vld [vmem:[%s7721_s30 + $0x68] sm:$0xff] }
 0x696   : > { %v1421_v36 = vpop.xlane.xlu0 %1420 }
 0x697   : > { %v1422_v37 = vsub.f32 %v1415_v33, %v1421_v36  ;;  %v5300_v33 = vld [vmem:[%s7721_s30 + $0x60] sm:$0xff] }
 0x698   : > { %v6237_v36 = vpack.c.bf16 %v5301_v34, %v5300_v33 }
 0x699   : > { %v1423_v38 = vmul.f32 1.442695, %v1422_v37 }
 0x69b   : > { %6440 = vpow2.f32 %v1423_v38  ;;  %v5302_v38 = vld [vmem:[%s7721_s30 + $0x70] sm:$0xff] }
 0x6a5   : > { %v6441_v39 = vpop.eup %6440 }
 0x6a6   : > { %v1425_v40 = vsel %vm932_vm2, %v6441_v39, 0.0 }
 0x6a7   : > { %1426 = vadd.xlane.f32.xlu1 %v1425_v40 }
 0x734   : > { %v1427_v42 = vpop.xlane.xlu1 %1426 }
 0x735   : > { %6442 = vrcp.f32 %v1427_v42  ;;  %v5315_v42 = vld [vmem:[%s7673_s8 + $0x68] sm:$0xff] }
 0x73f   : > { %v6443_v43 = vpop.eup %6442 }
 0x740   : > { %v1429_v44 = vmul.f32 %v6443_v43, %v6441_v39  ;;  %v5303_v39 = vld [vmem:[%s7721_s30 + $0x78] sm:$0xff]  ;;  %v6249_v43 = vpack.c.bf16 %v5315_v42, %v5314_v41  ;;  %v2753_v41 = vld [vmem:[%s7681_s16 + $0x8] sm:$0xff] }
 0x741   : > { %v6240_v40 = vpack.c.bf16 %v5303_v39, %v5302_v38  ;;  %v2662_v38 = vld [vmem:[%s7679_s14 + $0x18] sm:$0xff] }
 0x742   : > { %5779 = vmatmul.mubr.msk.f32.vlgmr.msra.gmra.mrb[8].mxu1 %vm932_vm2, %v1429_v44  ;;  %v5316_v44 = vld [vmem:[%s7673_s8 + $0x70] sm:$0xff] }
 0x743   : > { %5787 = vmatpush3.msra.mxu1 %v1093_v45  ;;  %5788 = vmatprep.mubr.msk.f32.mxu1 %vm6545_vm1, %v6546_v16  ;;  %v5317_v45 = vld [vmem:[%s7673_s8 + $0x78] sm:$0xff] }
 0x744   : > { %6224 = vmatprep.subr.bf16.mxu1 %v6544_v12  ;;  %v6252_v46 = vpack.c.bf16 %v5317_v45, %v5316_v44 }
 0x746   : > { %5789 = vmatmul.mubr.msk.f32.vlgmr.msra.gmra.mrb[10].mxu1 %vm932_vm2, %v1089_v22 }
 0x747   : > { %6226 = vmatpush3.bf16.msra.mxu1 %v6225_v48  ;;  %5810 = vmatprep.mubr.msk.f32.mxu1 %vm6545_vm1, %v6546_v16  ;;  %v5308_v48 = vld [vmem:[%s7724_s6 + $0x68] sm:$0xff] }
 0x748   : > { %6227 = vmatprep.subr.bf16.mxu1 %v6544_v12  ;;  %v6243_v49 = vpack.c.bf16 %v5308_v48, %v5307_v47  ;;  %v5327_v47 = vld [vmem:[%s7677_s12] ss:$0 sm:$0xff] }
 0x74b   : > { %6229 = vmatpush3.bf16.msra.mxu1 %v6228_v51  ;;  %v5310_v51 = vld [vmem:[%s7724_s6 + $0x78] sm:$0xff] }
 0x74c   : > { %5824 = vmatprep.subr.mxu1 %v6546_v16 }
 0x74e   : > { %5811 = vmatmul.mubr.msk.f32.vlgmr.msra.gmra.mrb[12].mxu1 %vm657_vm0, %v6752_v28 }
 0x74f   : > { %5826 = vmatprep.mubr.msk.f32.mxu1 %vm6545_vm1, %v6546_v16 }
 0x815   : > { %v1499_v57 = vpop.f32.mrb[8].mxu1 }
 0x816   : > { %v5780_v58 = vpop.f32.mrb[9].mxu1  ;;  %5784 = vmatmul.mubr.msk.f32.vlgmr.msra.gmra.mrb[10].mxu0 %vm932_vm2, %v1499_v57 }
 0x817   : > { %6220 = vmatpush3.bf16.msra.mxu0 %v6219_v54  ;;  %5799 = vmatprep.mubr.msk.f32.mxu0 %vm6545_vm1, %v6546_v16  ;;  %v6246_v54 = vpack.c.bf16 %v5310_v51, %v5309_v50 }
 0x818   : > { %6221 = vmatprep.subr.bf16.mxu0 %v6544_v12 }
 0x819   : > { %v1647_v62 = vpop.f32.mrb[10].mxu1 }
 0x81a   : > { %v5790_v63 = vpop.f32.mrb[11].mxu1 }
 0x81b   : > { %6223 = vmatpush3.bf16.msra.mxu0 %v6222_v59 }
 0x81c   : > { %6230 = vmatprep.subr.bf16.mxu0 %v6544_v12 }
 0x81e   : > { %5800 = vmatmul.mubr.msk.f32.vlgmr.msra.gmra.mrb[12].mxu0 %vm657_vm0, %v6752_v28 }
 0x81f   : > { %6232 = vmatpush3.bf16.msra.mxu0 %v6231_v0  ;;  %5821 = vmatprep.mubr.msk.f32.mxu0 %vm6545_vm1, %v6546_v16  ;;  %v5305_v0 = vld [vmem:[%s7728_s0 + $0x3] ss:$0 sm:$0xff] }
 0x820   : > { %6233 = vmatprep.subr.bf16.mxu0 %v6544_v12 }
 0x821   : > { %v1813_v6 = vpop.f32.mrb[12].mxu1 }
 0x822   : > { %v1814_v7 = vadd.f32 %v5286_v4, %v1813_v6  ;;  %v5812_v8 = vpop.f32.mrb[13].mxu1 }
 0x823   : > { %6235 = vmatpush3.bf16.msra.mxu0 %v6234_v5 }
 0x824   : > { %5825 = vmatpush3.xpose.msk.msra.mxu1 %vm932_vm2, %v1814_v7  ;;  %5834 = vmatprep.subr.mxu0 %v6546_v16 }
 0x825   : > { %5829 = vmatprep.subr.mxu1 %v6546_v16 }
 0x826   : > { %5822 = vmatmul.mubr.msk.f32.vlgmr.msra.gmra.mrb[14].mxu0 %vm657_vm0, %v6752_v28 }
 0x827   : > { %5836 = vmatprep.mubr.msk.f32.mxu0 %vm6545_vm1, %v6546_v16  ;;  %5835 = vmatpush3.msra.mxu0 %v5298_v31 }
 0x828   : > { %6242 = vmatprep.subr.bf16.mxu0 %v6544_v12 }
 0x8e9   : > { %v1574_v9 = vpop.f32.mrb[10].mxu0 }
 0x8ea   : > { %v6955_v10 = vadd.f32 %v1647_v62, %v1574_v9  ;;  %v5785_v11 = vpop.f32.mrb[11].mxu0  ;;  %v5312_v62 = vld [vmem:[%s7727_s7 + $0x3] ss:$0 sm:$0xff] }
 0x8f1   : > { %v1730_v14 = vpop.f32.mrb[12].mxu0 }
 0x8f2   : > { %v1731_v15 = vadd.f32 %v5279_v13, %v1730_v14  ;;  %v5801_v17 = vpop.f32.mrb[13].mxu0 }
 0x8f4   : > { %5827 = vmatmul.mubr.msk.f32.vlgmr.msra.gmra.mrb[14].mxu1 %vm932_vm2, %v1731_v15  ;;  %v5324_v15 = vld [vmem:[%s7675_s10 + $0x18] sm:$0xff] }
 0x8f5   : > { %5831 = vmatprep.mubr.msk.f32.mxu1 %vm6545_vm1, %v6546_v16 }
 0x8f9   : > { %v1896_v19 = vpop.f32.mrb[14].mxu0 }
 0x8fa   : > { %v1897_v20 = vadd.f32 %v5293_v18, %v1896_v19  ;;  %v5823_v21 = vpop.f32.mrb[15].mxu0 }
 0x8fc   : > { %5830 = vmatpush3.msra.mxu1 %v1897_v20 }
 0x8fd   : > { %6236 = vmatprep.subr.bf16.mxu1 %v6544_v12 }
 0x9c7   : > { %v1972_v22 = vpop.f32.mrb[14].mxu1 }
 0x9c8   : > { %v5828_v23 = vpop.f32.mrb[15].mxu1  ;;  %v1976_v24 = vsel %vm932_vm2, %v1972_v22, -inf }
 0x9c9   : > { %1977 = vmax.xlane.f32.xlu0 %v1976_v24 }
 0xa56   : > { %v1978_v25 = vpop.xlane.xlu0 %1977 }
 0xa57   : > { %v1979_v26 = vsub.f32 %v1972_v22, %v1978_v25  ;;  %v5326_v25 = vld [vmem:[%s7676_s11] ss:$0 sm:$0xff] }
 0xa59   : > { %v1980_v27 = vmul.f32 1.442695, %v1979_v26 }
 0xa5b   : > { %6444 = vpow2.f32 %v1980_v27 }
 0xa65   : > { %v6445_v29 = vpop.eup %6444 }
 0xa66   : > { %v1982_v30 = vsel %vm932_vm2, %v6445_v29, 0.0 }
 0xa67   : > { %1983 = vadd.xlane.f32.xlu1 %v1982_v30 }
 0xaf4   : > { %v1984_v32 = vpop.xlane.xlu1 %1983 }
 0xaf5   : > { %6446 = vrcp.f32 %v1984_v32 }
 0xaff   : > { %v6447_v35 = vpop.eup %6446 }
 0xb00   : > { %v1986_v37 = vmul.f32 %v6447_v35, %v6445_v29  ;;  %v2659_v35 = vld [vmem:[%s7679_s14] sm:$0xff] }
 0xb02   : > { %5832 = vmatmul.mubr.msk.f32.vlgmr.msra.gmra.mrb[16].mxu1 %vm932_vm2, %v1986_v37  ;;  %v2661_v37 = vld [vmem:[%s7679_s14 + $0x10] sm:$0xff] }
 0xb03   : > { %6238 = vmatpush3.bf16.msra.mxu1 %v6237_v36  ;;  %5847 = vmatprep.mubr.msk.f32.mxu1 %vm6545_vm1, %v6546_v16  ;;  %v6258_v39 = vpack.c.bf16 %v2662_v38, %v2661_v37  ;;  %v5338_v38 = vld [vmem:[%s7721_s30 + $0x90] sm:$0xff] }
 0xb04   : > { %6239 = vmatprep.subr.bf16.mxu1 %v6544_v12 }
 0xb07   : > { %6241 = vmatpush3.bf16.msra.mxu1 %v6240_v40  ;;  %v2752_v40 = vld [vmem:[%s7681_s16] sm:$0xff] }
 0xb08   : > { %6248 = vmatprep.subr.bf16.mxu1 %v6544_v12  ;;  %v6261_v42 = vpack.c.bf16 %v2753_v41, %v2752_v40 }
 0xb0a   : > { %5848 = vmatmul.mubr.msk.f32.vlgmr.msra.gmra.mrb[18].mxu1 %vm657_vm0, %v6752_v28 }
 0xb0b   : > { %6250 = vmatpush3.bf16.msra.mxu1 %v6249_v43  ;;  %5869 = vmatprep.mubr.msk.f32.mxu1 %vm6545_vm1, %v6546_v16 }
 0xb0c   : > { %6251 = vmatprep.subr.bf16.mxu1 %v6544_v12 }
 0xb0f   : > { %6253 = vmatpush3.bf16.msra.mxu1 %v6252_v46 }
 0xb10   : > { %5882 = vmatprep.subr.mxu1 %v6546_v16 }
 0xb12   : > { %5870 = vmatmul.mubr.msk.f32.vlgmr.msra.gmra.mrb[20].mxu1 %vm657_vm0, %v6752_v28 }
 0xb13   : > { %5884 = vmatprep.mubr.msk.f32.mxu1 %vm6545_vm1, %v6546_v16  ;;  %5883 = vmatpush3.msra.mxu1 %v5324_v15 }
 0xb14   : > { %6260 = vmatprep.subr.bf16.mxu1 %v6544_v12 }
 0xbd5   : > { %v2056_v52 = vpop.f32.mrb[16].mxu1 }
 0xbd6   : > { %v5833_v53 = vpop.f32.mrb[17].mxu1  ;;  %5837 = vmatmul.mubr.msk.f32.vlgmr.msra.gmra.mrb[16].mxu0 %vm932_vm2, %v2056_v52  ;;  %v2754_v52 = vld [vmem:[%s7681_s16 + $0x10] sm:$0xff] }
 0xbd7   : > { %6244 = vmatpush3.bf16.msra.mxu0 %v6243_v49  ;;  %5858 = vmatprep.mubr.msk.f32.mxu0 %vm6545_vm1, %v6546_v16  ;;  %v5328_v49 = vld [vmem:[%s7678_s13] ss:$0 sm:$0xff]  ;;  %v2755_v53 = vld [vmem:[%s7681_s16 + $0x18] sm:$0xff] }
 0xbd8   : > { %6245 = vmatprep.subr.bf16.mxu0 %v6544_v12 }
 0xbdb   : > { %6247 = vmatpush3.bf16.msra.mxu0 %v6246_v54  ;;  %v6264_v54 = vpack.c.bf16 %v2755_v53, %v2754_v52  ;;  %v5345_v53 = vld [vmem:[%s7724_s6 + $0x90] sm:$0xff] }
 0xbdc   : > { %5872 = vmatprep.subr.mxu0 %v6546_v16 }
 0xbdd   : > { %v2215_v55 = vpop.f32.mrb[18].mxu1 }
 0xbde   : > { %v5849_v56 = vpop.f32.mrb[19].mxu1  ;;  %5859 = vmatmul.mubr.msk.f32.vlgmr.msra.gmra.mrb[18].mxu0 %vm657_vm0, %v6752_v28  ;;  %v2216_v4 = vadd.f32 %v5305_v0, %v2215_v55  ;;  %v2756_v55 = vld [vmem:[%s7681_s16 + $0x20] sm:$0xff]  ;;  %v2762_v0 = vld [vmem:[%s7681_s16 + $0x50] sm:$0xff] }
 0xbdf   : > { %5874 = vmatprep.mubr.msk.f32.mxu0 %vm6545_vm1, %v6546_v16  ;;  %v2757_v56 = vld [vmem:[%s7681_s16 + $0x28] sm:$0xff] }
 0xbe5   : > { %v2381_v57 = vpop.f32.mrb[20].mxu1 }
 0xbe6   : > { %v5871_v58 = vpop.f32.mrb[21].mxu1  ;;  %v2382_v5 = vadd.f32 %v5319_v3, %v2381_v57  ;;  %v6267_v57 = vpack.c.bf16 %v2757_v56, %v2756_v55  ;;  %v2764_v3 = vld [vmem:[%s7681_s16 + $0x60] sm:$0xff] }
 0xbe7   : > { %v2758_v58 = vld [vmem:[%s7681_s16 + $0x30] sm:$0xff]  ;;  %v5350_v56 = vld [vmem:[%s7673_s8 + $0x80] sm:$0xff] }
 0xca9   : > { %v2131_v59 = vpop.f32.mrb[16].mxu0 }
 0xcaa   : > { %v2135_v60 = vadd.f32 %v2131_v59, %v6955_v10  ;;  %v5838_v61 = vpop.f32.mrb[17].mxu0  ;;  %v2759_v59 = vld [vmem:[%s7681_s16 + $0x38] sm:$0xff] }
 0xcab   : > { %v2760_v61 = vld [vmem:[%s7681_s16 + $0x40] sm:$0xff] }
 0xcb1   : > { %v2298_v63 = vpop.f32.mrb[18].mxu0 }
 0xcb2   : > { %v2299_v1 = vadd.f32 %v5312_v62, %v2298_v63  ;;  %v5860_v28 = vpop.f32.mrb[19].mxu0  ;;  %v2761_v62 = vld [vmem:[%s7681_s16 + $0x48] sm:$0xff] }
 0xcb3   : > { %v6273_v63 = vpack.c.bf16 %v2761_v62, %v2760_v61 }
 0xcb4   : > { %5873 = vmatpush3.xpose.msk.msra.mxu0 %vm932_vm2, %v2299_v1  ;;  %v2763_v1 = vld [vmem:[%s7681_s16 + $0x58] sm:$0xff] }
 0xcb5   : > { %5877 = vmatprep.subr.mxu0 %v6546_v16  ;;  %v6276_v28 = vpack.c.bf16 %v2763_v1, %v2762_v0  ;;  %v5348_v0 = vld [vmem:[%s7727_s7 + $0x4] ss:$0 sm:$0xff] }
 0xcb7   : > { %5875 = vmatmul.mubr.msk.f32.vlgmr.msra.gmra.mrb[20].mxu0 %vm932_vm2, %v2216_v4  ;;  %v2765_v4 = vld [vmem:[%s7681_s16 + $0x68] sm:$0xff] }
 0xcb8   : > { %5878 = vmatpush3.msra.mxu0 %v2382_v5  ;;  %5879 = vmatprep.mubr.msk.f32.mxu0 %vm6545_vm1, %v6546_v16  ;;  %v6279_v5 = vpack.c.bf16 %v2765_v4, %v2764_v3  ;;  %v5362_v3 = vld [vmem:[%s7721_s30 + $0xa8] sm:$0xff]  ;;  %v5341_v4 = vld [vmem:[%s7728_s0 + $0x4] ss:$0 sm:$0xff] }
 0xcb9   : > { %6254 = vmatprep.subr.bf16.mxu0 %v6544_v12 }
 0xd8a   : > { %v2457_v6 = vpop.f32.mrb[20].mxu0 }
 0xd8b   : > { %v5876_v7 = vpop.f32.mrb[21].mxu0  ;;  %v2461_v8 = vsel %vm932_vm2, %v2457_v6, -inf }
 0xd8c   : > { %2462 = vmax.xlane.f32.xlu0 %v2461_v8  ;;  %v2767_v7 = vld [vmem:[%s7681_s16 + $0x78] sm:$0xff] }
 0xe19   : > { %v2463_v9 = vpop.xlane.xlu0 %2462 }
 0xe1a   : > { %v2464_v10 = vsub.f32 %v2457_v6, %v2463_v9  ;;  %v2766_v6 = vld [vmem:[%s7681_s16 + $0x70] sm:$0xff]  ;;  %v5329_v9 = vld [vmem:[%s7680_s15] ss:$0 sm:$0xff] }
 0xe1b   : > { %v6282_v8 = vpack.c.bf16 %v2767_v7, %v2766_v6 }
 0xe1c   : > { %v2465_v11 = vmul.f32 1.442695, %v2464_v10 }
 0xe1e   : > { %6448 = vpow2.f32 %v2465_v11 }
 0xe28   : > { %v6449_v13 = vpop.eup %6448 }
 0xe29   : > { %v2467_v14 = vsel %vm932_vm2, %v6449_v13, 0.0 }
 0xe2a   : > { %2468 = vadd.xlane.f32.xlu1 %v2467_v14 }
 0xeb7   : > { %v2469_v17 = vpop.xlane.xlu1 %2468 }
 0xeb8   : > { %6450 = vrcp.f32 %v2469_v17 }
 0xec2   : > { %v6451_v18 = vpop.eup %6450 }
 0xec3   : > { %v2471_v19 = vmul.f32 %v6451_v18, %v6449_v13 }
 0xec5   : > { %5880 = vmatmul.mubr.msk.f32.vlgmr.msra.gmra.mrb[22].mxu0 %vm932_vm2, %v2471_v19 }
 0xec6   : > { %5895 = vmatprep.mubr.msk.f32.mxu0 %vm6545_vm1, %v6546_v16 }
 0xf98   : > { %v2541_v20 = vpop.f32.mrb[22].mxu0 }
 0xf99   : > { %v5881_v21 = vpop.f32.mrb[23].mxu0  ;;  %5885 = vmatmul.mubr.msk.f32.vlgmr.msra.gmra.mrb[22].mxu1 %vm932_vm2, %v2541_v20 }
 0xf9a   : > { %5930 = vmatprep.mubr.msk.f32.mxu1 %vm6545_vm1, %v6546_v16  ;;  %6262 = vmatpush3.bf16.msra.mxu1 %v6261_v42 }
 0xf9b   : > { %6263 = vmatprep.subr.bf16.mxu1 %v6544_v12 }
 0xf9e   : > { %6265 = vmatpush3.bf16.msra.mxu1 %v6264_v54  ;;  %v5346_v54 = vld [vmem:[%s7724_s6 + $0x98] sm:$0xff] }
 0xf9f   : > { %6266 = vmatprep.subr.bf16.mxu1 %v6544_v12  ;;  %v6294_v55 = vpack.c.bf16 %v5346_v54, %v5345_v53  ;;  %v5380_v54 = vld [vmem:[%s7674_s9 + $0x5] ss:$0 sm:$0xff] }
 0xfa2   : > { %6268 = vmatpush3.bf16.msra.mxu1 %v6267_v57  ;;  %v5351_v57 = vld [vmem:[%s7673_s8 + $0x88] sm:$0xff] }
 0xfa3   : > { %6269 = vmatprep.subr.bf16.mxu1 %v6544_v12 }
0x106c   : > { %v2616_v22 = vpop.f32.mrb[22].mxu1 }
0x106d   : > { %v2620_v23 = vadd.f32 %v2616_v22, %v2135_v60  ;;  %v5886_v24 = vpop.f32.mrb[23].mxu1  ;;  %v6270_v60 = vpack.c.bf16 %v2759_v59, %v2758_v58  ;;  %v6297_v58 = vpack.c.bf16 %v5351_v57, %v5350_v56  ;;  %v5352_v59 = vld [vmem:[%s7673_s8 + $0x90] sm:$0xff] }
0x106e   : > { %v5331_v24 = vld [vmem:[%s7682_s17] ss:$0 sm:$0xff] }
0x106f   : > { %v2621_v26 = vadd.f32 %v2620_v23, %v6714_v2  ;;  %v2660_v2 = vld [vmem:[%s7679_s14 + $0x8] sm:$0xff]  ;;  %6271 = vmatpush3.bf16.msra.mxu1 %v6270_v60  ;;  %v5353_v60 = vld [vmem:[%s7673_s8 + $0x98] sm:$0xff] }
0x1070   : > { %v6255_v36 = vpack.c.bf16 %v2660_v2, %v2659_v35  ;;  %6272 = vmatprep.subr.bf16.mxu1 %v6544_v12  ;;  %v6300_v61 = vpack.c.bf16 %v5353_v60, %v5352_v59 }
0x1071   : > { %v7065_v27 = vadd.f32 %v5326_v25, %v2621_v26 }
0x1072   : > { %6256 = vmatpush3.bf16.msra.mxu0 %v6255_v36  ;;  %v5336_v36 = vld [vmem:[%s7721_s30 + $0x80] sm:$0xff] }
0x1073   : > { %v2632_v29 = vsel %vm657_vm0, %v7065_v27, 0.0  ;;  %6257 = vmatprep.subr.bf16.mxu0 %v6544_v12  ;;  %6274 = vmatpush3.bf16.msra.mxu1 %v6273_v63 }
0x1074   : > { %2633 = vadd.xlane.f32.xlu0 %v2632_v29  ;;  %6275 = vmatprep.subr.bf16.mxu1 %v6544_v12 }
0x1076   : > { %6259 = vmatpush3.bf16.msra.mxu0 %v6258_v39  ;;  %v5339_v39 = vld [vmem:[%s7721_s30 + $0x98] sm:$0xff] }
0x1077   : > { %6284 = vmatprep.subr.bf16.mxu0 %v6544_v12  ;;  %6277 = vmatpush3.bf16.msra.mxu1 %v6276_v28  ;;  %v6288_v40 = vpack.c.bf16 %v5339_v39, %v5338_v38  ;;  %v5361_v28 = vld [vmem:[%s7721_s30 + $0xa0] sm:$0xff]  ;;  %v5369_v39 = vld [vmem:[%s7724_s6 + $0xa8] sm:$0xff] }
0x1078   : > { %6278 = vmatprep.subr.bf16.mxu1 %v6544_v12  ;;  %v6303_v7 = vpack.c.bf16 %v5362_v3, %v5361_v28  ;;  %v5368_v38 = vld [vmem:[%s7724_s6 + $0xa0] sm:$0xff] }
0x107b   : > { %6280 = vmatpush3.bf16.msra.mxu1 %v6279_v5 }
0x107c   : > { %6281 = vmatprep.subr.bf16.mxu1 %v6544_v12 }
0x107f   : > { %6283 = vmatpush3.bf16.msra.mxu1 %v6282_v8 }
0x1080   : > { %5971 = vmatprep.subr.mxu1 %v6546_v16 }
0x1101   : > { %v2634_v30 = vpop.xlane.xlu0 %2633 }
0x1102   : > { %v2635_v31 = vmul.f32 0.03125, %v2634_v30 }
0x1104   : > { %v2636_v32 = vsub.f32 %v7065_v27, %v2635_v31 }
0x1106   : > { %v2637_v33 = vmul.f32 %v2636_v32, %v2636_v32 }
0x1108   : > { %v2638_v34 = vsel %vm657_vm0, %v2637_v33, 0.0 }
0x1109   : > { %2639 = vadd.xlane.f32.xlu1 %v2638_v34 }
0x1196   : > { %v2640_v43 = vpop.xlane.xlu1 %2639 }
0x1197   : > { %v2641_v44 = vmul.f32 0.03125, %v2640_v43 }
0x1199   : > { %v2642_v45 = vadd.f32 1e-05, %v2641_v44 }
0x119b   : > { %6452 = vrsqrt.f32 %v2642_v45  ;;  %v5334_v45 = vld [vmem:[%s7723_s29 + $0x1] ss:$0 sm:$0xff] }
0x11a5   : > { %v6453_v46 = vpop.eup %6452 }
0x11a6   : > { %v2644_v48 = vmul.f32 %v6453_v46, %v2636_v32 }
0x11a8   : > { %v2651_v50 = vmul.f32 %v5327_v47, %v2644_v48  ;;  %v5343_v47 = vld [vmem:[%s7724_s6 + $0x80] sm:$0xff]  ;;  %v5344_v48 = vld [vmem:[%s7724_s6 + $0x88] sm:$0xff] }
0x11aa   : > { %v2658_v51 = vadd.f32 %v5328_v49, %v2651_v50  ;;  %v5335_v49 = vld [vmem:[%s7726_s21 + $0x1] ss:$0 sm:$0xff] }
0x11ac   : > { %5896 = vmatmul.mubr.msk.f32.vlgmr.msra.gmra.mrb[24].mxu0 %vm657_vm0, %v2658_v51  ;;  %v6291_v51 = vpack.c.bf16 %v5344_v48, %v5343_v47  ;;  %v5373_v48 = vld [vmem:[%s7727_s7 + $0x5] ss:$0 sm:$0xff] }
0x11ad   : > { %5941 = vmatprep.mubr.msk.f32.mxu0 %vm6545_vm1, %v6546_v16 }
0x127f   : > { %v2739_v10 = vpop.f32.mrb[24].mxu0 }
0x1280   : > { %v2740_v11 = vadd.f32 %v5329_v9, %v2739_v10  ;;  %v5897_v13 = vpop.f32.mrb[25].mxu0  ;;  %v5363_v9 = vld [vmem:[%s7721_s30 + $0xb0] sm:$0xff]  ;;  %v5364_v10 = vld [vmem:[%s7721_s30 + $0xb8] sm:$0xff] }
0x1281   : > { %v6306_v13 = vpack.c.bf16 %v5364_v10, %v5363_v9  ;;  %v5397_v9 = vld [vmem:[%s7724_s6 + $0xd0] sm:$0xff]  ;;  %v5398_v10 = vld [vmem:[%s7724_s6 + $0xd8] sm:$0xff] }
0x1282   : > { %v2743_v14 = vmul.f32 %v2740_v11, %v2740_v11 }
0x1284   : > { %v2744_v15 = vmul.f32 %v2743_v14, %v2740_v11 }
0x1286   : > { %v2745_v17 = vmul.f32 0.044715, %v2744_v15  ;;  %v5375_v15 = vld [vmem:[%s7673_s8 + $0xa0] sm:$0xff] }
0x1288   : > { %v2746_v18 = vadd.f32 %v2745_v17, %v2740_v11  ;;  %v5376_v17 = vld [vmem:[%s7673_s8 + $0xa8] sm:$0xff] }
0x128a   : > { %v2747_v19 = vmul.f32 0.7978846, %v2746_v18 }
0x128c   : > { %6454 = vtanh.f32 %v2747_v19 }
0x1296   : > { %v6455_v20 = vpop.eup %6454 }
0x1297   : > { %v2749_v21 = vadd.f32 1.0, %v6455_v20  ;;  %v6315_v20 = vpack.c.bf16 %v5376_v17, %v5375_v15  ;;  %v5390_v17 = vld [vmem:[%s7721_s30 + $0xd0] sm:$0xff] }
0x1299   : > { %v2750_v22 = vmul.f32 0.5, %v2749_v21  ;;  %v5377_v21 = vld [vmem:[%s7673_s8 + $0xb0] sm:$0xff] }
0x129b   : > { %v2751_v23 = vmul.f32 %v2750_v22, %v2740_v11  ;;  %v5355_v11 = vld [vmem:[%s7674_s9 + $0x4] ss:$0 sm:$0xff]  ;;  %v5378_v22 = vld [vmem:[%s7673_s8 + $0xb8] sm:$0xff] }
0x129d   : > { %5931 = vmatmul.mubr.f32.vlgmr.msra.gmra.mrb[24].mxu1 %v2751_v23  ;;  %v6318_v23 = vpack.c.bf16 %v5378_v22, %v5377_v21  ;;  %v5402_v22 = vld [vmem:[%s7673_s8 + $0xc0] sm:$0xff] }
0x129e   : > { %5973 = vmatprep.mubr.msk.f32.mxu1 %vm6545_vm1, %v6546_v16 }
0x1370   : > { %v2841_v25 = vpop.f32.mrb[24].mxu1 }
0x1371   : > { %v2842_v26 = vadd.f32 %v5331_v24, %v2841_v25  ;;  %v5932_v29 = vpop.f32.mrb[25].mxu1 }
0x1373   : > { %v7159_v30 = vadd.f32 %v2842_v26, %v7065_v27  ;;  %v5337_v27 = vld [vmem:[%s7721_s30 + $0x88] sm:$0xff] }
0x1374   : > { %v6285_v37 = vpack.c.bf16 %v5337_v27, %v5336_v36 }
0x1375   : > { %v2850_v31 = vsel %vm657_vm0, %v7159_v30, 0.0 }
0x1376   : > { %2851 = vadd.xlane.f32.xlu0 %v2850_v31  ;;  %6286 = vmatpush3.bf16.msra.mxu0 %v6285_v37 }
0x1377   : > { %6287 = vmatprep.subr.bf16.mxu0 %v6544_v12 }
0x137a   : > { %6289 = vmatpush3.bf16.msra.mxu0 %v6288_v40 }
0x137b   : > { %6290 = vmatprep.subr.bf16.mxu0 %v6544_v12 }
0x1403   : > { %v2852_v32 = vpop.xlane.xlu0 %2851 }
0x1404   : > { %v2853_v33 = vmul.f32 0.03125, %v2852_v32 }
0x1406   : > { %v2854_v34 = vsub.f32 %v7159_v30, %v2853_v33 }
0x1408   : > { %v2855_v35 = vmul.f32 %v2854_v34, %v2854_v34 }
0x140a   : > { %v2856_v2 = vsel %vm657_vm0, %v2855_v35, 0.0 }
0x140b   : > { %2857 = vadd.xlane.f32.xlu1 %v2856_v2 }
0x1498   : > { %v2858_v41 = vpop.xlane.xlu1 %2857 }
0x1499   : > { %v2859_v42 = vmul.f32 0.03125, %v2858_v41  ;;  %v6309_v41 = vpack.c.bf16 %v5369_v39, %v5368_v38  ;;  %v5393_v38 = vld [vmem:[%s7728_s0 + $0x6] ss:$0 sm:$0xff] }
0x149b   : > { %v2860_v43 = vadd.f32 1e-05, %v2859_v42 }
0x149d   : > { %6456 = vrsqrt.f32 %v2860_v43  ;;  %v5370_v43 = vld [vmem:[%s7724_s6 + $0xb0] sm:$0xff] }
0x14a7   : > { %v6457_v44 = vpop.eup %6456 }
0x14a8   : > { %v2862_v46 = vmul.f32 %v6457_v44, %v2854_v34  ;;  %v5371_v44 = vld [vmem:[%s7724_s6 + $0xb8] sm:$0xff] }
0x14aa   : > { %v2869_v50 = vmul.f32 %v5334_v45, %v2862_v46  ;;  %v6312_v45 = vpack.c.bf16 %v5371_v44, %v5370_v43 }
0x14ac   : > { %v7191_v52 = vadd.f32 %v5335_v49, %v2869_v50  ;;  %v5366_v50 = vld [vmem:[%s7728_s0 + $0x5] ss:$0 sm:$0xff] }
0x14ae   : > { %5942 = vmatmul.mubr.msk.f32.vlgmr.msra.gmra.mrb[26].mxu0 %vm657_vm0, %v7191_v52 }
0x14af   : > { %6292 = vmatpush3.bf16.msra.mxu0 %v6291_v51  ;;  %5952 = vmatprep.mubr.msk.f32.mxu0 %vm6545_vm1, %v6546_v16 }
0x14b0   : > { %6293 = vmatprep.subr.bf16.mxu0 %v6544_v12 }
0x14b3   : > { %6295 = vmatpush3.bf16.msra.mxu0 %v6294_v55 }
0x14b4   : > { %6296 = vmatprep.subr.bf16.mxu0 %v6544_v12 }
0x14b6   : > { %5953 = vmatmul.mubr.msk.f32.vlgmr.msra.gmra.mrb[28].mxu0 %vm657_vm0, %v7191_v52 }
0x14b7   : > { %6298 = vmatpush3.bf16.msra.mxu0 %v6297_v58  ;;  %5963 = vmatprep.mubr.msk.f32.mxu0 %vm6545_vm1, %v6546_v16 }
0x14b8   : > { %6299 = vmatprep.subr.bf16.mxu0 %v6544_v12 }
0x14bb   : > { %6301 = vmatpush3.bf16.msra.mxu0 %v6300_v61 }
0x14bc   : > { %5966 = vmatprep.subr.mxu0 %v6546_v16 }
0x14be   : > { %5964 = vmatmul.mubr.msk.f32.vlgmr.msra.gmra.mrb[30].mxu0 %vm657_vm0, %v7191_v52 }
0x14bf   : > { %5968 = vmatprep.mubr.msk.f32.mxu0 %vm6545_vm1, %v6546_v16 }
0x1581   : > { %v2959_v62 = vpop.f32.mrb[26].mxu0 }
0x1582   : > { %v5943_v63 = vpop.f32.mrb[27].mxu0  ;;  %v2960_v8 = vadd.f32 %v5341_v4, %v2959_v62 }
0x1589   : > { %v3042_v1 = vpop.f32.mrb[28].mxu0 }
0x158a   : > { %v3043_v5 = vadd.f32 %v5348_v0, %v3042_v1  ;;  %v5954_v6 = vpop.f32.mrb[29].mxu0  ;;  %v5385_v1 = vld [vmem:[%s7675_s10 + $0x28] sm:$0xff] }
0x158b   : > { %v5395_v6 = vld [vmem:[%s7724_s6 + $0xc0] sm:$0xff] }
0x158c   : > { %5967 = vmatpush3.xpose.msk.msra.mxu0 %vm932_vm2, %v3043_v5  ;;  %v5360_v5 = vld [vmem:[%s7675_s10 + $0x20] sm:$0xff] }
0x158d   : > { %6302 = vmatprep.subr.bf16.mxu0 %v6544_v12 }
0x158f   : > { %5969 = vmatmul.mubr.msk.f32.vlgmr.msra.gmra.mrb[32].mxu0 %vm932_vm2, %v2960_v8 }
0x1590   : > { %6304 = vmatpush3.bf16.msra.mxu0 %v6303_v7  ;;  %5984 = vmatprep.mubr.msk.f32.mxu0 %vm6545_vm1, %v6546_v16  ;;  %v5396_v7 = vld [vmem:[%s7724_s6 + $0xc8] sm:$0xff] }
0x1591   : > { %v3125_v14 = vpop.f32.mrb[30].mxu0  ;;  %6305 = vmatprep.subr.bf16.mxu0 %v6544_v12  ;;  %v6327_v8 = vpack.c.bf16 %v5396_v7, %v5395_v6  ;;  %v5421_v7 = vld [vmem:[%s7724_s6 + $0xe0] sm:$0xff] }
0x1592   : > { %v3126_v18 = vadd.f32 %v5355_v11, %v3125_v14  ;;  %v5965_v19 = vpop.f32.mrb[31].mxu0  ;;  %v6330_v11 = vpack.c.bf16 %v5398_v10, %v5397_v9  ;;  %v5389_v14 = vld [vmem:[%s7721_s30 + $0xc8] sm:$0xff]  ;;  %v5423_v10 = vld [vmem:[%s7724_s6 + $0xf0] sm:$0xff] }
0x1594   : > { %5972 = vmatpush3.msra.mxu1 %v3126_v18  ;;  %6307 = vmatpush3.bf16.msra.mxu0 %v6306_v13  ;;  %v5388_v13 = vld [vmem:[%s7721_s30 + $0xc0] sm:$0xff]  ;;  %v5391_v18 = vld [vmem:[%s7721_s30 + $0xd8] sm:$0xff] }
0x1595   : > { %6314 = vmatprep.subr.bf16.mxu0 %v6544_v12  ;;  %6308 = vmatprep.subr.bf16.mxu1 %v6544_v12  ;;  %v6321_v15 = vpack.c.bf16 %v5389_v14, %v5388_v13  ;;  %v6324_v21 = vpack.c.bf16 %v5391_v18, %v5390_v17 }
0x1597   : > { %5985 = vmatmul.mubr.msk.f32.vlgmr.msra.gmra.mrb[34].mxu0 %vm657_vm0, %v7191_v52 }
0x1598   : > { %6316 = vmatpush3.bf16.msra.mxu0 %v6315_v20  ;;  %6006 = vmatprep.mubr.msk.f32.mxu0 %vm6545_vm1, %v6546_v16 }
0x1599   : > { %6317 = vmatprep.subr.bf16.mxu0 %v6544_v12 }
0x159c   : > { %6319 = vmatpush3.bf16.msra.mxu0 %v6318_v23  ;;  %v5403_v23 = vld [vmem:[%s7673_s8 + $0xc8] sm:$0xff] }
0x159d   : > { %6019 = vmatprep.subr.mxu0 %v6546_v16 }
0x159f   : > { %6007 = vmatmul.mubr.msk.f32.vlgmr.msra.gmra.mrb[36].mxu0 %vm657_vm0, %v7191_v52 }
0x15a0   : > { %6021 = vmatprep.mubr.msk.f32.mxu0 %vm6545_vm1, %v6546_v16  ;;  %6020 = vmatpush3.msra.mxu0 %v5385_v1  ;;  %v5428_v1 = vld [vmem:[%s7673_s8 + $0xe0] sm:$0xff] }
0x15a1   : > { %6320 = vmatprep.subr.bf16.mxu0 %v6544_v12 }
0x1662   : > { %v3201_v24 = vpop.f32.mrb[32].mxu0 }
0x1663   : > { %v5970_v25 = vpop.f32.mrb[33].mxu0  ;;  %v3205_v26 = vsel %vm932_vm2, %v3201_v24, -inf }
0x1664   : > { %3206 = vmax.xlane.f32.xlu0 %v3205_v26  ;;  %v6333_v26 = vpack.c.bf16 %v5403_v23, %v5402_v22 }
0x166a   : > { %v3370_v29 = vpop.f32.mrb[34].mxu0 }
0x166b   : > { %v5986_v31 = vpop.f32.mrb[35].mxu0  ;;  %v3371_v55 = vadd.f32 %v5366_v50, %v3370_v29  ;;  %v5404_v29 = vld [vmem:[%s7673_s8 + $0xd0] sm:$0xff] }
0x166c   : > { %v5405_v31 = vld [vmem:[%s7673_s8 + $0xd8] sm:$0xff] }
0x1672   : > { %v3536_v32 = vpop.f32.mrb[36].mxu0 }
0x1673   : > { %v6008_v33 = vpop.f32.mrb[37].mxu0  ;;  %v3537_v56 = vadd.f32 %v5380_v54, %v3536_v32  ;;  %v5400_v32 = vld [vmem:[%s7727_s7 + $0x6] ss:$0 sm:$0xff] }
0x1674   : > { %v6336_v33 = vpack.c.bf16 %v5405_v31, %v5404_v29  ;;  %v5433_v31 = vld [vmem:[%s7674_s9 + $0x7] ss:$0 sm:$0xff] }
0x16f1   : > { %v3207_v34 = vpop.xlane.xlu0 %3206 }
0x16f2   : > { %v3208_v35 = vsub.f32 %v3201_v24, %v3207_v34 }
0x16f4   : > { %v3209_v2 = vmul.f32 1.442695, %v3208_v35 }
0x16f6   : > { %6458 = vpow2.f32 %v3209_v2 }
0x1700   : > { %v6459_v36 = vpop.eup %6458 }
0x1701   : > { %v3211_v27 = vsel %vm932_vm2, %v6459_v36, 0.0 }
0x1702   : > { %3212 = vadd.xlane.f32.xlu1 %v3211_v27 }
0x178f   : > { %v3213_v37 = vpop.xlane.xlu1 %3212 }
0x1790   : > { %6460 = vrcp.f32 %v3213_v37 }
0x179a   : > { %v6461_v40 = vpop.eup %6460 }
0x179b   : > { %v3215_v42 = vmul.f32 %v6461_v40, %v6459_v36 }
0x179d   : > { %5974 = vmatmul.mubr.msk.f32.vlgmr.msra.gmra.mrb[26].mxu1 %vm932_vm2, %v3215_v42  ;;  %v5407_v42 = vld [vmem:[%s7674_s9 + $0x6] ss:$0 sm:$0xff] }
0x179e   : > { %6310 = vmatpush3.bf16.msra.mxu1 %v6309_v41  ;;  %5995 = vmatprep.mubr.msk.f32.mxu1 %vm6545_vm1, %v6546_v16 }
0x179f   : > { %6311 = vmatprep.subr.bf16.mxu1 %v6544_v12 }
0x17a2   : > { %6313 = vmatpush3.bf16.msra.mxu1 %v6312_v45 }
0x17a3   : > { %6009 = vmatprep.subr.mxu1 %v6546_v16 }
0x17a5   : > { %5996 = vmatmul.mubr.msk.f32.vlgmr.msra.gmra.mrb[28].mxu1 %vm657_vm0, %v7191_v52 }
0x17a6   : > { %6011 = vmatprep.mubr.msk.f32.mxu1 %vm6545_vm1, %v6546_v16 }
0x1870   : > { %v3285_v46 = vpop.f32.mrb[26].mxu1 }
0x1871   : > { %v5975_v47 = vpop.f32.mrb[27].mxu1 }
0x1878   : > { %v3453_v49 = vpop.f32.mrb[28].mxu1 }
0x1879   : > { %v3454_v51 = vadd.f32 %v5373_v48, %v3453_v49  ;;  %v5997_v53 = vpop.f32.mrb[29].mxu1 }
0x187b   : > { %6010 = vmatpush3.xpose.msk.msra.mxu1 %vm932_vm2, %v3454_v51 }
0x187c   : > { %6014 = vmatprep.subr.mxu1 %v6546_v16 }
0x187e   : > { %6012 = vmatmul.mubr.msk.f32.vlgmr.msra.gmra.mrb[30].mxu1 %vm932_vm2, %v3371_v55  ;;  %v5412_v55 = vld [vmem:[%s7675_s10 + $0x30] sm:$0xff] }
0x187f   : > { %6015 = vmatpush3.msra.mxu1 %v3537_v56  ;;  %6016 = vmatprep.mubr.msk.f32.mxu1 %vm6545_vm1, %v6546_v16 }
0x1880   : > { %6024 = vmatprep.subr.mxu1 %v6546_v16 }
0x1951   : > { %v3612_v57 = vpop.f32.mrb[30].mxu1 }
0x1952   : > { %v6013_v58 = vpop.f32.mrb[31].mxu1  ;;  %v3616_v59 = vsel %vm932_vm2, %v3612_v57, -inf }
0x1953   : > { %3617 = vmax.xlane.f32.xlu0 %v3616_v59  ;;  %v5415_v58 = vld [vmem:[%s7721_s30 + $0xe8] sm:$0xff] }
0x19e0   : > { %v3618_v60 = vpop.xlane.xlu0 %3617 }
0x19e1   : > { %v3619_v61 = vsub.f32 %v3612_v57, %v3618_v60  ;;  %v5414_v57 = vld [vmem:[%s7721_s30 + $0xe0] sm:$0xff] }
0x19e2   : > { %v6339_v60 = vpack.c.bf16 %v5415_v58, %v5414_v57 }
0x19e3   : > { %v3620_v62 = vmul.f32 1.442695, %v3619_v61 }
0x19e5   : > { %6462 = vpow2.f32 %v3620_v62  ;;  %v5416_v62 = vld [vmem:[%s7721_s30 + $0xf0] sm:$0xff] }
0x19ef   : > { %v6463_v63 = vpop.eup %6462 }
0x19f0   : > { %v3622_v0 = vsel %vm932_vm2, %v6463_v63, 0.0 }
0x19f1   : > { %3623 = vadd.xlane.f32.xlu1 %v3622_v0 }
0x1a7e   : > { %v3624_v28 = vpop.xlane.xlu1 %3623 }
0x1a7f   : > { %6464 = vrcp.f32 %v3624_v28  ;;  %v5429_v28 = vld [vmem:[%s7673_s8 + $0xe8] sm:$0xff] }
0x1a89   : > { %v6465_v3 = vpop.eup %6464 }
0x1a8a   : > { %v3626_v4 = vmul.f32 %v6465_v3, %v6463_v63  ;;  %v5417_v63 = vld [vmem:[%s7721_s30 + $0xf8] sm:$0xff]  ;;  %v6351_v3 = vpack.c.bf16 %v5429_v28, %v5428_v1  ;;  %v5454_v1 = vld [vmem:[%s7681_s16 + $0x88] sm:$0xff] }
0x1a8b   : > { %v6342_v0 = vpack.c.bf16 %v5417_v63, %v5416_v62  ;;  %v5449_v62 = vld [vmem:[%s7679_s14 + $0x38] sm:$0xff] }
0x1a8c   : > { %6017 = vmatmul.mubr.msk.f32.vlgmr.msra.gmra.mrb[32].mxu1 %vm932_vm2, %v3626_v4  ;;  %v5430_v4 = vld [vmem:[%s7673_s8 + $0xf0] sm:$0xff] }
0x1a8d   : > { %6025 = vmatpush3.msra.mxu1 %v5360_v5  ;;  %6026 = vmatprep.mubr.msk.f32.mxu1 %vm6545_vm1, %v6546_v16  ;;  %v5431_v5 = vld [vmem:[%s7673_s8 + $0xf8] sm:$0xff] }
0x1a8e   : > { %6326 = vmatprep.subr.bf16.mxu1 %v6544_v12  ;;  %v6354_v6 = vpack.c.bf16 %v5431_v5, %v5430_v4 }
0x1a90   : > { %6027 = vmatmul.mubr.msk.f32.vlgmr.msra.gmra.mrb[34].mxu1 %vm932_vm2, %v3285_v46 }
0x1a91   : > { %6328 = vmatpush3.bf16.msra.mxu1 %v6327_v8  ;;  %6048 = vmatprep.mubr.msk.f32.mxu1 %vm6545_vm1, %v6546_v16  ;;  %v5422_v8 = vld [vmem:[%s7724_s6 + $0xe8] sm:$0xff] }
0x1a92   : > { %6329 = vmatprep.subr.bf16.mxu1 %v6544_v12  ;;  %v6345_v9 = vpack.c.bf16 %v5422_v8, %v5421_v7  ;;  %v5444_v7 = vld [vmem:[%s7677_s12 + $0x1] ss:$0 sm:$0xff] }
0x1a95   : > { %6331 = vmatpush3.bf16.msra.mxu1 %v6330_v11  ;;  %v5424_v11 = vld [vmem:[%s7724_s6 + $0xf8] sm:$0xff]  ;;  %s6486_s6 = scalar_lea.vmem %s6485_s22, 256 }
0x1a96   : > { %6062 = vmatprep.subr.mxu1 %v6546_v16  ;;  %p6488_p1 = scmp.lt.s32.totalorder %s6486_s6, %s6480_s5 }
0x1a98   : > { %6049 = vmatmul.mubr.msk.f32.vlgmr.msra.gmra.mrb[36].mxu1 %vm657_vm0, %v7191_v52  ;;  %p6489_p2 = por %p6488_p1, %p6487_p0 }
0x1a99   : > { %6064 = vmatprep.mubr.msk.f32.mxu1 %vm6545_vm1, %v6546_v16 }
0x1a9a   : > { %p6490_p3 = pnand %p6489_p2, %p6483_p13 }
0x1b5f   : > { %v3696_v19 = vpop.f32.mrb[32].mxu1 }
0x1b60   : > { %v6018_v20 = vpop.f32.mrb[33].mxu1  ;;  %6022 = vmatmul.mubr.msk.f32.vlgmr.msra.gmra.mrb[38].mxu0 %vm932_vm2, %v3696_v19 }
0x1b61   : > { %6322 = vmatpush3.bf16.msra.mxu0 %v6321_v15  ;;  %6037 = vmatprep.mubr.msk.f32.mxu0 %vm6545_vm1, %v6546_v16  ;;  %v6348_v15 = vpack.c.bf16 %v5424_v11, %v5423_v10 }
0x1b62   : > { %6323 = vmatprep.subr.bf16.mxu0 %v6544_v12 }
0x1b63   : > { %v3844_v24 = vpop.f32.mrb[34].mxu1 }
0x1b64   : > { %v6028_v25 = vpop.f32.mrb[35].mxu1 }
0x1b65   : > { %6325 = vmatpush3.bf16.msra.mxu0 %v6324_v21 }
0x1b66   : > { %6332 = vmatprep.subr.bf16.mxu0 %v6544_v12 }
0x1b68   : > { %6038 = vmatmul.mubr.msk.f32.vlgmr.msra.gmra.mrb[40].mxu0 %vm657_vm0, %v7191_v52 }
0x1b69   : > { %6334 = vmatpush3.bf16.msra.mxu0 %v6333_v26  ;;  %6059 = vmatprep.mubr.msk.f32.mxu0 %vm6545_vm1, %v6546_v16  ;;  %v5419_v26 = vld [vmem:[%s7728_s0 + $0x7] ss:$0 sm:$0xff] }
0x1b6a   : > { %6335 = vmatprep.subr.bf16.mxu0 %v6544_v12 }
0x1b6b   : > { %v4010_v34 = vpop.f32.mrb[36].mxu1 }
0x1b6c   : > { %v4011_v35 = vadd.f32 %v5400_v32, %v4010_v34  ;;  %v6050_v2 = vpop.f32.mrb[37].mxu1 }
0x1b6d   : > { %6337 = vmatpush3.bf16.msra.mxu0 %v6336_v33 }
0x1b6e   : > { %6063 = vmatpush3.xpose.msk.msra.mxu1 %vm932_vm2, %v4011_v35  ;;  %6072 = vmatprep.subr.mxu0 %v6546_v16 }
0x1b6f   : > { %6067 = vmatprep.subr.mxu1 %v6546_v16 }
0x1b70   : > { %6060 = vmatmul.mubr.msk.f32.vlgmr.msra.gmra.mrb[42].mxu0 %vm657_vm0, %v7191_v52 }
0x1b71   : > { %6074 = vmatprep.mubr.msk.f32.mxu0 %vm6545_vm1, %v6546_v16  ;;  %6073 = vmatpush3.msra.mxu0 %v5412_v55 }
0x1b72   : > { %6344 = vmatprep.subr.bf16.mxu0 %v6544_v12 }
0x1c33   : > { %v3771_v36 = vpop.f32.mrb[38].mxu0 }
0x1c34   : > { %v7394_v27 = vadd.f32 %v3844_v24, %v3771_v36  ;;  %v6023_v37 = vpop.f32.mrb[39].mxu0  ;;  %v5426_v24 = vld [vmem:[%s7727_s7 + $0x7] ss:$0 sm:$0xff]  ;;  %s7730_s7 = sld [smem:[#allocation20_spill]] }
0x1c3a   : > { %s7622_s2 = scalar_lea.hbm %s7730_s7, %s5475_s23 }
0x1c3b   : > { %v3927_v39 = vpop.f32.mrb[40].mxu0 }
0x1c3c   : > { %v3928_v40 = vadd.f32 %v5393_v38, %v3927_v39  ;;  %v6039_v41 = vpop.f32.mrb[41].mxu0 }
0x1c3e   : > { %6065 = vmatmul.mubr.msk.f32.vlgmr.msra.gmra.mrb[38].mxu1 %vm932_vm2, %v3928_v40  ;;  %v5438_v40 = vld [vmem:[%s7675_s10 + $0x38] sm:$0xff] }
0x1c3f   : > { %6069 = vmatprep.mubr.msk.f32.mxu1 %vm6545_vm1, %v6546_v16 }
0x1c43   : > { %v4093_v43 = vpop.f32.mrb[42].mxu0 }
0x1c44   : > { %v4094_v44 = vadd.f32 %v5407_v42, %v4093_v43  ;;  %v6061_v45 = vpop.f32.mrb[43].mxu0 }
0x1c46   : > { %6068 = vmatpush3.msra.mxu1 %v4094_v44 }
0x1c47   : > { %6338 = vmatprep.subr.bf16.mxu1 %v6544_v12 }
0x1d11   : > { %v4169_v46 = vpop.f32.mrb[38].mxu1 }
0x1d12   : > { %v6066_v47 = vpop.f32.mrb[39].mxu1  ;;  %v4173_v48 = vsel %vm932_vm2, %v4169_v46, -inf }
0x1d13   : > { %4174 = vmax.xlane.f32.xlu0 %v4173_v48 }
0x1da0   : > { %v4175_v49 = vpop.xlane.xlu0 %4174 }
0x1da1   : > { %v4176_v50 = vsub.f32 %v4169_v46, %v4175_v49  ;;  %v5441_v49 = vld [vmem:[%s7676_s11 + $0x1] ss:$0 sm:$0xff] }
0x1da3   : > { %v4177_v51 = vmul.f32 1.442695, %v4176_v50 }
0x1da5   : > { %6466 = vpow2.f32 %v4177_v51 }
0x1daf   : > { %v6467_v53 = vpop.eup %6466 }
0x1db0   : > { %v4179_v54 = vsel %vm932_vm2, %v6467_v53, 0.0 }
0x1db1   : > { %4180 = vadd.xlane.f32.xlu1 %v4179_v54 }
0x1e3e   : > { %v4181_v56 = vpop.xlane.xlu1 %4180 }
0x1e3f   : > { %6468 = vrcp.f32 %v4181_v56 }
0x1e49   : > { %v6469_v59 = vpop.eup %6468 }
0x1e4a   : > { %v4183_v61 = vmul.f32 %v6469_v59, %v6467_v53  ;;  %v5446_v59 = vld [vmem:[%s7679_s14 + $0x20] sm:$0xff] }
0x1e4c   : > { %6070 = vmatmul.mubr.msk.f32.vlgmr.msra.gmra.mrb[40].mxu1 %vm932_vm2, %v4183_v61  ;;  %v5448_v61 = vld [vmem:[%s7679_s14 + $0x30] sm:$0xff] }
0x1e4d   : > { %6340 = vmatpush3.bf16.msra.mxu1 %v6339_v60  ;;  %6085 = vmatprep.mubr.msk.f32.mxu1 %vm6545_vm1, %v6546_v16  ;;  %v6360_v63 = vpack.c.bf16 %v5449_v62, %v5448_v61  ;;  %v5082_v62 = vld [vmem:[%s7685_s20 + $0x18] sm:$0xff] }
0x1e4e   : > { %6341 = vmatprep.subr.bf16.mxu1 %v6544_v12 }
0x1e51   : > { %6343 = vmatpush3.bf16.msra.mxu1 %v6342_v0  ;;  %v5453_v0 = vld [vmem:[%s7681_s16 + $0x80] sm:$0xff] }
0x1e52   : > { %6350 = vmatprep.subr.bf16.mxu1 %v6544_v12  ;;  %v6363_v28 = vpack.c.bf16 %v5454_v1, %v5453_v0 }
0x1e54   : > { %6086 = vmatmul.mubr.msk.f32.vlgmr.msra.gmra.mrb[42].mxu1 %vm657_vm0, %v7191_v52 }
0x1e55   : > { %6352 = vmatpush3.bf16.msra.mxu1 %v6351_v3  ;;  %6107 = vmatprep.mubr.msk.f32.mxu1 %vm6545_vm1, %v6546_v16 }
0x1e56   : > { %6353 = vmatprep.subr.bf16.mxu1 %v6544_v12 }
0x1e59   : > { %6355 = vmatpush3.bf16.msra.mxu1 %v6354_v6 }
0x1e5a   : > { %6120 = vmatprep.subr.mxu1 %v6546_v16 }
0x1e5c   : > { %6108 = vmatmul.mubr.msk.f32.vlgmr.msra.gmra.mrb[44].mxu1 %vm657_vm0, %v7191_v52 }
0x1e5d   : > { %6122 = vmatprep.mubr.msk.f32.mxu1 %vm6545_vm1, %v6546_v16  ;;  %6121 = vmatpush3.msra.mxu1 %v5438_v40 }
0x1e5e   : > { %6362 = vmatprep.subr.bf16.mxu1 %v6544_v12 }
0x1f1f   : > { %v4253_v13 = vpop.f32.mrb[40].mxu1 }
0x1f20   : > { %v6071_v14 = vpop.f32.mrb[41].mxu1  ;;  %6075 = vmatmul.mubr.msk.f32.vlgmr.msra.gmra.mrb[44].mxu0 %vm932_vm2, %v4253_v13  ;;  %v5455_v13 = vld [vmem:[%s7681_s16 + $0x90] sm:$0xff] }
0x1f21   : > { %6346 = vmatpush3.bf16.msra.mxu0 %v6345_v9  ;;  %6096 = vmatprep.mubr.msk.f32.mxu0 %vm6545_vm1, %v6546_v16  ;;  %v5445_v9 = vld [vmem:[%s7678_s13 + $0x1] ss:$0 sm:$0xff]  ;;  %v5456_v14 = vld [vmem:[%s7681_s16 + $0x98] sm:$0xff] }
0x1f22   : > { %6347 = vmatprep.subr.bf16.mxu0 %v6544_v12 }
0x1f25   : > { %6349 = vmatpush3.bf16.msra.mxu0 %v6348_v15  ;;  %v6366_v15 = vpack.c.bf16 %v5456_v14, %v5455_v13 }
0x1f26   : > { %6110 = vmatprep.subr.mxu0 %v6546_v16 }
0x1f27   : > { %v4412_v17 = vpop.f32.mrb[42].mxu1 }
0x1f28   : > { %v6087_v18 = vpop.f32.mrb[43].mxu1  ;;  %6097 = vmatmul.mubr.msk.f32.vlgmr.msra.gmra.mrb[46].mxu0 %vm657_vm0, %v7191_v52  ;;  %v4413_v32 = vadd.f32 %v5419_v26, %v4412_v17  ;;  %v5457_v17 = vld [vmem:[%s7681_s16 + $0xa0] sm:$0xff]  ;;  %v5464_v26 = vld [vmem:[%s7681_s16 + $0xd8] sm:$0xff] }
0x1f29   : > { %6112 = vmatprep.mubr.msk.f32.mxu0 %vm6545_vm1, %v6546_v16 }
0x1f2f   : > { %v4578_v19 = vpop.f32.mrb[44].mxu1 }
0x1f30   : > { %v6109_v20 = vpop.f32.mrb[45].mxu1  ;;  %v4579_v33 = vadd.f32 %v5433_v31, %v4578_v19  ;;  %v5459_v19 = vld [vmem:[%s7681_s16 + $0xb0] sm:$0xff]  ;;  %v5466_v31 = vld [vmem:[%s7681_s16 + $0xe8] sm:$0xff] }
0x1f31   : > { %v5460_v20 = vld [vmem:[%s7681_s16 + $0xb8] sm:$0xff] }
0x1ff3   : > { %v4328_v21 = vpop.f32.mrb[44].mxu0 }
0x1ff4   : > { %v4332_v22 = vadd.f32 %v4328_v21, %v7394_v27  ;;  %v6076_v23 = vpop.f32.mrb[45].mxu0  ;;  %v6372_v21 = vpack.c.bf16 %v5460_v20, %v5459_v19 }
0x1ff5   : > { %v5462_v23 = vld [vmem:[%s7681_s16 + $0xc8] sm:$0xff] }
0x1ffb   : > { %v4495_v25 = vpop.f32.mrb[46].mxu0 }
0x1ffc   : > { %v4496_v29 = vadd.f32 %v5426_v24, %v4495_v25  ;;  %v6098_v52 = vpop.f32.mrb[47].mxu0  ;;  %v5463_v25 = vld [vmem:[%s7681_s16 + $0xd0] sm:$0xff] }
0x1ffd   : > { %v5465_v52 = vld [vmem:[%s7681_s16 + $0xe0] sm:$0xff] }
0x1ffe   : > { %6111 = vmatpush3.xpose.msk.msra.mxu0 %vm932_vm2, %v4496_v29  ;;  %v6378_v29 = vpack.c.bf16 %v5464_v26, %v5463_v25 }
0x1fff   : > { %6115 = vmatprep.subr.mxu0 %v6546_v16 }
0x2001   : > { %6113 = vmatmul.mubr.msk.f32.vlgmr.msra.gmra.mrb[48].mxu0 %vm932_vm2, %v4413_v32  ;;  %v6381_v32 = vpack.c.bf16 %v5466_v31, %v5465_v52 }
0x2002   : > { %6116 = vmatpush3.msra.mxu0 %v4579_v33  ;;  %6117 = vmatprep.mubr.msk.f32.mxu0 %vm6545_vm1, %v6546_v16  ;;  %v5467_v33 = vld [vmem:[%s7681_s16 + $0xf0] sm:$0xff] }
0x2003   : > { %6356 = vmatprep.subr.bf16.mxu0 %v6544_v12 }
0x20d4   : > { %v4654_v34 = vpop.f32.mrb[48].mxu0 }
0x20d5   : > { %v6114_v35 = vpop.f32.mrb[49].mxu0  ;;  %v4658_v2 = vsel %vm932_vm2, %v4654_v34, -inf }
0x20d6   : > { %4659 = vmax.xlane.f32.xlu0 %v4658_v2  ;;  %v5451_v2 = vld [vmem:[%s7680_s15 + $0x1] ss:$0 sm:$0xff] }
0x2163   : > { %v4660_v36 = vpop.xlane.xlu0 %4659 }
0x2164   : > { %v4661_v27 = vsub.f32 %v4654_v34, %v4660_v36  ;;  %v5468_v34 = vld [vmem:[%s7681_s16 + $0xf8] sm:$0xff] }
0x2165   : > { %v6384_v35 = vpack.c.bf16 %v5468_v34, %v5467_v33 }
0x2166   : > { %v4662_v37 = vmul.f32 1.442695, %v4661_v27 }
0x2168   : > { %6470 = vpow2.f32 %v4662_v37 }
0x2172   : > { %v6471_v38 = vpop.eup %6470 }
0x2173   : > { %v4664_v39 = vsel %vm932_vm2, %v6471_v38, 0.0 }
0x2174   : > { %4665 = vadd.xlane.f32.xlu1 %v4664_v39 }
0x2201   : > { %v4666_v41 = vpop.xlane.xlu1 %4665 }
0x2202   : > { %6472 = vrcp.f32 %v4666_v41 }
0x220c   : > { %v6473_v42 = vpop.eup %6472 }
0x220d   : > { %v4668_v43 = vmul.f32 %v6473_v42, %v6471_v38 }
0x220f   : > { %6118 = vmatmul.mubr.msk.f32.vlgmr.msra.gmra.mrb[50].mxu0 %vm932_vm2, %v4668_v43 }
0x2210   : > { %6133 = vmatprep.mubr.msk.f32.mxu0 %vm6545_vm1, %v6546_v16 }
0x22e2   : > { %v4738_v44 = vpop.f32.mrb[50].mxu0 }
0x22e3   : > { %v6119_v45 = vpop.f32.mrb[51].mxu0  ;;  %6123 = vmatmul.mubr.msk.f32.vlgmr.msra.gmra.mrb[46].mxu1 %vm932_vm2, %v4738_v44 }
0x22e4   : > { %6168 = vmatprep.mubr.msk.f32.mxu1 %vm6545_vm1, %v6546_v16  ;;  %6364 = vmatpush3.bf16.msra.mxu1 %v6363_v28 }
0x22e5   : > { %6365 = vmatprep.subr.bf16.mxu1 %v6544_v12 }
0x22e8   : > { %6367 = vmatpush3.bf16.msra.mxu1 %v6366_v15 }
0x22e9   : > { %6368 = vmatprep.subr.bf16.mxu1 %v6544_v12 }
0x23b6   : > { %v4813_v46 = vpop.f32.mrb[46].mxu1 }
0x23b7   : > { %v4817_v47 = vadd.f32 %v4813_v46, %v4332_v22  ;;  %v6124_v48 = vpop.f32.mrb[47].mxu1  ;;  %v5461_v22 = vld [vmem:[%s7681_s16 + $0xc0] sm:$0xff] }
0x23b8   : > { %v6375_v24 = vpack.c.bf16 %v5462_v23, %v5461_v22 }
0x23b9   : > { %v4818_v50 = vadd.f32 %v4817_v47, %v7159_v30  ;;  %v5447_v30 = vld [vmem:[%s7679_s14 + $0x28] sm:$0xff]  ;;  %v5470_v47 = vld [vmem:[%s7682_s17 + $0x1] ss:$0 sm:$0xff] }
0x23ba   : > { %v6357_v60 = vpack.c.bf16 %v5447_v30, %v5446_v59  ;;  %v5079_v30 = vld [vmem:[%s7685_s20] sm:$0xff] }
0x23bb   : > { %v7504_v51 = vadd.f32 %v5441_v49, %v4818_v50 }
0x23bc   : > { %6358 = vmatpush3.bf16.msra.mxu0 %v6357_v60  ;;  %v5080_v60 = vld [vmem:[%s7685_s20 + $0x8] sm:$0xff] }
0x23bd   : > { %v4832_v53 = vsel %vm657_vm0, %v7504_v51, 0.0  ;;  %6359 = vmatprep.subr.bf16.mxu0 %v6544_v12  ;;  %v6387_v61 = vpack.c.bf16 %v5080_v60, %v5079_v30 }
0x23be   : > { %4833 = vadd.xlane.f32.xlu0 %v4832_v53 }
0x23c0   : > { %6361 = vmatpush3.bf16.msra.mxu0 %v6360_v63 }
0x23c1   : > { %6386 = vmatprep.subr.bf16.mxu0 %v6544_v12 }
0x244b   : > { %v4834_v54 = vpop.xlane.xlu0 %4833 }
0x244c   : > { %v4835_v55 = vmul.f32 0.03125, %v4834_v54 }
0x244e   : > { %v4836_v56 = vsub.f32 %v7504_v51, %v4835_v55 }
0x2450   : > { %v4837_v57 = vmul.f32 %v4836_v56, %v4836_v56 }
0x2452   : > { %v4838_v58 = vsel %vm657_vm0, %v4837_v57, 0.0 }
0x2453   : > { %4839 = vadd.xlane.f32.xlu1 %v4838_v58 }
0x24e0   : > { %v4840_v3 = vpop.xlane.xlu1 %4839 }
0x24e1   : > { %v4841_v4 = vmul.f32 0.03125, %v4840_v3 }
0x24e3   : > { %v4842_v5 = vadd.f32 1e-05, %v4841_v4 }
0x24e5   : > { %6474 = vrsqrt.f32 %v4842_v5  ;;  %v5472_v5 = vld [vmem:[%s7684_s19] ss:$0 sm:$0xff] }
0x24ef   : > { %v6475_v6 = vpop.eup %6474 }
0x24f0   : > { %v4844_v8 = vmul.f32 %v6475_v6, %v4836_v56 }
0x24f2   : > { %v4851_v10 = vmul.f32 %v5444_v7, %v4844_v8 }
0x24f4   : > { %v4858_v11 = vadd.f32 %v5445_v9, %v4851_v10 }
0x24f6   : > { %6134 = vmatmul.mubr.msk.f32.vlgmr.msra.gmra.mrb[52].mxu0 %vm657_vm0, %v4858_v11 }
0x24f7   : > { %6179 = vmatprep.mubr.msk.f32.mxu0 %vm6545_vm1, %v6546_v16  ;;  %v5458_v16 = vld [vmem:[%s7681_s16 + $0xa8] sm:$0xff]  ;;  %6388 = vmatpush3.bf16.msra.mxu0 %v6387_v61 }
0x24f8   : > { %v6369_v18 = vpack.c.bf16 %v5458_v16, %v5457_v17  ;;  %6389 = vmatprep.subr.bf16.mxu0 %v6544_v12 }
0x24fa   : > { %6370 = vmatpush3.bf16.msra.mxu1 %v6369_v18 }
0x24fb   : > { %6371 = vmatprep.subr.bf16.mxu1 %v6544_v12 }
0x24fe   : > { %6373 = vmatpush3.bf16.msra.mxu1 %v6372_v21 }
0x24ff   : > { %6374 = vmatprep.subr.bf16.mxu1 %v6544_v12 }
0x2502   : > { %6376 = vmatpush3.bf16.msra.mxu1 %v6375_v24 }
0x2503   : > { %6377 = vmatprep.subr.bf16.mxu1 %v6544_v12 }
0x2506   : > { %6379 = vmatpush3.bf16.msra.mxu1 %v6378_v29 }
0x2507   : > { %6380 = vmatprep.subr.bf16.mxu1 %v6544_v12 }
0x250a   : > { %6382 = vmatpush3.bf16.msra.mxu1 %v6381_v32 }
0x250b   : > { %6383 = vmatprep.subr.bf16.mxu1 %v6544_v12  ;;  %v5471_v12 = vld [vmem:[%s7683_s18] ss:$0 sm:$0xff] }
0x250e   : > { %6385 = vmatpush3.bf16.msra.mxu1 %v6384_v35 }
0x25c9   : > { %v4941_v36 = vpop.f32.mrb[52].mxu0 }
0x25ca   : > { %v4942_v27 = vadd.f32 %v5451_v2, %v4941_v36  ;;  %v6135_v37 = vpop.f32.mrb[53].mxu0 }
0x25cc   : > { %v4945_v38 = vmul.f32 %v4942_v27, %v4942_v27 }
0x25ce   : > { %v4946_v39 = vmul.f32 %v4945_v38, %v4942_v27 }
0x25d0   : > { %v4947_v40 = vmul.f32 0.044715, %v4946_v39 }
0x25d2   : > { %v4948_v41 = vadd.f32 %v4947_v40, %v4942_v27 }
0x25d4   : > { %v4949_v42 = vmul.f32 0.7978846, %v4948_v41 }
0x25d6   : > { %6476 = vtanh.f32 %v4949_v42 }
0x25e0   : > { %v6477_v43 = vpop.eup %6476 }
0x25e1   : > { %v4951_v44 = vadd.f32 1.0, %v6477_v43 }
0x25e3   : > { %v4952_v45 = vmul.f32 0.5, %v4951_v44 }
0x25e5   : > { %v4953_v46 = vmul.f32 %v4952_v45, %v4942_v27 }
0x25e7   : > { %6169 = vmatmul.mubr.f32.vlgmr.msra.gmra.mrb[48].mxu1 %v4953_v46 }
0x26ba   : > { %v5045_v48 = vpop.f32.mrb[48].mxu1 }
0x26bb   : > { %v5046_v49 = vadd.f32 %v5470_v47, %v5045_v48  ;;  %v6170_v50 = vpop.f32.mrb[49].mxu1 }
0x26bd   : > { %v5049_v53 = vadd.f32 %v5046_v49, %v7504_v51  ;;  %v5081_v51 = vld [vmem:[%s7685_s20 + $0x10] sm:$0xff] }
0x26be   : > { %v6390_v63 = vpack.c.bf16 %v5082_v62, %v5081_v51 }
0x26bf   : > { %v5052_v54 = vsel %vm657_vm0, %v5049_v53, 0.0 }
0x26c0   : > { %5053 = vadd.xlane.f32.xlu0 %v5052_v54  ;;  %6391 = vmatpush3.bf16.msra.mxu0 %v6390_v63 }
0x274d   : > { %v5054_v55 = vpop.xlane.xlu0 %5053 }
0x274e   : > { %v5055_v56 = vmul.f32 0.03125, %v5054_v55 }
0x2750   : > { %v5056_v57 = vsub.f32 %v5049_v53, %v5055_v56 }
0x2752   : > { %v5057_v58 = vmul.f32 %v5056_v57, %v5056_v57 }
0x2754   : > { %v5058_v59 = vsel %vm657_vm0, %v5057_v58, 0.0 }
0x2755   : > { %5059 = vadd.xlane.f32.xlu1 %v5058_v59 }
0x27e2   : > { %v5060_v0 = vpop.xlane.xlu1 %5059 }
0x27e3   : > { %v5061_v1 = vmul.f32 0.03125, %v5060_v0 }
0x27e5   : > { %v5062_v28 = vadd.f32 1e-05, %v5061_v1 }
0x27e7   : > { %6478 = vrsqrt.f32 %v5062_v28 }
0x27f1   : > { %v6479_v3 = vpop.eup %6478 }
0x27f2   : > { %v5064_v4 = vmul.f32 %v6479_v3, %v5056_v57 }
0x27f4   : > { %v5071_v6 = vmul.f32 %v5471_v12, %v5064_v4 }
0x27f6   : > { %v5078_v7 = vadd.f32 %v5472_v5, %v5071_v6 }
0x27f8   : > { %6180 = vmatmul.mubr.msk.f32.vlgmr.msra.gmra.mrb[54].mxu0 %vm657_vm0, %v5078_v7 }
0x28cb   : > { %v5152_v8 = vpop.f32.mrb[54].mxu0 }
0x28cc   : > { %5156 = vst.msk [vmem:[%s647_s24] sm:$0xff] %vm657_vm0, %v5152_v8  ;;  %v6181_v9 = vpop.f32.mrb[55].mxu0 }
0x28cd   : > { %6493 = shalt.err (!%p6490_p3)
}
0x28ce   : > { %s6494_s0 = scalar_lea.hbm %s7622_s2, 128  ;;  %s6498_s23 = scalar_lea.hbm %s7730_s7, 256 }
0x28cf   : > { %p6495_p4 = scmp.ne.s32.totalorder %s7622_s2, %s6494_s0  ;;  %p6499_p9 = scmp.lt.u32.totalorder %s7622_s2, %s7730_s7 }
0x28d0   : > { %p6500_p10 = scmp.lt.u32.totalorder %s6498_s23, %s6494_s0  ;;  %p6502_p12 = scmp.lt.u32.totalorder %s6494_s0, %s7622_s2 }
0x28d1   : > { %p6496_p7 = pnand %p6495_p4, %p6696_p5 }
0x28d2   : > { %p6501_p11 = por %p6500_p10, %p6499_p9 }
0x28d3   : > { %p6497_p8 = pneg %p6496_p7 }
0x28d4   : > { %p6503_p13 = por %p6502_p12, %p6501_p11 }
0x28d6   : > { %p6504_p0 = pnand %p6503_p13, %p6497_p8 }
0x28d8   : > { %6507 = shalt.err (!%p6504_p0)
}
0x28d9   : > { %6392 = dma.vmem_to_hbm [thread:$0]  (%p6696_p5), %s7624_s26, 128, %s7622_s2, %s5158_s27  }
0x28da PF: > { %s7731_s5 = sld [smem:[#allocation7_spill]]  ;;  %s7732_s22 = sld [smem:[#allocation5_spill]] }
0x28e0   : > { %p6398_p1 = scmp.ge.s32.totalorder %s7731_s5, 2  ;;  %s5183_s28 = sand.u32 1, %s7732_s22  }
0x28e1   : > { %s5184_s4 = scalar_lea.sflag [#allocation3], %s5183_s28 }
0x28e2   : > { %p6395_p2 = pnand %p6398_p1, %p6700_p6 }
0x28e4   : > { %6525 = dma.done.wait (!%p6395_p2), %s5184_s4, 128  }
0x28e5   : > { %6527 = vsyncadd (!%p6395_p2), %s5184_s4, 4294967168  ;;  %s7734_s27 = sld [smem:[#allocation8_spill]]  ;;  %s7735_s0 = sld [smem:[#allocation6_spill]] }
0x28e6   : > { %s7736_s26 = sld [smem:[#allocation9_spill]]  ;;  %s7737_s2 = smov %s6534_s25 }
0x28eb   : > { %p31_p3 = scmp.ge.s32.totalorder %s7734_s27, 4   ;;  %s7738_s25 = smov %s7735_s0 }
0x28ed   :  { %33 = sbr.rel (!%p31_p3) target bundleno = 13 (0xd), region = 197 }
0x28f4   :  { %5189 = vsyncpa [#allocation3], 1 }
0x28f5   :  { %5191 = vsyncpa [#allocation3 + $0x1], 1 }

</bundles_post_ra>
